<compile_context>
chip_gen: v5e
topology: v5e:2x2
jax: 0.10.0
libtpu: 0.0.40
codegen_flags: <defaults>
</compile_context>

<pallas_src>
import functools

import jax
import jax.numpy as jnp
from jax.experimental import pallas as pl
from jax.experimental.pallas import tpu as pltpu


# ----------------------------------------------------------------------------------- #
# Hardware / feature probes (evaluated once, outside the real kernel execution path).  #
# ----------------------------------------------------------------------------------- #

def _gate_act_dtype():
    """bf16 gate nonlinearities on chips with packed-bf16 VPU/EUP (v6e/v7x); f32 else."""
    try:
        kind = jax.devices()[0].device_kind.lower()
    except Exception:
        return jnp.bfloat16
    if any(tag in kind for tag in ("v2", "v3", "v4", "v5")):
        return jnp.float32
    return jnp.bfloat16


def _usable_vmem_bytes():
    """Physical VMEM capacity with compiler headroom (~56 MiB on v7x, ~112 MiB v5e/v6e)."""
    try:
        cap = int(pltpu.get_tpu_info().vmem_capacity_bytes)
    except Exception:
        cap = 64 << 20
    return max(32 << 20, (cap * 7) // 8)


@functools.lru_cache(maxsize=1)
def _supports_buffered_const_blocks():
    """True if this jax build lowers pipeline_mode=pl.Buffered(1) on pallas_call
    BlockSpecs.  Detected by compiling a tiny probe (no real-kernel execution)."""
    if not hasattr(pl, "Buffered"):
        return False
    try:
        def _probe(x_ref, w_ref, o_ref):
            o_ref[...] = x_ref[...] + w_ref[...]

        call = pl.pallas_call(
            _probe,
            out_shape=jax.ShapeDtypeStruct((16, 128), jnp.float32),
            grid_spec=pltpu.PrefetchScalarGridSpec(
                num_scalar_prefetch=0,
                grid=(2,),
                in_specs=[
                    pl.BlockSpec((8, 128), lambda i: (i, 0)),
                    pl.BlockSpec((8, 128), lambda i: (0, 0),
                                 pipeline_mode=pl.Buffered(1)),
                ],
                out_specs=pl.BlockSpec((8, 128), lambda i: (i, 0)),
            ),
        )
        x_s = jax.ShapeDtypeStruct((16, 128), jnp.float32)
        w_s = jax.ShapeDtypeStruct((8, 128), jnp.float32)
        jax.jit(call).lower(x_s, w_s).compile()
        return True
    except Exception:  # feature probe only; the real kernel is never (re-)executed here
        return False


# ----------------------------------------------------------------------------------- #
# Kernel                                                                                #
# ----------------------------------------------------------------------------------- #

def _lstm_fe_kernel(x_ref, *rest, num_layers, hidden_dim, chunk_rows, act_dtype):
    """Fused seq_len==1 bidirectional multi-layer LSTM + final Linear.

    rest = (Wg_0, bg_0, ..., Wg_{L-1}, bg_{L-1}, W_fcb, b_fcb, o_ref)
    Gate weights Wg_l are (in_l, 3*H) with column blocks [i_f|i_b|g_f|g_b|o_f|o_b];
    the 0.5 sigmoid-input pre-scale is already folded into the i/o columns + biases.
    """
    n_params = 2 * num_layers + 2
    param_refs = rest[:n_params]
    o_ref = rest[n_params]
    H = hidden_dim
    n_chunks = x_ref.shape[0] // chunk_rows

    # Batch sub-tiles: the MXU matmul of chunk m+1 overlaps the VPU/EUP gate math of
    # chunk m (statically unrolled, scheduler co-issues vmatmul with the epilogue).
    h_chunks = [x_ref[pl.ds(m * chunk_rows, chunk_rows), :].astype(jnp.bfloat16)
                for m in range(n_chunks)]

    for l in range(num_layers):
        w = param_refs[2 * l][...]
        b = param_refs[2 * l + 1][...]
        nxt = []
        for m in range(n_chunks):
            gates = (jnp.dot(h_chunks[m], w, preferred_element_type=jnp.float32)
                     + b).astype(act_dtype)
            # sigmoid(z) = 0.5*(tanh(0.5*z)+1); the inner 0.5 is folded into the weights.
            i = 0.5 * (jnp.tanh(gates[:, 0:H]) + 1.0)
            g = jnp.tanh(gates[:, H:2 * H])
            o = 0.5 * (jnp.tanh(gates[:, 2 * H:3 * H]) + 1.0)
            # c = i*g (forget*c0 == 0), h = o*tanh(c); carried directly as bf16 so the
            # next layer's matmul consumes it without a VMEM scratch round-trip.
            nxt.append((o * jnp.tanh(i * g)).astype(jnp.bfloat16))
        h_chunks = nxt

    wf = param_refs[2 * num_layers]
    bf = param_refs[2 * num_layers + 1]
    for m in range(n_chunks):
        out = jnp.dot(h_chunks[m], wf[...], preferred_element_type=jnp.float32) + bf[...]
        o_ref[pl.ds(m * chunk_rows, chunk_rows), :] = out.astype(o_ref.dtype)


# ----------------------------------------------------------------------------------- #
# Wrapper                                                                               #
# ----------------------------------------------------------------------------------- #

def lstm_feature_extractor_forward(x, params, *, block_b=None, chunk_rows=128):
    """x: (batch, input_dim) float32; params from prepare_params().  Pure / jittable."""
    gate_w = params["gate_w"]
    gate_b = params["gate_b"]
    fcb_w = params["fcb_w"]
    fcb_b = params["fcb_b"]
    num_layers = len(gate_w)
    H = fcb_w.shape[1]
    B, in_dim = x.shape
    in_dim_pad = gate_w[0].shape[0]          # layer-0 K already padded to 128 multiple

    if block_b is None:
        # Big tiles amortize per-grid-step overhead and weight re-streaming; keep
        # >= 2 grid steps when the batch allows it so both v7x TensorCores get work.
        block_b = 512
        while block_b > 128 and pl.cdiv(B, block_b) < 2:
            block_b //= 2
    block_b = max(chunk_rows, block_b)
    assert block_b % chunk_rows == 0, "block_b must be a multiple of chunk_rows"

    # Zero-pad batch to the tile and layer-0 features to the padded K the weights use.
    B_pad = block_b * pl.cdiv(B, block_b)
    pad_b, pad_k = B_pad - B, in_dim_pad - in_dim
    if pad_b or pad_k:
        x = jnp.pad(x, ((0, pad_b), (0, pad_k)))

    flat_params = []
    for w, b in zip(gate_w, gate_b):
        flat_params += [w, b]
    flat_params += [fcb_w, fcb_b]

    buffered = _supports_buffered_const_blocks()

    # VMEM budget: resident params (single- or double-buffered), double-buffered x/out
    # pipeline tiles, the per-chunk f32 gates + i/g/o temporaries, carried activations.
    param_bytes = sum(int(a.size) * a.dtype.itemsize for a in flat_params)
    param_resident = param_bytes * (1 if buffered else 2)
    io_bytes = 2 * block_b * (in_dim_pad + H) * 4
    gates_bytes = 2 * chunk_rows * 3 * H * 4
    h_bytes = 2 * block_b * max(in_dim_pad, H) * 2
    needed = param_resident + io_bytes + gates_bytes + h_bytes + (6 << 20)
    vmem_limit = int(max(32 << 20, min(needed, _usable_vmem_bytes())))

    const_specs = []
    for a in flat_params:
        if buffered:
            # Grid-constant blocks: single-buffer so the resident parameter stack is
            # not doubled in VMEM (matters at hidden_dim=1024 / 5 layers on v7x).
            const_specs.append(pl.BlockSpec(a.shape, lambda i: (0, 0),
                                            pipeline_mode=pl.Buffered(1)))
        else:
            # TODO(synk): on v7x at the full config, double-buffered weights may exceed
            # VMEM; prefer memory_space=pl.ANY + a one-time manual copy in that case.
            const_specs.append(pl.BlockSpec(a.shape, lambda i: (0, 0)))

    kernel = functools.partial(
        _lstm_fe_kernel, num_layers=num_layers, hidden_dim=H,
        chunk_rows=chunk_rows, act_dtype=_gate_act_dtype())

    out = pl.pallas_call(
        kernel,
        out_shape=jax.ShapeDtypeStruct((B_pad, H), x.dtype),
        grid_spec=pltpu.PrefetchScalarGridSpec(
            num_scalar_prefetch=0,
            grid=(B_pad // block_b,),
            in_specs=[pl.BlockSpec((block_b, in_dim_pad), lambda i: (i, 0))] + const_specs,
            out_specs=pl.BlockSpec((block_b, H), lambda i: (i, 0)),
        ),
        compiler_params=pltpu.CompilerParams(
            dimension_semantics=("parallel",),
            vmem_limit_bytes=vmem_limit,
        ),
    )(x, *flat_params)

    return out[:B]


# ----------------------------------------------------------------------------------- #
# Parameter construction (PyTorch layout) and packing                                  #
# ----------------------------------------------------------------------------------- #

def init_lstm_feature_extractor(key, input_dim, num_layers, hidden_dim, bdrnn=True):
    """PyTorch-layout parameters with default-init distributions.

    nn.LSTM params ~ U(+-1/sqrt(Hh)) with Hh = hidden_dim//2 (bidirectional);
    nn.Linear(hidden_dim, hidden_dim) ~ U(+-1/sqrt(hidden_dim)).
    """
    assert bdrnn, "module default (bdrnn=True) only"
    assert hidden_dim % 2 == 0
    Hh = hidden_dim // 2
    k_lstm = 1.0 / (Hh ** 0.5)
    k_fcb = 1.0 / (hidden_dim ** 0.5)

    layers = []
    for l in range(num_layers):
        in_l = input_dim if l == 0 else hidden_dim
        layer = {}
        for d in ("fwd", "bwd"):
            key, k1, k2, k3, k4 = jax.random.split(key, 5)
            w_ih = jax.random.uniform(k1, (4 * Hh, in_l), jnp.float32, -k_lstm, k_lstm)
            w_hh = jax.random.uniform(k2, (4 * Hh, Hh), jnp.float32, -k_lstm, k_lstm)
            b_ih = jax.random.uniform(k3, (4 * Hh,), jnp.float32, -k_lstm, k_lstm)
            b_hh = jax.random.uniform(k4, (4 * Hh,), jnp.float32, -k_lstm, k_lstm)
            layer[d] = (w_ih, w_hh, b_ih, b_hh)
        layers.append(layer)

    key, k1, k2 = jax.random.split(key, 3)
    fcb_w = jax.random.uniform(k1, (hidden_dim, hidden_dim), jnp.float32, -k_fcb, k_fcb)
    fcb_b = jax.random.uniform(k2, (hidden_dim,), jnp.float32, -k_fcb, k_fcb)
    return {"Hh": Hh, "lstm": layers, "fcb": (fcb_w, fcb_b)}


def prepare_params(raw, weight_dtype=jnp.bfloat16):
    """Pack PyTorch-layout params into the kernel layout.

    Gate weights become (in_l, 3*H) with columns [i_f|i_b|g_f|g_b|o_f|o_b]: the forget
    gate is dropped (it multiplies c0 == 0 at seq_len == 1) and the i/o columns and
    biases are pre-scaled by 0.5 (sigmoid-input fold).  Biases fold b_ih + b_hh and are
    stored lane-dense as (1, N) rows.  Weights cast to bf16; layer-0 rows padded to a
    multiple of 128 so the first contraction is lane-aligned.
    """
    Hh = raw["Hh"]
    gate_w, gate_b = [], []
    for li, layer in enumerate(raw["lstm"]):
        cols_w, cols_b = [], []
        for gate, scale in ((0, 0.5), (2, 1.0), (3, 0.5)):       # i, g, o (f dropped)
            for d in ("fwd", "bwd"):
                w_ih, _w_hh, b_ih, b_hh = layer[d]
                cols_w.append(scale * w_ih[gate * Hh:(gate + 1) * Hh, :].T)
                cols_b.append(scale * (b_ih[gate * Hh:(gate + 1) * Hh]
                                       + b_hh[gate * Hh:(gate + 1) * Hh]))
        w = jnp.concatenate(cols_w, axis=1)
        if li == 0:
            in0 = w.shape[0]
            in0_pad = 128 * pl.cdiv(in0, 128)
            if in0_pad != in0:
                w = jnp.pad(w, ((0, in0_pad - in0), (0, 0)))
        gate_w.append(w.astype(weight_dtype))
        gate_b.append(jnp.concatenate(cols_b, axis=0)[None, :].astype(jnp.float32))
    fcb_w, fcb_b = raw["fcb"]
    return dict(gate_w=gate_w, gate_b=gate_b,
                fcb_w=fcb_w.T.astype(weight_dtype),
                fcb_b=fcb_b[None, :].astype(jnp.float32))


def _reference_forward(x, raw):
    """Pure-JAX f32 reference with full nn.LSTM cell semantics at seq_len == 1."""
    Hh = raw["Hh"]
    B = x.shape[0]
    h_in = x.astype(jnp.float32)
    for layer in raw["lstm"]:
        outs = []
        for d in ("fwd", "bwd"):
            w_ih, w_hh, b_ih, b_hh = layer[d]
            h0 = jnp.zeros((B, Hh), jnp.float32)
            c0 = jnp.zeros((B, Hh), jnp.float32)
            gates = h_in @ w_ih.T + b_ih + h0 @ w_hh.T + b_hh
            i = jax.nn.sigmoid(gates[:, 0:Hh])
            f = jax.nn.sigmoid(gates[:, Hh:2 * Hh])
            g = jnp.tanh(gates[:, 2 * Hh:3 * Hh])
            o = jax.nn.sigmoid(gates[:, 3 * Hh:4 * Hh])
            c = f * c0 + i * g
            outs.append(o * jnp.tanh(c))
        h_in = jnp.concatenate(outs, axis=-1)
    fcb_w, fcb_b = raw["fcb"]
    return h_in @ fcb_w.T + fcb_b


if __name__ == "__main__":
    # Small shapes consistent with the module (real config: input_dim=train_src_x.size(1),
    # hidden_dim=1024, num_layers=5; dropout is identity at eval).
    input_dim = 128
    hidden_dim = 256        # bidirectional: 128 per direction
    num_layers = 2
    batch = 200             # not a multiple of the batch tile: exercises padding

    key = jax.random.PRNGKey(0)
    k_x, k_p = jax.random.split(key)
    x = jax.random.normal(k_x, (batch, input_dim), jnp.float32)

    raw = init_lstm_feature_extractor(k_p, input_dim, num_layers, hidden_dim)
    params = prepare_params(raw, weight_dtype=jnp.bfloat16)

    # Prime the (compile-only) feature probe outside of any trace, then jit the forward
    # so repeated calls hit the compile cache (no per-call retrace / host latency).
    _supports_buffered_const_blocks()
    fwd = jax.jit(lstm_feature_extractor_forward)

    out = jax.block_until_ready(fwd(x, params))

    ref = _reference_forward(x, raw)
    assert out.shape == (batch, hidden_dim)
    assert jnp.allclose(out, ref, rtol=1e-2, atol=1e-2), "kernel mismatch vs reference"

    print("KERNEL_OK")
</pallas_src>

<mosaic_0001>
module attributes {stable_mosaic.version = 11 : i64} {
  func.func @_lstm_fe_kernel(%arg0: i32, %arg1: memref<128x128xf32, #tpu.memory_space<vmem>>, %arg2: memref<128x768xbf16, #tpu.memory_space<vmem>>, %arg3: memref<1x768xf32, #tpu.memory_space<vmem>>, %arg4: memref<256x768xbf16, #tpu.memory_space<vmem>>, %arg5: memref<1x768xf32, #tpu.memory_space<vmem>>, %arg6: memref<256x256xbf16, #tpu.memory_space<vmem>>, %arg7: memref<1x256xf32, #tpu.memory_space<vmem>>, %arg8: memref<128x256xf32, #tpu.memory_space<vmem>>) attributes {dimension_semantics = [#tpu.dimension_semantics<parallel>], iteration_bounds = array<i64: 2>, scalar_prefetch = 0 : i64, scratch_operands = 0 : i64, tpu.core_type = #tpu.core_type<tc>, window_params = [{transform_indices = @transform_0, window_bounds = array<i64: 128, 128>}, {pipeline_mode = #tpu.pipeline_mode<synchronous>, transform_indices = @transform_1, window_bounds = array<i64: 128, 768>}, {pipeline_mode = #tpu.pipeline_mode<synchronous>, transform_indices = @transform_2, window_bounds = array<i64: 1, 768>}, {pipeline_mode = #tpu.pipeline_mode<synchronous>, transform_indices = @transform_3, window_bounds = array<i64: 256, 768>}, {pipeline_mode = #tpu.pipeline_mode<synchronous>, transform_indices = @transform_4, window_bounds = array<i64: 1, 768>}, {pipeline_mode = #tpu.pipeline_mode<synchronous>, transform_indices = @transform_5, window_bounds = array<i64: 256, 256>}, {pipeline_mode = #tpu.pipeline_mode<synchronous>, transform_indices = @transform_6, window_bounds = array<i64: 1, 256>}, {transform_indices = @transform_7, window_bounds = array<i64: 128, 256>}]} {
    %c0 = arith.constant 0 : index
    %c0_0 = arith.constant 0 : index
    %0 = vector.load %arg1[%c0, %c0_0] : memref<128x128xf32, #tpu.memory_space<vmem>>, vector<128x128xf32>
    %1 = arith.truncf %0 : vector<128x128xf32> to vector<128x128xbf16>
    %c0_1 = arith.constant 0 : index
    %c0_2 = arith.constant 0 : index
    %2 = vector.load %arg2[%c0_1, %c0_2] : memref<128x768xbf16, #tpu.memory_space<vmem>>, vector<128x768xbf16>
    %c0_3 = arith.constant 0 : index
    %c0_4 = arith.constant 0 : index
    %3 = vector.load %arg3[%c0_3, %c0_4] : memref<1x768xf32, #tpu.memory_space<vmem>>, vector<1x768xf32>
    %cst = arith.constant dense<0.000000e+00> : vector<128x768xf32>
    %4 = tpu.matmul %1, %2, %cst {dimension_numbers = #tpu.dot_dimension_numbers<[1], [0], [0], [1], [0, 0, 1, 1], [], []>} : vector<128x128xbf16>, vector<128x768xbf16>, vector<128x768xf32> -> vector<128x768xf32>
    %5 = vector.broadcast %3 : vector<1x768xf32> to vector<128x768xf32>
    %6 = arith.addf %4, %5 : vector<128x768xf32>
    %7 = arith.truncf %6 : vector<128x768xf32> to vector<128x768xbf16>
    %8 = vector.extract_strided_slice %7 {offsets = [0, 0], sizes = [128, 256], strides = [1, 1]} : vector<128x768xbf16> to vector<128x256xbf16>
    %9 = math.tanh %8 : vector<128x256xbf16>
    %cst_5 = arith.constant 1.000000e+00 : bf16
    %10 = vector.broadcast %cst_5 : bf16 to vector<128x256xbf16>
    %11 = arith.addf %9, %10 : vector<128x256xbf16>
    %cst_6 = arith.constant 5.000000e-01 : bf16
    %12 = vector.broadcast %cst_6 : bf16 to vector<128x256xbf16>
    %13 = arith.mulf %12, %11 : vector<128x256xbf16>
    %14 = vector.extract_strided_slice %7 {offsets = [0, 256], sizes = [128, 256], strides = [1, 1]} : vector<128x768xbf16> to vector<128x256xbf16>
    %15 = math.tanh %14 : vector<128x256xbf16>
    %16 = vector.extract_strided_slice %7 {offsets = [0, 512], sizes = [128, 256], strides = [1, 1]} : vector<128x768xbf16> to vector<128x256xbf16>
    %17 = math.tanh %16 : vector<128x256xbf16>
    %cst_7 = arith.constant 1.000000e+00 : bf16
    %18 = vector.broadcast %cst_7 : bf16 to vector<128x256xbf16>
    %19 = arith.addf %17, %18 : vector<128x256xbf16>
    %cst_8 = arith.constant 5.000000e-01 : bf16
    %20 = vector.broadcast %cst_8 : bf16 to vector<128x256xbf16>
    %21 = arith.mulf %20, %19 : vector<128x256xbf16>
    %22 = arith.mulf %13, %15 : vector<128x256xbf16>
    %23 = math.tanh %22 : vector<128x256xbf16>
    %24 = arith.mulf %21, %23 : vector<128x256xbf16>
    %c0_9 = arith.constant 0 : index
    %c0_10 = arith.constant 0 : index
    %25 = vector.load %arg4[%c0_9, %c0_10] : memref<256x768xbf16, #tpu.memory_space<vmem>>, vector<256x768xbf16>
    %c0_11 = arith.constant 0 : index
    %c0_12 = arith.constant 0 : index
    %26 = vector.load %arg5[%c0_11, %c0_12] : memref<1x768xf32, #tpu.memory_space<vmem>>, vector<1x768xf32>
    %cst_13 = arith.constant dense<0.000000e+00> : vector<128x768xf32>
    %27 = tpu.matmul %24, %25, %cst_13 {dimension_numbers = #tpu.dot_dimension_numbers<[1], [0], [0], [1], [0, 0, 1, 1], [], []>} : vector<128x256xbf16>, vector<256x768xbf16>, vector<128x768xf32> -> vector<128x768xf32>
    %28 = vector.broadcast %26 : vector<1x768xf32> to vector<128x768xf32>
    %29 = arith.addf %27, %28 : vector<128x768xf32>
    %30 = arith.truncf %29 : vector<128x768xf32> to vector<128x768xbf16>
    %31 = vector.extract_strided_slice %30 {offsets = [0, 0], sizes = [128, 256], strides = [1, 1]} : vector<128x768xbf16> to vector<128x256xbf16>
    %32 = math.tanh %31 : vector<128x256xbf16>
    %cst_14 = arith.constant 1.000000e+00 : bf16
    %33 = vector.broadcast %cst_14 : bf16 to vector<128x256xbf16>
    %34 = arith.addf %32, %33 : vector<128x256xbf16>
    %cst_15 = arith.constant 5.000000e-01 : bf16
    %35 = vector.broadcast %cst_15 : bf16 to vector<128x256xbf16>
    %36 = arith.mulf %35, %34 : vector<128x256xbf16>
    %37 = vector.extract_strided_slice %30 {offsets = [0, 256], sizes = [128, 256], strides = [1, 1]} : vector<128x768xbf16> to vector<128x256xbf16>
    %38 = math.tanh %37 : vector<128x256xbf16>
    %39 = vector.extract_strided_slice %30 {offsets = [0, 512], sizes = [128, 256], strides = [1, 1]} : vector<128x768xbf16> to vector<128x256xbf16>
    %40 = math.tanh %39 : vector<128x256xbf16>
    %cst_16 = arith.constant 1.000000e+00 : bf16
    %41 = vector.broadcast %cst_16 : bf16 to vector<128x256xbf16>
    %42 = arith.addf %40, %41 : vector<128x256xbf16>
    %cst_17 = arith.constant 5.000000e-01 : bf16
    %43 = vector.broadcast %cst_17 : bf16 to vector<128x256xbf16>
    %44 = arith.mulf %43, %42 : vector<128x256xbf16>
    %45 = arith.mulf %36, %38 : vector<128x256xbf16>
    %46 = math.tanh %45 : vector<128x256xbf16>
    %47 = arith.mulf %44, %46 : vector<128x256xbf16>
    %c0_18 = arith.constant 0 : index
    %c0_19 = arith.constant 0 : index
    %48 = vector.load %arg6[%c0_18, %c0_19] : memref<256x256xbf16, #tpu.memory_space<vmem>>, vector<256x256xbf16>
    %cst_20 = arith.constant dense<0.000000e+00> : vector<128x256xf32>
    %49 = tpu.matmul %47, %48, %cst_20 {dimension_numbers = #tpu.dot_dimension_numbers<[1], [0], [0], [1], [0, 0, 1, 1], [], []>} : vector<128x256xbf16>, vector<256x256xbf16>, vector<128x256xf32> -> vector<128x256xf32>
    %c0_21 = arith.constant 0 : index
    %c0_22 = arith.constant 0 : index
    %50 = vector.load %arg7[%c0_21, %c0_22] : memref<1x256xf32, #tpu.memory_space<vmem>>, vector<1x256xf32>
    %51 = vector.broadcast %50 : vector<1x256xf32> to vector<128x256xf32>
    %52 = arith.addf %49, %51 : vector<128x256xf32>
    %c0_23 = arith.constant 0 : index
    %c0_24 = arith.constant 0 : index
    %53 = vector.load %arg8[%c0_23, %c0_24] : memref<128x256xf32, #tpu.memory_space<vmem>>, vector<128x256xf32>
    tpu.vector_store %arg8[%c0_23, %c0_24], %52 {strides = array<i32>} : memref<128x256xf32, #tpu.memory_space<vmem>>, vector<128x256xf32>,
    return
  }
  func.func @transform_0(%arg0: i32) -> (i32, i32) {
    %c0_i32 = arith.constant 0 : i32
    %c0_i32_0 = arith.constant 0 : i32
    return %arg0, %c0_i32 : i32, i32
  }
  func.func @transform_1(%arg0: i32) -> (i32, i32) {
    %c0_i32 = arith.constant 0 : i32
    %c0_i32_0 = arith.constant 0 : i32
    %c0_i32_1 = arith.constant 0 : i32
    return %c0_i32, %c0_i32_0 : i32, i32
  }
  func.func @transform_2(%arg0: i32) -> (i32, i32) {
    %c0_i32 = arith.constant 0 : i32
    %c0_i32_0 = arith.constant 0 : i32
    %c0_i32_1 = arith.constant 0 : i32
    return %c0_i32, %c0_i32_0 : i32, i32
  }
  func.func @transform_3(%arg0: i32) -> (i32, i32) {
    %c0_i32 = arith.constant 0 : i32
    %c0_i32_0 = arith.constant 0 : i32
    %c0_i32_1 = arith.constant 0 : i32
    return %c0_i32, %c0_i32_0 : i32, i32
  }
  func.func @transform_4(%arg0: i32) -> (i32, i32) {
    %c0_i32 = arith.constant 0 : i32
    %c0_i32_0 = arith.constant 0 : i32
    %c0_i32_1 = arith.constant 0 : i32
    return %c0_i32, %c0_i32_0 : i32, i32
  }
  func.func @transform_5(%arg0: i32) -> (i32, i32) {
    %c0_i32 = arith.constant 0 : i32
    %c0_i32_0 = arith.constant 0 : i32
    %c0_i32_1 = arith.constant 0 : i32
    return %c0_i32, %c0_i32_0 : i32, i32
  }
  func.func @transform_6(%arg0: i32) -> (i32, i32) {
    %c0_i32 = arith.constant 0 : i32
    %c0_i32_0 = arith.constant 0 : i32
    %c0_i32_1 = arith.constant 0 : i32
    return %c0_i32, %c0_i32_0 : i32, i32
  }
  func.func @transform_7(%arg0: i32) -> (i32, i32) {
    %c0_i32 = arith.constant 0 : i32
    %c0_i32_0 = arith.constant 0 : i32
    return %arg0, %c0_i32 : i32, i32
  }
}

</mosaic_0001>

<bundles_post_ra>
// kernel: lstm_feature_extractor_forward.1
= control target key start
LH: loop header
LB: loop body
LE: loop exit
PB: predicated region body
PF: predicated region fallthrough
CT: control target
= control target key end

     0   :  { %12 = vsyncpa [#allocation3], 0  ;;  %s7708_s0 = inlined_call_operand.vmem [shape: f32[256,128], index: 0, kind: input, shape index: {}]   ;;  %s7709_s1 = inlined_call_operand.vmem [shape: bf16[128,768], index: 1, kind: input, shape index: {}]   ;;  %s7710_s2 = inlined_call_operand.vmem [shape: f32[1,768], index: 2, kind: input, shape index: {}]   ;;  %s7711_s3 = inlined_call_operand.hbm [shape: bf16[256,768], index: 3, kind: input, shape index: {}]   ;;  %s7712_s4 = inlined_call_operand.vmem [shape: f32[1,768], index: 4, kind: input, shape index: {}]   ;;  %s7713_s5 = inlined_call_operand.hbm [shape: bf16[256,256], index: 5, kind: input, shape index: {}]   ;;  %s7714_s6 = inlined_call_operand.vmem [shape: f32[1,256], index: 6, kind: input, shape index: {}]   ;;  %s7715_s7 = inlined_call_operand.vmem [shape: f32[256,256], index: 7, kind: output, shape index: {}]  }
   0x1   :  { %13 = vsyncpa [#allocation5], 0  ;;  %s6027_s24 = smov 0  }
   0x2 LB: > { %s219_s27 = sshll.u32 %s7711_s3, 4  ;;  %s4446_s28 = sadd.s32 4294967295, %s5979_s24   ;;  %s5979_s24 = sphi %s6027_s24, %s19_s24   ;;  %s220_s27 = int_to_ptr.hbm [resolvable:$true] %s219_s27 }
   0x3   : > { %p4448_p0 = scmp.ge.s32.totalorder %s5979_s24, 1  ;;  %p202_p1 = scmp.lt.s32.totalorder %s5979_s24, 3 }
   0x4   : > { %p6040_p2 = scmp.eq.s32.totalorder %s4446_s28, 0  ;;  %s5981_s8 = smov [#allocation2]  }
   0x5   : > { %p6044_p3 = pnand %p4448_p0, %p202_p1  ;;  %s221_s9 = sshll.u32 %s5981_s8, 4  ;;  %s222_s9 = int_to_ptr.vmem [resolvable:$true] %s221_s9 }
   0x6   : > { %s236_s12 = sshll.u32 %s7713_s5, 4  ;;  %s5982_s13 = smov [#allocation4]   ;;  %s237_s12 = int_to_ptr.hbm [resolvable:$true] %s236_s12 }
   0x7   : > { %p5367_p4 = pneg %p6044_p3  ;;  %s238_s14 = sshll.u32 %s5982_s13, 4  ;;  %s239_s14 = int_to_ptr.vmem [resolvable:$true] %s238_s14 }
   0x8   : > { %s5983_s15 = smov 384   ;;  %s5984_s16 = smov 24  }
   0x9   : > { %p5368_p5 = pnand %p6040_p2, %p5367_p4  ;;  %s5985_s17 = smov 128  }
   0xa   : > { %s5986_s18 = smov 8   ;;  %266 = sbr.rel (%p6044_p3) target bundleno = 1049 (0x419), region = 48 }
   0xb   : > { %5370 = dma.hbm_to_vmem [thread:$0]  (!%p5368_p5), %s220_s27, 12288, %s222_s9, [#allocation3], %s5983_s15, %s5983_s15, %s5984_s16  }
   0xc   : > { %5373 = dma.hbm_to_vmem [thread:$0]  (!%p5368_p5), %s237_s12, 4096, %s239_s14, [#allocation5], %s5985_s17, %s5985_s17, %s5986_s18  }
   0xf   : > { %5970 = dma.done.wait (%p6040_p2), [#allocation3], 12288  }
  0x10   : > { %5972 = vsyncadd (%p6040_p2), [#allocation3], 4294955008 }
  0x11   : > { %5974 = dma.done.wait (%p6040_p2), [#allocation5], 4096  }
  0x12   : > { %5976 = vsyncadd (%p6040_p2), [#allocation5], 4294963200  ;;  %v4630_v0 = vld [vmem:[%s7709_s1 + $0x150] sm:$0xf]  ;;  %v5212_v1 = vld [vmem:[%s7709_s1 + $0x164] sm:$0xf0] }
  0x13   : > { %v5209_v2 = vld [vmem:[%s7709_s1 + $0x154] sm:$0xf]  ;;  %v4631_v3 = vor.u32 %v5212_v1, %v4630_v0  ;;  %v4632_v4 = vld [vmem:[%s7709_s1 + $0x168] sm:$0xf0]  ;;  %v4606_v5 = vld [vmem:[%s7709_s1 + $0x120] sm:$0xf] }
  0x14   : > { %v5206_v6 = vld [vmem:[%s7709_s1 + $0x134] sm:$0xf0]  ;;  %v4635_v7 = vor.u32 %v5209_v2, %v4632_v4  ;;  %v5203_v8 = vld [vmem:[%s7709_s1 + $0x124] sm:$0xf]  ;;  %v4608_v9 = vld [vmem:[%s7709_s1 + $0x138] sm:$0xf0] }
  0x15   : > { %5343 = vmatpush.bf16.msra.mxu2 %v4631_v3  ;;  %644 = vmatpush.bf16.msra.mxu0 %v4631_v3  ;;  %v4607_v10 = vor.u32 %v5206_v6, %v4606_v5  ;;  %v4611_v11 = vor.u32 %v5203_v8, %v4608_v9  ;;  %v4582_v12 = vld [vmem:[%s7709_s1 + $0xf0] sm:$0xf]  ;;  %v5200_v13 = vld [vmem:[%s7709_s1 + $0x104] sm:$0xf0]  ;;  %v5197_v14 = vld [vmem:[%s7709_s1 + $0xf4] sm:$0xf] }
  0x16   : > { %5351 = vmatpush.bf16.msra.mxu3 %v4635_v7  ;;  %693 = vmatpush.bf16.msra.mxu1 %v4635_v7  ;;  %v4584_v15 = vld [vmem:[%s7709_s1 + $0x108] sm:$0xf0]  ;;  %v4583_v16 = vor.u32 %v5200_v13, %v4582_v12  ;;  %v4558_v18 = vld [vmem:[%s7709_s1 + $0xc0] sm:$0xf]  ;;  %v5194_v19 = vld [vmem:[%s7709_s1 + $0xd4] sm:$0xf0] }
  0x17   : > { %v4587_v17 = vor.u32 %v5197_v14, %v4584_v15  ;;  %s4455_s27 = sshll.u32 %s4446_s28, 4  ;;  %v5191_v20 = vld [vmem:[%s7709_s1 + $0xc4] sm:$0xf]  ;;  %v4560_v21 = vld [vmem:[%s7709_s1 + $0xd8] sm:$0xf0]  ;;  %v4559_v22 = vor.u32 %v5194_v19, %v4558_v18 }
  0x18   : > { %p306_p6 = scmp.lt.s32.totalorder %s4455_s27, 31  ;;  %v4563_v23 = vor.u32 %v5191_v20, %v4560_v21  ;;  %v4534_v24 = vld [vmem:[%s7709_s1 + $0x90] sm:$0xf]  ;;  %v5188_v25 = vld [vmem:[%s7709_s1 + $0xa4] sm:$0xf0] }
  0x19   : > { %5344 = vmatpush.bf16.msra.mxu2 %v4607_v10  ;;  %645 = vmatpush.bf16.msra.mxu0 %v4607_v10  ;;  %v5185_v26 = vld [vmem:[%s7709_s1 + $0x94] sm:$0xf]  ;;  %v4536_v27 = vld [vmem:[%s7709_s1 + $0xa8] sm:$0xf0]  ;;  %v4535_v28 = vor.u32 %v5188_v25, %v4534_v24  ;;  %v4510_v30 = vld [vmem:[%s7709_s1 + $0x60] sm:$0xf] }
  0x1a   : > { %5352 = vmatpush.bf16.msra.mxu3 %v4611_v11  ;;  %694 = vmatpush.bf16.msra.mxu1 %v4611_v11  ;;  %s7734_s27 = smov (!%p306_p6, %s4455_s27), 31  ;;  %v4539_v29 = vor.u32 %v5185_v26, %v4536_v27  ;;  %v5182_v31 = vld [vmem:[%s7709_s1 + $0x74] sm:$0xf0]  ;;  %v5179_v32 = vld [vmem:[%s7709_s1 + $0x64] sm:$0xf] }
  0x1b   : > { %v4512_v33 = vld [vmem:[%s7709_s1 + $0x78] sm:$0xf0]  ;;  %v4511_v34 = vor.u32 %v5182_v31, %v4510_v30  ;;  %s4456_s26 = sshll.u32 %s7734_s27, 3  ;;  %v4486_v36 = vld [vmem:[%s7709_s1 + $0x30] sm:$0xf]  ;;  %s5166_s19 = sshll.u32 %s7734_s27, 4 }
  0x1c   : > { %v4515_v35 = vor.u32 %v5179_v32, %v4512_v33  ;;  %v5176_v37 = vld [vmem:[%s7709_s1 + $0x44] sm:$0xf0]  ;;  %v5173_v38 = vld [vmem:[%s7709_s1 + $0x34] sm:$0xf]  ;;  %v4488_v39 = vld [vmem:[%s7709_s1 + $0x48] sm:$0xf0]  ;;  %s6157_s15 = scalar_lea.vmem %s7708_s0, %s4456_s26  ;;  %s7638_s22 = scalar_lea.vmem %s7715_s7, %s5166_s19 }
  0x1d   : > { %5345 = vmatpush.bf16.msra.mxu2 %v4583_v16  ;;  %646 = vmatpush.bf16.msra.mxu0 %v4583_v16  ;;  %v4487_v40 = vor.u32 %v5176_v37, %v4486_v36  ;;  %v4491_v41 = vor.u32 %v5173_v38, %v4488_v39  ;;  %v4462_v42 = vld [vmem:[%s7709_s1] sm:$0xf]  ;;  %v5170_v43 = vld [vmem:[%s7709_s1 + $0x14] sm:$0xf0]  ;;  %v5167_v44 = vld [vmem:[%s7709_s1 + $0x4] sm:$0xf] }
  0x1e   : > { %5353 = vmatpush.bf16.msra.mxu3 %v4587_v17  ;;  %695 = vmatpush.bf16.msra.mxu1 %v4587_v17  ;;  %v4464_v45 = vld [vmem:[%s7709_s1 + $0x18] sm:$0xf0]  ;;  %v326_v46 = vld [vmem:[%s6157_s15 + $0x40] sm:$0xff]  ;;  %v4638_v47 = vld [vmem:[%s7709_s1 + $0x158] sm:$0xf]  ;;  %v4463_v51 = vor.u32 %v5170_v43, %v4462_v42 }
  0x1f   : > { %v5213_v48 = vld [vmem:[%s7709_s1 + $0x16c] sm:$0xf0]  ;;  %v5210_v49 = vld [vmem:[%s7709_s1 + $0x15c] sm:$0xf]  ;;  %v4640_v50 = vld [vmem:[%s7709_s1 + $0x170] sm:$0xf0]  ;;  %v4467_v55 = vor.u32 %v5167_v44, %v4464_v45 }
  0x20   : > { %v327_v52 = vld [vmem:[%s6157_s15 + $0x48] sm:$0xff]  ;;  %v318_v53 = vld [vmem:[%s6157_s15] sm:$0xff]  ;;  %v4639_v58 = vor.u32 %v5213_v48, %v4638_v47  ;;  %v4643_v59 = vor.u32 %v5210_v49, %v4640_v50  ;;  %v5214_v60 = vld [vmem:[%s7709_s1 + $0x174] sm:$0xf0] }
  0x21   : > { %5346 = vmatpush.bf16.msra.mxu2 %v4559_v22  ;;  %647 = vmatpush.bf16.msra.mxu0 %v4559_v22  ;;  %v319_v54 = vld [vmem:[%s6157_s15 + $0x8] sm:$0xff]  ;;  %v4646_v57 = vld [vmem:[%s7709_s1 + $0x160] sm:$0xf]  ;;  %v5211_v61 = vld [vmem:[%s7709_s1 + $0x164] sm:$0xf]  ;;  %v6202_v63 = vpack.c.bf16 %v327_v52, %v326_v46 }
  0x22   : > { %5354 = vmatpush.bf16.msra.mxu3 %v4563_v23  ;;  %696 = vmatpush.bf16.msra.mxu1 %v4563_v23  ;;  %v4614_v56 = vld [vmem:[%s7709_s1 + $0x128] sm:$0xf]  ;;  %v4648_v62 = vld [vmem:[%s7709_s1 + $0x178] sm:$0xf0]  ;;  %v6204_v0 = vpack.c.bf16 %v319_v54, %v318_v53  ;;  %v5207_v1 = vld [vmem:[%s7709_s1 + $0x13c] sm:$0xf0]  ;;  %v4647_v4 = vor.u32 %v5214_v60, %v4646_v57 }
  0x23   : > { %v5204_v2 = vld [vmem:[%s7709_s1 + $0x12c] sm:$0xf]  ;;  %v4616_v3 = vld [vmem:[%s7709_s1 + $0x140] sm:$0xf0]  ;;  %v4651_v5 = vor.u32 %v5211_v61, %v4648_v62  ;;  %v4590_v6 = vld [vmem:[%s7709_s1 + $0xf8] sm:$0xf]  ;;  %v4615_v8 = vor.u32 %v5207_v1, %v4614_v56 }
  0x24   : > { %v4622_v7 = vld [vmem:[%s7709_s1 + $0x130] sm:$0xf]  ;;  %v4619_v9 = vor.u32 %v5204_v2, %v4616_v3  ;;  %v5208_v10 = vld [vmem:[%s7709_s1 + $0x144] sm:$0xf0]  ;;  %v5205_v11 = vld [vmem:[%s7709_s1 + $0x134] sm:$0xf] }
  0x25   : > { %5347 = vmatpush.bf16.msra.mxu2 %v4535_v28  ;;  %648 = vmatpush.bf16.msra.mxu0 %v4535_v28  ;;  %v4624_v12 = vld [vmem:[%s7709_s1 + $0x148] sm:$0xf0]  ;;  %v5201_v13 = vld [vmem:[%s7709_s1 + $0x10c] sm:$0xf0]  ;;  %v5198_v14 = vld [vmem:[%s7709_s1 + $0xfc] sm:$0xf]  ;;  %v4623_v16 = vor.u32 %v5208_v10, %v4622_v7 }
  0x26   : > { %5355 = vmatpush.bf16.msra.mxu3 %v4539_v29  ;;  %697 = vmatpush.bf16.msra.mxu1 %v4539_v29  ;;  %v4592_v15 = vld [vmem:[%s7709_s1 + $0x110] sm:$0xf0]  ;;  %v4627_v17 = vor.u32 %v5205_v11, %v4624_v12  ;;  %v4566_v18 = vld [vmem:[%s7709_s1 + $0xc8] sm:$0xf]  ;;  %v4598_v19 = vld [vmem:[%s7709_s1 + $0x100] sm:$0xf]  ;;  %v4591_v20 = vor.u32 %v5201_v13, %v4590_v6 }
  0x27   : > { %v4595_v21 = vor.u32 %v5198_v14, %v4592_v15  ;;  %v5202_v22 = vld [vmem:[%s7709_s1 + $0x114] sm:$0xf0]  ;;  %v5199_v23 = vld [vmem:[%s7709_s1 + $0x104] sm:$0xf]  ;;  %v4600_v24 = vld [vmem:[%s7709_s1 + $0x118] sm:$0xf0] }
  0x28   : > { %v5195_v25 = vld [vmem:[%s7709_s1 + $0xdc] sm:$0xf0]  ;;  %v5192_v26 = vld [vmem:[%s7709_s1 + $0xcc] sm:$0xf]  ;;  %v4568_v27 = vld [vmem:[%s7709_s1 + $0xe0] sm:$0xf0]  ;;  %v4599_v28 = vor.u32 %v5202_v22, %v4598_v19  ;;  %v4603_v29 = vor.u32 %v5199_v23, %v4600_v24 }
  0x29   : > { %5348 = vmatpush.bf16.msra.mxu2 %v4511_v34  ;;  %649 = vmatpush.bf16.msra.mxu0 %v4511_v34  ;;  %v4542_v30 = vld [vmem:[%s7709_s1 + $0x98] sm:$0xf]  ;;  %v4574_v31 = vld [vmem:[%s7709_s1 + $0xd0] sm:$0xf]  ;;  %v4567_v33 = vor.u32 %v5195_v25, %v4566_v18  ;;  %v4571_v34 = vor.u32 %v5192_v26, %v4568_v27  ;;  %v5193_v36 = vld [vmem:[%s7709_s1 + $0xd4] sm:$0xf] }
  0x2a   : > { %5356 = vmatpush.bf16.msra.mxu3 %v4515_v35  ;;  %698 = vmatpush.bf16.msra.mxu1 %v4515_v35  ;;  %v328_v32 = vld [vmem:[%s6157_s15 + $0x50] sm:$0xff]  ;;  %v5196_v35 = vld [vmem:[%s7709_s1 + $0xe4] sm:$0xf0]  ;;  %v4576_v37 = vld [vmem:[%s7709_s1 + $0xe8] sm:$0xf0] }
  0x2b   : > { %v5189_v38 = vld [vmem:[%s7709_s1 + $0xac] sm:$0xf0]  ;;  %v5186_v39 = vld [vmem:[%s7709_s1 + $0x9c] sm:$0xf]  ;;  %v4575_v44 = vor.u32 %v5196_v35, %v4574_v31  ;;  %v4579_v45 = vor.u32 %v5193_v36, %v4576_v37  ;;  %v4518_v46 = vld [vmem:[%s7709_s1 + $0x68] sm:$0xf] }
  0x2c   : > { %v320_v42 = vld [vmem:[%s6157_s15 + $0x10] sm:$0xff]  ;;  %v321_v43 = vld [vmem:[%s6157_s15 + $0x18] sm:$0xff]  ;;  %v4550_v47 = vld [vmem:[%s7709_s1 + $0xa0] sm:$0xf]  ;;  %v4543_v48 = vor.u32 %v5189_v38, %v4542_v30 }
  0x2d   : > { %5349 = vmatpush.bf16.msra.mxu2 %v4487_v40  ;;  %650 = vmatpush.bf16.msra.mxu0 %v4487_v40  ;;  %v4544_v40 = vld [vmem:[%s7709_s1 + $0xb0] sm:$0xf0]  ;;  %v5190_v50 = vld [vmem:[%s7709_s1 + $0xb4] sm:$0xf0]  ;;  %v4552_v52 = vld [vmem:[%s7709_s1 + $0xb8] sm:$0xf0]  ;;  %v6312_v54 = vpack.c.bf16 %v321_v43, %v320_v42 }
  0x2e   : > { %5357 = vmatpush.bf16.msra.mxu3 %v4491_v41  ;;  %699 = vmatpush.bf16.msra.mxu1 %v4491_v41  ;;  %v329_v41 = vld [vmem:[%s6157_s15 + $0x58] sm:$0xff]  ;;  %v4547_v49 = vor.u32 %v5186_v39, %v4544_v40  ;;  %v5180_v56 = vld [vmem:[%s7709_s1 + $0x6c] sm:$0xf]  ;;  %v4520_v57 = vld [vmem:[%s7709_s1 + $0x80] sm:$0xf0] }
  0x2f   : > { %v6310_v53 = vpack.c.bf16 %v329_v41, %v328_v32  ;;  %v4523_v61 = vor.u32 %v5180_v56, %v4520_v57  ;;  %v4494_v62 = vld [vmem:[%s7709_s1 + $0x38] sm:$0xf]  ;;  %v5177_v1 = vld [vmem:[%s7709_s1 + $0x4c] sm:$0xf0]  ;;  %v5174_v2 = vld [vmem:[%s7709_s1 + $0x3c] sm:$0xf] }
  0x30   : > { %v4496_v3 = vld [vmem:[%s7709_s1 + $0x50] sm:$0xf0]  ;;  %v4526_v6 = vld [vmem:[%s7709_s1 + $0x70] sm:$0xf]  ;;  %v5184_v7 = vld [vmem:[%s7709_s1 + $0x84] sm:$0xf0] }
  0x31   : > { %5350 = vmatpush.bf16.msra.mxu2 %v4463_v51  ;;  %651 = vmatpush.bf16.msra.mxu0 %v4463_v51  ;;  %v5187_v51 = vld [vmem:[%s7709_s1 + $0xa4] sm:$0xf]  ;;  %v4528_v10 = vld [vmem:[%s7709_s1 + $0x88] sm:$0xf0]  ;;  %v4470_v11 = vld [vmem:[%s7709_s1 + $0x8] sm:$0xf] }
  0x32   : > { %5358 = vmatpush.bf16.msra.mxu3 %v4467_v55  ;;  %700 = vmatpush.bf16.msra.mxu1 %v4467_v55  ;;  %v5183_v55 = vld [vmem:[%s7709_s1 + $0x7c] sm:$0xf0]  ;;  %v5168_v14 = vld [vmem:[%s7709_s1 + $0xc] sm:$0xf]  ;;  %v4472_v15 = vld [vmem:[%s7709_s1 + $0x20] sm:$0xf0] }
  0x33   : > { %v4519_v60 = vor.u32 %v5183_v55, %v4518_v46  ;;  %v5171_v12 = vld [vmem:[%s7709_s1 + $0x1c] sm:$0xf0]  ;;  %v5175_v18 = vld [vmem:[%s7709_s1 + $0x44] sm:$0xf]  ;;  %v4504_v19 = vld [vmem:[%s7709_s1 + $0x58] sm:$0xf0] }
  0x34   : > { %672 = vmatmul.bf16.vlgmr.msra.gmra.mxu2 %v6202_v63  ;;  %652 = vmatmul.bf16.vlgmr.msra.gmra.mxu0 %v6204_v0  ;;  %v330_v23 = vld [vmem:[%s6157_s15 + $0x60] sm:$0xff]  ;;  %v4507_v24 = vor.u32 %v5175_v18, %v4504_v19  ;;  %v331_v25 = vld [vmem:[%s6157_s15 + $0x68] sm:$0xff]  ;;  %v4478_v30 = vld [vmem:[%s7709_s1 + $0x10] sm:$0xf] }
  0x35   : > { %742 = vmatpush.bf16.msrb.mxu2 %v4639_v58  ;;  %721 = vmatmul.bf16.vlgmr.msra.gmra.mxu3 %v6202_v63  ;;  %v4551_v58 = vor.u32 %v5190_v50, %v4550_v47  ;;  %v322_v26 = vld [vmem:[%s6157_s15 + $0x20] sm:$0xff]  ;;  %v323_v27 = vld [vmem:[%s6157_s15 + $0x28] sm:$0xff]  ;;  %v5169_v32 = vld [vmem:[%s7709_s1 + $0x14] sm:$0xf] }
  0x36   : > { %791 = vmatpush.bf16.msrb.mxu3 %v4643_v59  ;;  %701 = vmatmul.bf16.vlgmr.msra.gmra.mxu1 %v6204_v0  ;;  %v4555_v59 = vor.u32 %v5187_v51, %v4552_v52  ;;  %v5172_v31 = vld [vmem:[%s7709_s1 + $0x24] sm:$0xf0]  ;;  %v332_v36 = vld [vmem:[%s6157_s15 + $0x70] sm:$0xff]  ;;  %v333_v37 = vld [vmem:[%s6157_s15 + $0x78] sm:$0xff] }
  0x37   : > { %840 = vmatpush.bf16.msrb.mxu0 %v4647_v4  ;;  %889 = vmatpush.bf16.msrb.mxu1 %v4651_v5  ;;  %v4495_v4 = vor.u32 %v5177_v1, %v4494_v62  ;;  %v4499_v5 = vor.u32 %v5174_v2, %v4496_v3  ;;  %v324_v38 = vld [vmem:[%s6157_s15 + $0x30] sm:$0xff]  ;;  %v325_v39 = vld [vmem:[%s6157_s15 + $0x38] sm:$0xff]  ;;  %v6399_v40 = vpack.c.bf16 %v333_v37, %v332_v36  ;;  %v5260_v43 = vld [vmem:[#allocation2 + $0x164] sm:$0xf0] }
  0x38   : > { %v337_v41 = vpack.c.bf16 %v325_v39, %v324_v38  ;;  %v4822_v42 = vld [vmem:[#allocation2 + $0x150] sm:$0xf]  ;;  %v5308_v46 = vld [vmem:[#allocation2 + $0x2e4] sm:$0xf0]  ;;  %v5257_v47 = vld [vmem:[#allocation2 + $0x154] sm:$0xf] }
  0x39   : > { %743 = vmatpush.bf16.msrb.mxu2 %v4615_v8  ;;  %v5181_v8 = vld [vmem:[%s7709_s1 + $0x74] sm:$0xf]  ;;  %v5016_v52 = vld [vmem:[#allocation2 + $0x2e8] sm:$0xf0]  ;;  %v5254_v55 = vld [vmem:[#allocation2 + $0x134] sm:$0xf0] }
  0x3a   : > { %792 = vmatpush.bf16.msrb.mxu3 %v4619_v9  ;;  %v4527_v9 = vor.u32 %v5184_v7, %v4526_v6  ;;  %v4531_v13 = vor.u32 %v5181_v8, %v4528_v10  ;;  %v5305_v51 = vld [vmem:[#allocation2 + $0x2d4] sm:$0xf]  ;;  %v6414_v57 = vld [vmem:[%s7710_s2] sm:$0x3f]  ;;  %v5302_v62 = vld [vmem:[#allocation2 + $0x2b4] sm:$0xf0] }
  0x3b   : > { %841 = vmatpush.bf16.msrb.mxu0 %v4623_v16  ;;  %890 = vmatpush.bf16.msrb.mxu1 %v4627_v17  ;;  %v4502_v16 = vld [vmem:[%s7709_s1 + $0x40] sm:$0xf]  ;;  %v5178_v17 = vld [vmem:[%s7709_s1 + $0x54] sm:$0xf0]  ;;  %v4800_v6 = vld [vmem:[#allocation2 + $0x138] sm:$0xf0] }
  0x3c   : > { %v4503_v22 = vor.u32 %v5178_v17, %v4502_v16  ;;  %v5299_v7 = vld [vmem:[#allocation2 + $0x2a4] sm:$0xf]  ;;  %v4992_v10 = vld [vmem:[#allocation2 + $0x2b8] sm:$0xf0] }
  0x3d   : > { %744 = vmatpush.bf16.msrb.mxu2 %v4591_v20  ;;  %v4471_v20 = vor.u32 %v5171_v12, %v4470_v11  ;;  %v4995_v11 = vor.u32 %v5299_v7, %v4992_v10 }
  0x3e   : > { %793 = vmatpush.bf16.msrb.mxu3 %v4595_v21  ;;  %v4475_v21 = vor.u32 %v5168_v14, %v4472_v15 }
  0x3f   : > { %842 = vmatpush.bf16.msrb.mxu0 %v4599_v28  ;;  %891 = vmatpush.bf16.msrb.mxu1 %v4603_v29  ;;  %v6379_v28 = vpack.c.bf16 %v331_v25, %v330_v23  ;;  %v336_v29 = vpack.c.bf16 %v323_v27, %v322_v26  ;;  %v4774_v25 = vld [vmem:[#allocation2 + $0xf0] sm:$0xf]  ;;  %v5248_v26 = vld [vmem:[#allocation2 + $0x104] sm:$0xf0] }
  0x40   : > { %v4775_v27 = vor.u32 %v5248_v26, %v4774_v25 }
  0x41   : > { %745 = vmatpush.bf16.msrb.mxu2 %v4567_v33  ;;  %v4479_v33 = vor.u32 %v5172_v31, %v4478_v30 }
  0x42   : > { %794 = vmatpush.bf16.msrb.mxu3 %v4571_v34  ;;  %v4480_v34 = vld [vmem:[%s7709_s1 + $0x28] sm:$0xf0] }
  0x43   : > { %843 = vmatpush.bf16.msrb.mxu0 %v4575_v44  ;;  %892 = vmatpush.bf16.msrb.mxu1 %v4579_v45  ;;  %v4483_v35 = vor.u32 %v5169_v32, %v4480_v34  ;;  %v5014_v44 = vld [vmem:[#allocation2 + $0x2d0] sm:$0xf]  ;;  %v4823_v45 = vor.u32 %v5260_v43, %v4822_v42 }
  0x44   : > { %677 = vmatmul.bf16.gmra.mxu2 %v6310_v53  ;;  %657 = vmatmul.bf16.gmra.mxu0 %v6312_v54 }
  0x45   : > { %746 = vmatpush.bf16.msrb.mxu2 %v4543_v48  ;;  %726 = vmatmul.bf16.gmra.mxu3 %v6310_v53  ;;  %v4824_v48 = vld [vmem:[#allocation2 + $0x168] sm:$0xf0] }
  0x46   : > { %795 = vmatpush.bf16.msrb.mxu3 %v4547_v49  ;;  %706 = vmatmul.bf16.gmra.mxu1 %v6312_v54  ;;  %v5015_v49 = vor.u32 %v5308_v46, %v5014_v44  ;;  %v4827_v50 = vor.u32 %v5257_v47, %v4824_v48  ;;  %v4966_v46 = vld [vmem:[#allocation2 + $0x270] sm:$0xf]  ;;  %v5296_v47 = vld [vmem:[#allocation2 + $0x284] sm:$0xf0] }
  0x47   : > { %844 = vmatpush.bf16.msrb.mxu0 %v4551_v58  ;;  %893 = vmatpush.bf16.msrb.mxu1 %v4555_v59  ;;  %v6417_v58 = vperm.slane %v6414_v57, 0  ;;  %v4967_v48 = vor.u32 %v5296_v47, %v4966_v46 }
  0x49   : > { %747 = vmatpush.bf16.msrb.mxu2 %v4519_v60  ;;  %v6420_v60 = vperm.slane %v6414_v57, 1 }
  0x4a   : > { %796 = vmatpush.bf16.msrb.mxu3 %v4523_v61  ;;  %v4990_v61 = vld [vmem:[#allocation2 + $0x2a0] sm:$0xf] }
  0x4b   : > { %845 = vmatpush.bf16.msrb.mxu0 %v4527_v9  ;;  %894 = vmatpush.bf16.msrb.mxu1 %v4531_v13  ;;  %v4991_v3 = vor.u32 %v5302_v62, %v4990_v61 }
  0x4d   : > { %748 = vmatpush.bf16.msrb.mxu2 %v4495_v4 }
  0x4e   : > { %797 = vmatpush.bf16.msrb.mxu3 %v4499_v5  ;;  %v5251_v5 = vld [vmem:[#allocation2 + $0x124] sm:$0xf] }
  0x4f   : > { %846 = vmatpush.bf16.msrb.mxu0 %v4503_v22  ;;  %895 = vmatpush.bf16.msrb.mxu1 %v4507_v24  ;;  %v4803_v9 = vor.u32 %v5251_v5, %v4800_v6 }
  0x51   : > { %749 = vmatpush.bf16.msrb.mxu2 %v4471_v20 }
  0x52   : > { %798 = vmatpush.bf16.msrb.mxu3 %v4475_v21 }
  0x53   : > { %847 = vmatpush.bf16.msrb.mxu0 %v4479_v33  ;;  %896 = vmatpush.bf16.msrb.mxu1 %v4483_v35 }
  0x54   : > { %682 = vmatmul.bf16.gmra.mxu2 %v6379_v28  ;;  %662 = vmatmul.bf16.gmra.mxu0 %v336_v29 }
  0x55   : > { %731 = vmatmul.bf16.gmra.mxu3 %v6379_v28  ;;  %2440 = vmatpush.bf16.msra.mxu2 %v4823_v45 }
  0x56   : > { %711 = vmatmul.bf16.gmra.mxu1 %v336_v29  ;;  %2489 = vmatpush.bf16.msra.mxu3 %v5015_v49 }
  0x57   : > { %2538 = vmatpush.bf16.msra.mxu0 %v4827_v50 }
  0x5a   : > { %2490 = vmatpush.bf16.msra.mxu3 %v4991_v3 }
  0x5b   : > { %2539 = vmatpush.bf16.msra.mxu0 %v4803_v9 }
  0x5e   : > { %2491 = vmatpush.bf16.msra.mxu3 %v4967_v48 }
  0x64   : > { %687 = vmatmul.bf16.gmra.mxu2 %v6399_v40  ;;  %667 = vmatmul.bf16.gmra.mxu0 %v337_v41 }
  0x65   : > { %736 = vmatmul.bf16.gmra.mxu3 %v6399_v40 }
  0x66   : > { %716 = vmatmul.bf16.gmra.mxu1 %v337_v41 }
  0x74   : > { %750 = vmatmul.bf16.vlgmr.msrb.gmra.mxu2 %v6204_v0  ;;  %848 = vmatmul.bf16.vlgmr.msrb.gmra.mxu0 %v6204_v0 }
  0x75   : > { %799 = vmatmul.bf16.vlgmr.msrb.gmra.mxu3 %v6204_v0 }
  0x76   : > { %897 = vmatmul.bf16.vlgmr.msrb.gmra.mxu1 %v6204_v0  ;;  %v5019_v0 = vor.u32 %v5305_v51, %v5016_v52 }
  0x78   : > { %2587 = vmatpush.bf16.msra.mxu1 %v5019_v0 }
  0x7c   : > { %2588 = vmatpush.bf16.msra.mxu1 %v4995_v11 }
  0x84   : > { %755 = vmatmul.bf16.gmra.mxu2 %v6312_v54  ;;  %853 = vmatmul.bf16.gmra.mxu0 %v6312_v54 }
  0x85   : > { %804 = vmatmul.bf16.gmra.mxu3 %v6312_v54 }
  0x86   : > { %902 = vmatmul.bf16.gmra.mxu1 %v6312_v54  ;;  %v4798_v54 = vld [vmem:[#allocation2 + $0x120] sm:$0xf] }
  0x87   : > { %v4799_v56 = vor.u32 %v5254_v55, %v4798_v54 }
  0x89   : > { %2441 = vmatpush.bf16.msra.mxu2 %v4799_v56  ;;  %v5245_v56 = vld [vmem:[#allocation2 + $0xf4] sm:$0xf] }
  0x8d   : > { %2442 = vmatpush.bf16.msra.mxu2 %v4775_v27 }
  0x94   : > { %760 = vmatmul.bf16.gmra.mxu2 %v336_v29  ;;  %858 = vmatmul.bf16.gmra.mxu0 %v336_v29 }
  0x95   : > { %809 = vmatmul.bf16.gmra.mxu3 %v336_v29 }
  0x96   : > { %907 = vmatmul.bf16.gmra.mxu1 %v336_v29 }
  0xa4   : > { %765 = vmatmul.bf16.gmra.mxu2 %v337_v41  ;;  %863 = vmatmul.bf16.gmra.mxu0 %v337_v41 }
  0xa5   : > { %814 = vmatmul.bf16.gmra.mxu3 %v337_v41 }
  0xa6   : > { %912 = vmatmul.bf16.gmra.mxu1 %v337_v41 }
  0xb1   : > { %v653_v59 = vpop.f32.mrf.mxu0 }
  0xb2   : > { %v654_v1 = vadd.f32 %v653_v59, %v6417_v58  ;;  %v4776_v59 = vld [vmem:[#allocation2 + $0x108] sm:$0xf0] }
  0xb3   : > { %v702_v2 = vpop.f32.mrf.mxu1 }
  0xb4   : > { %v703_v4 = vadd.f32 %v702_v2, %v6420_v60  ;;  %770 = vmatmul.bf16.gmra.mxu2 %v6202_v63  ;;  %868 = vmatmul.bf16.gmra.mxu0 %v6202_v63  ;;  %v4779_v2 = vor.u32 %v5245_v56, %v4776_v59 }
  0xb5   : > { %819 = vmatmul.bf16.gmra.mxu3 %v6202_v63 }
  0xb6   : > { %v938_v8 = vpack.c.bf16 %v703_v4, %v654_v1  ;;  %917 = vmatmul.bf16.gmra.mxu1 %v6202_v63  ;;  %2540 = vmatpush.bf16.msra.mxu0 %v4779_v2 }
  0xb7   : > { %v673_v14 = vpop.f32.mrf.mxu2 }
  0xb8   : > { %v986_v12 = vunpack.c.l.bf16 %v938_v8  ;;  %v987_v13 = vunpack.c.h.bf16 %v938_v8  ;;  %v674_v15 = vadd.f32 %v673_v14, %v6417_v58  ;;  %v722_v16 = vpop.f32.mrf.mxu3  ;;  %v5293_v14 = vld [vmem:[#allocation2 + $0x274] sm:$0xf] }
  0xb9   : > { %v723_v17 = vadd.f32 %v722_v16, %v6420_v60  ;;  %v655_v18 = vpop.f32.mrf.mxu0 }
  0xba   : > { %5392 = vtanh.f32 %v986_v12  ;;  %v656_v19 = vadd.f32 %v655_v18, %v6417_v58 }
  0xbb   : > { %5394 = vtanh.f32 %v987_v13  ;;  %v704_v63 = vpop.f32.mrf.mxu1  ;;  %v962_v20 = vpack.c.bf16 %v723_v17, %v674_v15  ;;  %v4968_v15 = vld [vmem:[#allocation2 + $0x288] sm:$0xf0] }
  0xbc   : > { %v705_v21 = vadd.f32 %v704_v63, %v6420_v60 }
  0xbd   : > { %v1002_v22 = vunpack.c.l.bf16 %v962_v20  ;;  %v1003_v23 = vunpack.c.h.bf16 %v962_v20 }
  0xbe   : > { %v941_v24 = vpack.c.bf16 %v705_v21, %v656_v19 }
  0xbf   : > { %5396 = vtanh.f32 %v1002_v22  ;;  %v675_v32 = vpop.f32.mrf.mxu2 }
  0xc0   : > { %v5393_v29 = vpop.eup %5392  ;;  %v988_v30 = vunpack.c.l.bf16 %v941_v24  ;;  %v989_v31 = vunpack.c.h.bf16 %v941_v24  ;;  %5398 = vtanh.f32 %v1003_v23  ;;  %v676_v34 = vadd.f32 %v675_v32, %v6417_v58  ;;  %v724_v35 = vpop.f32.mrf.mxu3 }
  0xc1   : > { %v5395_v33 = vpop.eup %5394  ;;  %v725_v37 = vadd.f32 %v724_v35, %v6420_v60  ;;  %v658_v38 = vpop.f32.mrf.mxu0  ;;  %v4971_v23 = vor.u32 %v5293_v14, %v4968_v15 }
  0xc2   : > { %v1050_v36 = vpack.c.bf16 %v5395_v33, %v5393_v29  ;;  %5400 = vtanh.f32 %v988_v30  ;;  %v659_v39 = vadd.f32 %v658_v38, %v6417_v58 }
  0xc3   : > { %5402 = vtanh.f32 %v989_v31  ;;  %v707_v41 = vpop.f32.mrf.mxu1  ;;  %v965_v44 = vpack.c.bf16 %v725_v37, %v676_v34  ;;  %2589 = vmatpush.bf16.msra.mxu1 %v4971_v23 }
  0xc4   : > { %v1066_v42 = vunpack.c.l.bf16 %v1050_v36  ;;  %v1067_v43 = vunpack.c.h.bf16 %v1050_v36  ;;  %v708_v45 = vadd.f32 %v707_v41, %v6420_v60  ;;  %775 = vmatmul.bf16.gmra.mxu2 %v6310_v53  ;;  %873 = vmatmul.bf16.gmra.mxu0 %v6310_v53 }
  0xc5   : > { %v5397_v49 = vpop.eup %5396  ;;  %v1004_v50 = vunpack.c.l.bf16 %v965_v44  ;;  %v1005_v51 = vunpack.c.h.bf16 %v965_v44  ;;  %824 = vmatmul.bf16.gmra.mxu3 %v6310_v53 }
  0xc6   : > { %922 = vmatmul.bf16.gmra.mxu1 %v6310_v53  ;;  %v5399_v52 = vpop.eup %5398  ;;  %v1098_v0 = vadd.f32 1.0, %v1066_v42  ;;  %v1099_v54 = vadd.f32 1.0, %v1067_v43  ;;  %v944_v55 = vpack.c.bf16 %v708_v45, %v659_v39 }
  0xc7   : > { %v1058_v62 = vpack.c.bf16 %v5399_v52, %v5397_v49  ;;  %5404 = vtanh.f32 %v1004_v50  ;;  %v678_v1 = vpop.f32.mrf.mxu2  ;;  %v5242_v52 = vld [vmem:[#allocation2 + $0xd4] sm:$0xf0] }
  0xc8   : > { %v5401_v61 = vpop.eup %5400  ;;  %5406 = vtanh.f32 %v1005_v51  ;;  %v990_v4 = vunpack.c.l.bf16 %v944_v55  ;;  %v991_v5 = vunpack.c.h.bf16 %v944_v55  ;;  %v679_v6 = vadd.f32 %v678_v1, %v6417_v58  ;;  %v727_v7 = vpop.f32.mrf.mxu3  ;;  %v4750_v51 = vld [vmem:[#allocation2 + $0xc0] sm:$0xf] }
  0xc9   : > { %v5403_v3 = vpop.eup %5402  ;;  %v1082_v53 = vunpack.c.l.bf16 %v1058_v62  ;;  %v1083_v8 = vunpack.c.h.bf16 %v1058_v62  ;;  %v660_v9 = vpop.f32.mrf.mxu0  ;;  %v1130_v10 = vpack.c.bf16 %v1099_v54, %v1098_v0  ;;  %v728_v12 = vadd.f32 %v727_v7, %v6420_v60 }
  0xca   : > { %v1051_v11 = vpack.c.bf16 %v5403_v3, %v5401_v61  ;;  %5408 = vtanh.f32 %v990_v4  ;;  %v661_v18 = vadd.f32 %v660_v9, %v6417_v58  ;;  %v4751_v3 = vor.u32 %v5242_v52, %v4750_v51 }
  0xcb   : > { %v709_v13 = vpop.f32.mrf.mxu1  ;;  %v1114_v16 = vadd.f32 1.0, %v1082_v53  ;;  %v1115_v17 = vadd.f32 1.0, %v1083_v8  ;;  %5410 = vtanh.f32 %v991_v5  ;;  %v968_v19 = vpack.c.bf16 %v728_v12, %v679_v6 }
  0xcc   : > { %v1068_v20 = vunpack.c.l.bf16 %v1051_v11  ;;  %v1069_v21 = vunpack.c.h.bf16 %v1051_v11  ;;  %v710_v22 = vadd.f32 %v709_v13, %v6420_v60  ;;  %v1146_v25 = vunpack.c.l.bf16 %v1130_v10  ;;  %2443 = vmatpush.bf16.msra.mxu2 %v4751_v3 }
  0xcd   : > { %v5405_v63 = vpop.eup %5404  ;;  %v1006_v26 = vunpack.c.l.bf16 %v968_v19  ;;  %v1007_v27 = vunpack.c.h.bf16 %v968_v19  ;;  %v1147_v29 = vunpack.c.h.bf16 %v1130_v10  ;;  %v1138_v30 = vpack.c.bf16 %v1115_v17, %v1114_v16  ;;  %v4942_v17 = vld [vmem:[#allocation2 + $0x240] sm:$0xf] }
  0xce   : > { %v5407_v24 = vpop.eup %5406  ;;  %v947_v32 = vpack.c.bf16 %v710_v22, %v661_v18  ;;  %v1100_v36 = vadd.f32 1.0, %v1068_v20  ;;  %v1101_v37 = vadd.f32 1.0, %v1069_v21  ;;  %v1178_v43 = vmul.f32 0.5, %v1146_v25  ;;  %v5290_v18 = vld [vmem:[#allocation2 + $0x254] sm:$0xf0] }
  0xcf   : > { %v1059_v31 = vpack.c.bf16 %v5407_v24, %v5405_v63  ;;  %v680_v33 = vpop.f32.mrf.mxu2  ;;  %5412 = vtanh.f32 %v1006_v26  ;;  %v1179_v47 = vmul.f32 0.5, %v1147_v29  ;;  %v1162_v48 = vunpack.c.l.bf16 %v1138_v30 }
  0xd0   : > { %v5409_v34 = vpop.eup %5408  ;;  %v729_v35 = vpop.f32.mrf.mxu3  ;;  %5414 = vtanh.f32 %v1007_v27  ;;  %v992_v44 = vunpack.c.l.bf16 %v947_v32  ;;  %v681_v45 = vadd.f32 %v680_v33, %v6417_v58  ;;  %v993_v50 = vunpack.c.h.bf16 %v947_v32 }
  0xd1   : > { %v1084_v38 = vunpack.c.l.bf16 %v1059_v31  ;;  %v1085_v39 = vunpack.c.h.bf16 %v1059_v31  ;;  %v663_v41 = vpop.f32.mrf.mxu0  ;;  %v5411_v42 = vpop.eup %5410  ;;  %v1163_v0 = vunpack.c.h.bf16 %v1138_v30  ;;  %v730_v54 = vadd.f32 %v729_v35, %v6420_v60 }
  0xd2   : > { %v1052_v49 = vpack.c.bf16 %v5411_v42, %v5409_v34  ;;  %5416 = vtanh.f32 %v992_v44  ;;  %v1131_v55 = vpack.c.bf16 %v1101_v37, %v1100_v36  ;;  %v664_v1 = vadd.f32 %v663_v41, %v6417_v58  ;;  %v5239_v41 = vld [vmem:[#allocation2 + $0xc4] sm:$0xf]  ;;  %v4752_v42 = vld [vmem:[#allocation2 + $0xd8] sm:$0xf0] }
  0xd3   : > { %v712_v46 = vpop.f32.mrf.mxu1  ;;  %v1116_v56 = vadd.f32 1.0, %v1084_v38  ;;  %v1117_v59 = vadd.f32 1.0, %v1085_v39  ;;  %5418 = vtanh.f32 %v993_v50  ;;  %v971_v62 = vpack.c.bf16 %v730_v54, %v681_v45 }
  0xd4   : > { %780 = vmatmul.bf16.gmra.mxu2 %v6379_v28  ;;  %878 = vmatmul.bf16.gmra.mxu0 %v6379_v28  ;;  %v713_v2 = vadd.f32 %v712_v46, %v6420_v60  ;;  %v6452_v4 = vmul.f32 0.5, %v1162_v48  ;;  %v1070_v5 = vunpack.c.l.bf16 %v1052_v49  ;;  %v1071_v6 = vunpack.c.h.bf16 %v1052_v49  ;;  %v5287_v46 = vld [vmem:[#allocation2 + $0x244] sm:$0xf] }
  0xd5   : > { %829 = vmatmul.bf16.gmra.mxu3 %v6379_v28  ;;  %v5413_v61 = vpop.eup %5412  ;;  %v6454_v53 = vpack.c.bf16 %v1179_v47, %v1178_v43  ;;  %v1008_v9 = vunpack.c.l.bf16 %v971_v62  ;;  %v1009_v10 = vunpack.c.h.bf16 %v971_v62  ;;  %v1148_v13 = vunpack.c.l.bf16 %v1131_v55  ;;  %v4944_v47 = vld [vmem:[#allocation2 + $0x258] sm:$0xf0] }
  0xd6   : > { %927 = vmatmul.bf16.gmra.mxu1 %v6379_v28  ;;  %v5415_v8 = vpop.eup %5414  ;;  %v950_v11 = vpack.c.bf16 %v713_v2, %v664_v1  ;;  %v1149_v14 = vunpack.c.h.bf16 %v1131_v55  ;;  %v1139_v15 = vpack.c.bf16 %v1117_v59, %v1116_v56  ;;  %v6457_v20 = vmul.f32 0.5, %v1163_v0 }
  0xd7   : > { %v683_v7 = vpop.f32.mrf.mxu2  ;;  %v1060_v16 = vpack.c.bf16 %v5415_v8, %v5413_v61  ;;  %5420 = vtanh.f32 %v1008_v9  ;;  %v1102_v25 = vadd.f32 1.0, %v1070_v5  ;;  %v1103_v26 = vadd.f32 1.0, %v1071_v6 }
  0xd8   : > { %v684_v28 = vadd.f32 %v683_v7, %v6417_v58  ;;  %v732_v12 = vpop.f32.mrf.mxu3  ;;  %v5417_v63 = vpop.eup %5416  ;;  %v994_v21 = vunpack.c.l.bf16 %v950_v11  ;;  %v995_v29 = vunpack.c.h.bf16 %v950_v11  ;;  %5422 = vtanh.f32 %v1009_v10 }
  0xd9   : > { %v665_v19 = vpop.f32.mrf.mxu0  ;;  %v733_v22 = vadd.f32 %v732_v12, %v6420_v60  ;;  %v5419_v24 = vpop.eup %5418  ;;  %v1086_v27 = vunpack.c.l.bf16 %v1060_v16  ;;  %v4943_v32 = vor.u32 %v5290_v18, %v4942_v17  ;;  %v6460_v33 = vmul.f32 0.5, %v1148_v13 }
  0xda   : > { %v1053_v30 = vpack.c.bf16 %v5419_v24, %v5417_v63  ;;  %v6462_v34 = vmul.f32 0.5, %v1149_v14  ;;  %v1164_v35 = vunpack.c.l.bf16 %v1139_v15  ;;  %v1087_v36 = vunpack.c.h.bf16 %v1060_v16  ;;  %v5236_v24 = vld [vmem:[#allocation2 + $0xa4] sm:$0xf0] }
  0xdb   : > { %v714_v23 = vpop.f32.mrf.mxu1  ;;  %v974_v31 = vpack.c.bf16 %v733_v22, %v684_v28  ;;  %5424 = vtanh.f32 %v994_v21  ;;  %2492 = vmatpush.bf16.msra.mxu3 %v4943_v32  ;;  %v1165_v43 = vunpack.c.h.bf16 %v1139_v15  ;;  %v666_v45 = vadd.f32 %v665_v19, %v6417_v58 }
  0xdc   : > { %v1072_v37 = vunpack.c.l.bf16 %v1053_v30  ;;  %v1073_v38 = vunpack.c.h.bf16 %v1053_v30  ;;  %5426 = vtanh.f32 %v995_v29  ;;  %v6465_v50 = vpack.c.bf16 %v1103_v26, %v1102_v25 }
  0xdd   : > { %v1010_v39 = vunpack.c.l.bf16 %v974_v31  ;;  %v1011_v44 = vunpack.c.h.bf16 %v974_v31  ;;  %v5421_v49 = vpop.eup %5420  ;;  %v1118_v51 = vadd.f32 1.0, %v1086_v27  ;;  %v715_v52 = vadd.f32 %v714_v23, %v6420_v60  ;;  %v4726_v23 = vld [vmem:[#allocation2 + $0x90] sm:$0xf] }
  0xde   : > { %v1119_v54 = vadd.f32 1.0, %v1087_v36  ;;  %v1104_v55 = vadd.f32 1.0, %v1072_v37  ;;  %v4755_v56 = vor.u32 %v5239_v41, %v4752_v42  ;;  %v5423_v59 = vpop.eup %5422  ;;  %v1105_v61 = vadd.f32 1.0, %v1073_v38 }
  0xdf   : > { %v685_v48 = vpop.f32.mrf.mxu2  ;;  %5428 = vtanh.f32 %v1010_v39  ;;  %v953_v62 = vpack.c.bf16 %v715_v52, %v666_v45  ;;  %v4947_v1 = vor.u32 %v5287_v46, %v4944_v47  ;;  %v6469_v3 = vmul.f32 0.5, %v1164_v35 }
  0xe0   : > { %v734_v0 = vpop.f32.mrf.mxu3  ;;  %5430 = vtanh.f32 %v1011_v44  ;;  %v686_v2 = vadd.f32 %v685_v48, %v6417_v58  ;;  %v6471_v5 = vmul.f32 0.5, %v1165_v43  ;;  %v1061_v6 = vpack.c.bf16 %v5423_v59, %v5421_v49  ;;  %2541 = vmatpush.bf16.msra.mxu0 %v4755_v56 }
  0xe1   : > { %v735_v7 = vadd.f32 %v734_v0, %v6420_v60  ;;  %v668_v8 = vpop.f32.mrf.mxu0  ;;  %v5425_v10 = vpop.eup %5424  ;;  %v1150_v11 = vunpack.c.l.bf16 %v6465_v50  ;;  %v1151_v28 = vunpack.c.h.bf16 %v6465_v50  ;;  %v996_v12 = vunpack.c.l.bf16 %v953_v62  ;;  %2590 = vmatpush.bf16.msra.mxu1 %v4947_v1  ;;  %v4918_v0 = vld [vmem:[#allocation2 + $0x210] sm:$0xf] }
  0xe2   : > { %v997_v13 = vunpack.c.h.bf16 %v953_v62  ;;  %v5427_v14 = vpop.eup %5426  ;;  %v1140_v15 = vpack.c.bf16 %v1119_v54, %v1118_v51  ;;  %v1088_v16 = vunpack.c.l.bf16 %v1061_v6  ;;  %v1089_v17 = vunpack.c.h.bf16 %v1061_v6  ;;  %v5284_v54 = vld [vmem:[#allocation2 + $0x224] sm:$0xf0] }
  0xe3   : > { %v717_v9 = vpop.f32.mrf.mxu1  ;;  %v977_v18 = vpack.c.bf16 %v735_v7, %v686_v2  ;;  %v1133_v63 = vpack.c.bf16 %v1105_v61, %v1104_v55  ;;  %v1054_v21 = vpack.c.bf16 %v5427_v14, %v5425_v10  ;;  %5432 = vtanh.f32 %v996_v12 }
  0xe4   : > { %785 = vmatmul.bf16.gmra.mxu2 %v6399_v40  ;;  %883 = vmatmul.bf16.gmra.mxu0 %v6399_v40  ;;  %v669_v22 = vadd.f32 %v668_v8, %v6417_v58  ;;  %v1120_v26 = vadd.f32 1.0, %v1088_v16  ;;  %v1121_v27 = vadd.f32 1.0, %v1089_v17  ;;  %5434 = vtanh.f32 %v997_v13 }
  0xe5   : > { %834 = vmatmul.bf16.gmra.mxu3 %v6399_v40  ;;  %v5429_v19 = vpop.eup %5428  ;;  %v1012_v29 = vunpack.c.l.bf16 %v977_v18  ;;  %v1074_v31 = vunpack.c.l.bf16 %v1054_v21  ;;  %v1075_v32 = vunpack.c.h.bf16 %v1054_v21  ;;  %v1013_v36 = vunpack.c.h.bf16 %v977_v18 }
  0xe6   : > { %932 = vmatmul.bf16.gmra.mxu1 %v6399_v40  ;;  %v5431_v25 = vpop.eup %5430  ;;  %v1141_v38 = vpack.c.bf16 %v1121_v27, %v1120_v26  ;;  %v718_v39 = vadd.f32 %v717_v9, %v6420_v60  ;;  %v4727_v41 = vor.u32 %v5236_v24, %v4726_v23  ;;  %v6482_v45 = vmul.f32 0.5, %v1150_v11  ;;  %v5233_v23 = vld [vmem:[#allocation2 + $0x94] sm:$0xf]  ;;  %v4728_v24 = vld [vmem:[#allocation2 + $0xa8] sm:$0xf0] }
  0xe7   : > { %v688_v30 = vpop.f32.mrf.mxu2  ;;  %v1062_v35 = vpack.c.bf16 %v5431_v25, %v5429_v19  ;;  %5436 = vtanh.f32 %v1012_v29  ;;  %v1106_v42 = vadd.f32 1.0, %v1074_v31  ;;  %v1107_v43 = vadd.f32 1.0, %v1075_v32  ;;  %v4920_v31 = vld [vmem:[#allocation2 + $0x228] sm:$0xf0] }
  0xe8   : > { %v737_v37 = vpop.f32.mrf.mxu3  ;;  %v6484_v46 = vmul.f32 0.5, %v1151_v28  ;;  %5438 = vtanh.f32 %v1013_v36  ;;  %v956_v47 = vpack.c.bf16 %v718_v39, %v669_v22  ;;  %2444 = vmatpush.bf16.msra.mxu2 %v4727_v41  ;;  %v1166_v49 = vunpack.c.l.bf16 %v1140_v15 }
  0xe9   : > { %v1090_v44 = vunpack.c.l.bf16 %v1062_v35  ;;  %v1091_v40 = vunpack.c.h.bf16 %v1062_v35  ;;  %v5433_v48 = vpop.eup %5432  ;;  %v1167_v50 = vunpack.c.h.bf16 %v1140_v15  ;;  %v1152_v51 = vunpack.c.l.bf16 %v1133_v63  ;;  %v670_v1 = vpop.f32.mrf.mxu0 }
  0xea   : > { %v1153_v52 = vunpack.c.h.bf16 %v1133_v63  ;;  %v5435_v55 = vpop.eup %5434  ;;  %v6486_v56 = vpack.c.bf16 %v1107_v43, %v1106_v42  ;;  %v998_v59 = vunpack.c.l.bf16 %v956_v47  ;;  %v999_v61 = vunpack.c.h.bf16 %v956_v47 }
  0xeb   : > { %v689_v62 = vadd.f32 %v688_v30, %v6417_v58  ;;  %v719_v2 = vpop.f32.mrf.mxu1  ;;  %v1168_v6 = vunpack.c.l.bf16 %v1141_v38  ;;  %v1169_v7 = vunpack.c.h.bf16 %v1141_v38  ;;  %v1122_v8 = vadd.f32 1.0, %v1090_v44  ;;  %v5281_v30 = vld [vmem:[#allocation2 + $0x214] sm:$0xf] }
  0xec   : > { %v1123_v9 = vadd.f32 1.0, %v1091_v40  ;;  %v1055_v11 = vpack.c.bf16 %v5435_v55, %v5433_v48  ;;  %5440 = vtanh.f32 %v998_v59  ;;  %v738_v28 = vadd.f32 %v737_v37, %v6420_v60 }
  0xed   : > { %v5437_v10 = vpop.eup %5436  ;;  %v4919_v12 = vor.u32 %v5284_v54, %v4918_v0  ;;  %v6490_v13 = vmul.f32 0.5, %v1166_v49  ;;  %v6492_v14 = vmul.f32 0.5, %v1167_v50  ;;  %v6494_v15 = vmul.f32 0.5, %v1152_v51 }
  0xee   : > { %v671_v16 = vadd.f32 %v670_v1, %v6417_v58  ;;  %v5439_v19 = vpop.eup %5438  ;;  %v6497_v63 = vmul.f32 0.5, %v1153_v52  ;;  %v1154_v21 = vunpack.c.l.bf16 %v6486_v56  ;;  %5442 = vtanh.f32 %v999_v61 }
  0xef   : > { %v690_v17 = vpop.f32.mrf.mxu2  ;;  %v980_v22 = vpack.c.bf16 %v738_v28, %v689_v62  ;;  %2493 = vmatpush.bf16.msra.mxu3 %v4919_v12  ;;  %v6500_v25 = vmul.f32 0.5, %v1168_v6  ;;  %v6502_v26 = vmul.f32 0.5, %v1169_v7  ;;  %v1063_v27 = vpack.c.bf16 %v5439_v19, %v5437_v10  ;;  %v5230_v28 = vld [vmem:[#allocation2 + $0x74] sm:$0xf0] }
  0xf0   : > { %v739_v18 = vpop.f32.mrf.mxu3  ;;  %v720_v29 = vadd.f32 %v719_v2, %v6420_v60  ;;  %v1142_v32 = vpack.c.bf16 %v1123_v9, %v1122_v8  ;;  %v1076_v35 = vunpack.c.l.bf16 %v1055_v11  ;;  %v1155_v38 = vunpack.c.h.bf16 %v6486_v56 }
  0xf1   : > { %v1014_v36 = vunpack.c.l.bf16 %v980_v22  ;;  %v1015_v37 = vunpack.c.h.bf16 %v980_v22  ;;  %v1077_v39 = vunpack.c.h.bf16 %v1055_v11  ;;  %v4731_v42 = vor.u32 %v5233_v23, %v4728_v24  ;;  %v849_v56 = vpop.f32.mrf.mxu0  ;;  %v4702_v11 = vld [vmem:[#allocation2 + $0x60] sm:$0xf] }
  0xf2   : > { %v959_v41 = vpack.c.bf16 %v720_v29, %v671_v16  ;;  %v5441_v43 = vpop.eup %5440  ;;  %v6506_v44 = vmul.f32 0.5, %v1154_v21  ;;  %v4923_v40 = vor.u32 %v5281_v30, %v4920_v31  ;;  %v691_v47 = vadd.f32 %v690_v17, %v6417_v58 }
  0xf3   : > { %5444 = vtanh.f32 %v1014_v36  ;;  %v1092_v48 = vunpack.c.l.bf16 %v1063_v27  ;;  %v1093_v49 = vunpack.c.h.bf16 %v1063_v27  ;;  %2542 = vmatpush.bf16.msra.mxu0 %v4731_v42  ;;  %v1170_v52 = vunpack.c.l.bf16 %v1142_v32  ;;  %v898_v59 = vpop.f32.mrf.mxu1 }
  0xf4   : > { %5446 = vtanh.f32 %v1015_v37  ;;  %v1000_v50 = vunpack.c.l.bf16 %v959_v41  ;;  %v5443_v51 = vpop.eup %5442  ;;  %v1108_v0 = vadd.f32 1.0, %v1076_v35  ;;  %v1001_v54 = vunpack.c.h.bf16 %v959_v41  ;;  %2591 = vmatpush.bf16.msra.mxu1 %v4923_v40 }
  0xf5   : > { %v740_v55 = vadd.f32 %v739_v18, %v6420_v60  ;;  %v1109_v61 = vadd.f32 1.0, %v1077_v39  ;;  %v1056_v62 = vpack.c.bf16 %v5443_v51, %v5441_v43  ;;  %v6511_v1 = vperm.slane %v6414_v57, 4  ;;  %v4894_v51 = vld [vmem:[#allocation2 + $0x1e0] sm:$0xf] }
  0xf6   : > { %5448 = vtanh.f32 %v1000_v50  ;;  %v6513_v58 = vmul.f32 0.5, %v1155_v38  ;;  %v1171_v2 = vunpack.c.h.bf16 %v1142_v32  ;;  %v1124_v7 = vadd.f32 1.0, %v1092_v48 }
  0xf7   : > { %5450 = vtanh.f32 %v1001_v54  ;;  %v983_v6 = vpack.c.bf16 %v740_v55, %v691_v47  ;;  %v1125_v8 = vadd.f32 1.0, %v1093_v49  ;;  %v1078_v9 = vunpack.c.l.bf16 %v1056_v62  ;;  %v751_v60 = vpop.f32.mrf.mxu2 }
  0xf8   : > { %v1079_v10 = vunpack.c.h.bf16 %v1056_v62  ;;  %v800_v12 = vpop.f32.mrf.mxu3  ;;  %v850_v19 = vadd.f32 %v849_v56, %v6511_v1  ;;  %v6517_v21 = vperm.slane %v6414_v57, 5  ;;  %v6519_v23 = vmul.f32 0.5, %v1170_v52  ;;  %v5278_v52 = vld [vmem:[#allocation2 + $0x1f4] sm:$0xf0] }
  0xf9   : > { %v5445_v16 = vpop.eup %5444  ;;  %v1016_v17 = vunpack.c.l.bf16 %v983_v6  ;;  %v1017_v18 = vunpack.c.h.bf16 %v983_v6  ;;  %v1135_v24 = vpack.c.bf16 %v1109_v61, %v1108_v0  ;;  %v1110_v27 = vadd.f32 1.0, %v1078_v9 }
  0xfa   : > { %v5447_v22 = vpop.eup %5446  ;;  %v1111_v29 = vadd.f32 1.0, %v1079_v10  ;;  %v899_v31 = vadd.f32 %v898_v59, %v6517_v21  ;;  %v4703_v32 = vor.u32 %v5230_v28, %v4702_v11  ;;  %v6522_v36 = vmul.f32 0.5, %v1171_v2  ;;  %v851_v59 = vpop.f32.mrf.mxu0  ;;  %v5227_v11 = vld [vmem:[#allocation2 + $0x64] sm:$0xf]  ;;  %v4704_v28 = vld [vmem:[#allocation2 + $0x78] sm:$0xf0] }
  0xfb   : > { %v1064_v30 = vpack.c.bf16 %v5447_v22, %v5445_v16  ;;  %5452 = vtanh.f32 %v1016_v17  ;;  %v1143_v37 = vpack.c.bf16 %v1125_v8, %v1124_v7  ;;  %v6525_v38 = vperm.slane %v6414_v57, 2  ;;  %v900_v61 = vpop.f32.mrf.mxu1  ;;  %v4896_v22 = vld [vmem:[#allocation2 + $0x1f8] sm:$0xf0] }
  0xfc   : > { %v5449_v35 = vpop.eup %5448  ;;  %5454 = vtanh.f32 %v1017_v18  ;;  %v940_v43 = vpack.c.bf16 %v899_v31, %v850_v19  ;;  %2445 = vmatpush.bf16.msra.mxu2 %v4703_v32  ;;  %v6528_v40 = vperm.slane %v6414_v57, 3  ;;  %v1156_v47 = vunpack.c.l.bf16 %v1135_v24 }
  0xfd   : > { %v5451_v39 = vpop.eup %5450  ;;  %v1094_v41 = vunpack.c.l.bf16 %v1064_v30  ;;  %v1095_v42 = vunpack.c.h.bf16 %v1064_v30  ;;  %v1136_v48 = vpack.c.bf16 %v1111_v29, %v1110_v27  ;;  %v752_v50 = vadd.f32 %v751_v60, %v6525_v38  ;;  %v5275_v60 = vld [vmem:[#allocation2 + $0x1e4] sm:$0xf] }
  0xfe   : > { %v1057_v49 = vpack.c.bf16 %v5451_v39, %v5449_v35  ;;  %v1306_v55 = vunpack.c.l.bf16 %v940_v43  ;;  %v1307_v56 = vunpack.c.h.bf16 %v940_v43  ;;  %v1157_v62 = vunpack.c.h.bf16 %v1135_v24 }
  0xff   : > { %v1126_v0 = vadd.f32 1.0, %v1094_v41  ;;  %v1127_v54 = vadd.f32 1.0, %v1095_v42  ;;  %v1172_v2 = vunpack.c.l.bf16 %v1143_v37  ;;  %v1173_v57 = vunpack.c.h.bf16 %v1143_v37  ;;  %v753_v27 = vpop.f32.mrf.mxu2 }
 0x100   : > { %v1080_v6 = vunpack.c.l.bf16 %v1057_v49  ;;  %v1081_v7 = vunpack.c.h.bf16 %v1057_v49  ;;  %5456 = vtanh.f32 %v1306_v55  ;;  %v801_v9 = vadd.f32 %v800_v12, %v6528_v40  ;;  %v802_v24 = vpop.f32.mrf.mxu3 }
 0x101   : > { %v5453_v8 = vpop.eup %5452  ;;  %v4895_v10 = vor.u32 %v5278_v52, %v4894_v51  ;;  %v1144_v17 = vpack.c.bf16 %v1127_v54, %v1126_v0  ;;  %5458 = vtanh.f32 %v1307_v56  ;;  %v1158_v29 = vunpack.c.l.bf16 %v1136_v48 }
 0x102   : > { %v5455_v16 = vpop.eup %5454  ;;  %v1112_v18 = vadd.f32 1.0, %v1080_v6  ;;  %v1113_v19 = vadd.f32 1.0, %v1081_v7  ;;  %v939_v31 = vpack.c.bf16 %v801_v9, %v752_v50  ;;  %v852_v32 = vadd.f32 %v851_v59, %v6511_v1 }
 0x103   : > { %v1065_v30 = vpack.c.bf16 %v5455_v16, %v5453_v8  ;;  %2494 = vmatpush.bf16.msra.mxu3 %v4895_v10  ;;  %v1159_v35 = vunpack.c.h.bf16 %v1136_v48  ;;  %v901_v12 = vadd.f32 %v900_v61, %v6517_v21  ;;  %v4707_v37 = vor.u32 %v5227_v11, %v4704_v28  ;;  %v903_v9 = vpop.f32.mrf.mxu1 }
 0x104   : > { %v4899_v39 = vor.u32 %v5275_v60, %v4896_v22  ;;  %v6534_v41 = vmul.f32 0.5, %v1156_v47  ;;  %v6536_v42 = vmul.f32 0.5, %v1157_v62  ;;  %v6538_v43 = vmul.f32 0.5, %v1172_v2 }
 0x105   : > { %v6540_v49 = vmul.f32 0.5, %v1173_v57  ;;  %v1174_v51 = vunpack.c.l.bf16 %v1144_v17  ;;  %v6542_v52 = vpack.c.bf16 %v1113_v19, %v1112_v18  ;;  %v1226_v50 = vunpack.c.l.bf16 %v939_v31  ;;  %2543 = vmatpush.bf16.msra.mxu0 %v4707_v37  ;;  %v854_v57 = vpop.f32.mrf.mxu0 }
 0x106   : > { %v1227_v0 = vunpack.c.h.bf16 %v939_v31  ;;  %2592 = vmatpush.bf16.msra.mxu1 %v4899_v39  ;;  %v5457_v48 = vpop.eup %5456  ;;  %v1096_v54 = vunpack.c.l.bf16 %v1065_v30  ;;  %v1097_v55 = vunpack.c.h.bf16 %v1065_v30  ;;  %v943_v56 = vpack.c.bf16 %v901_v12, %v852_v32 }
 0x107   : > { %v754_v47 = vadd.f32 %v753_v27, %v6525_v38  ;;  %v5459_v59 = vpop.eup %5458  ;;  %v6545_v61 = vmul.f32 0.5, %v1158_v29  ;;  %v6547_v62 = vmul.f32 0.5, %v1159_v35  ;;  %5460 = vtanh.f32 %v1226_v50  ;;  %v4678_v27 = vld [vmem:[#allocation2 + $0x30] sm:$0xf]  ;;  %v756_v31 = vpop.f32.mrf.mxu2 }
 0x108   : > { %v803_v2 = vadd.f32 %v802_v24, %v6528_v40  ;;  %v1175_v6 = vunpack.c.h.bf16 %v1144_v17  ;;  %v1370_v7 = vpack.c.bf16 %v5459_v59, %v5457_v48  ;;  %5462 = vtanh.f32 %v1227_v0  ;;  %v5224_v24 = vld [vmem:[#allocation2 + $0x44] sm:$0xf0]  ;;  %v805_v32 = vpop.f32.mrf.mxu3  ;;  %v4870_v48 = vld [vmem:[#allocation2 + $0x1b0] sm:$0xf] }
 0x109   : > { %v1308_v8 = vunpack.c.l.bf16 %v943_v56  ;;  %v6550_v10 = vmul.f32 0.5, %v1174_v51  ;;  %v1160_v11 = vunpack.c.l.bf16 %v6542_v52  ;;  %v1309_v28 = vunpack.c.h.bf16 %v943_v56 }
 0x10a   : > { %v942_v60 = vpack.c.bf16 %v803_v2, %v754_v47  ;;  %v1128_v16 = vadd.f32 1.0, %v1096_v54  ;;  %v1129_v18 = vadd.f32 1.0, %v1097_v55  ;;  %v1546_v19 = vunpack.c.l.bf16 %v6454_v53  ;;  %v5272_v54 = vld [vmem:[#allocation2 + $0x1c4] sm:$0xf0] }
 0x10b   : > { %v1547_v22 = vunpack.c.h.bf16 %v6454_v53  ;;  %5464 = vtanh.f32 %v1308_v8  ;;  %v855_v30 = vadd.f32 %v854_v57, %v6511_v1  ;;  %v6556_v35 = vmul.f32 0.5, %v1175_v6 }
 0x10c   : > { %v1228_v17 = vunpack.c.l.bf16 %v942_v60  ;;  %v1229_v29 = vunpack.c.h.bf16 %v942_v60  ;;  %v1161_v12 = vunpack.c.h.bf16 %v6542_v52  ;;  %v1386_v37 = vunpack.c.l.bf16 %v1370_v7 }
 0x10d   : > { %7718 = vst [vmem:[#allocation8_spill] sm:$0xff] %v6556_v35  ;;  %v1387_v39 = vunpack.c.h.bf16 %v1370_v7  ;;  %v5461_v51 = vpop.eup %5460  ;;  %v6559_v50 = vmul.f32 0.5, %v1160_v11  ;;  %5466 = vtanh.f32 %v1309_v28  ;;  %v904_v53 = vadd.f32 %v903_v9, %v6517_v21 }
 0x10e   : > { %v4679_v0 = vor.u32 %v5224_v24, %v4678_v27  ;;  %v5463_v55 = vpop.eup %5462  ;;  %v6562_v56 = vpack.c.bf16 %v1129_v18, %v1128_v16  ;;  %5468 = vtanh.f32 %v1228_v17  ;;  %v757_v47 = vadd.f32 %v756_v31, %v6525_v38 }
 0x10f   : > { %v806_v59 = vadd.f32 %v805_v32, %v6528_v40  ;;  %v1290_v52 = vpack.c.bf16 %v5463_v55, %v5461_v51  ;;  %v6568_v2 = vpack.c.bf16 %v6462_v34, %v6460_v33  ;;  %5470 = vtanh.f32 %v1229_v29  ;;  %v856_v33 = vpop.f32.mrf.mxu0  ;;  %v905_v34 = vpop.f32.mrf.mxu1 }
 0x110   : > { %v946_v6 = vpack.c.bf16 %v904_v53, %v855_v30  ;;  %2446 = vmatpush.bf16.msra.mxu2 %v4679_v0  ;;  %v1418_v7 = vadd.f32 1.0, %v1386_v37  ;;  %v1419_v8 = vadd.f32 1.0, %v1387_v39  ;;  %v4871_v9 = vor.u32 %v5272_v54, %v4870_v48  ;;  %v5221_v0 = vld [vmem:[#allocation2 + $0x34] sm:$0xf]  ;;  %v4680_v48 = vld [vmem:[#allocation2 + $0x48] sm:$0xf0] }
 0x111   : > { %v945_v57 = vpack.c.bf16 %v806_v59, %v757_v47  ;;  %v5465_v11 = vpop.eup %5464  ;;  %v1578_v28 = vunpack.c.l.bf16 %v1290_v52  ;;  %v1579_v60 = vunpack.c.h.bf16 %v1290_v52  ;;  %v6570_v27 = vmul.f32 0.5, %v1161_v12 }
 0x112   : > { %v1310_v16 = vunpack.c.l.bf16 %v946_v6  ;;  %v1311_v18 = vunpack.c.h.bf16 %v946_v6  ;;  %v1176_v24 = vunpack.c.l.bf16 %v6562_v56  ;;  %2495 = vmatpush.bf16.msra.mxu3 %v4871_v9  ;;  %v1548_v53 = vunpack.c.l.bf16 %v6568_v2  ;;  %v5269_v6 = vld [vmem:[#allocation2 + $0x1b4] sm:$0xf] }
 0x113   : > { %v1230_v17 = vunpack.c.l.bf16 %v945_v57  ;;  %v1231_v31 = vunpack.c.h.bf16 %v945_v57  ;;  %v5467_v29 = vpop.eup %5466  ;;  %v1610_v32 = vmul.f32 %v1578_v28, %v1546_v19  ;;  %v1611_v37 = vmul.f32 %v1579_v60, %v1547_v22  ;;  %v4872_v57 = vld [vmem:[#allocation2 + $0x1c8] sm:$0xf0] }
 0x114   : > { %5472 = vtanh.f32 %v1310_v16  ;;  %v5469_v39 = vpop.eup %5468  ;;  %v1371_v51 = vpack.c.bf16 %v5467_v29, %v5465_v11  ;;  %v1549_v12 = vunpack.c.h.bf16 %v6568_v2  ;;  %v1450_v55 = vpack.c.bf16 %v1419_v8, %v1418_v7 }
 0x115   : > { %5474 = vtanh.f32 %v1311_v18  ;;  %v5471_v54 = vpop.eup %5470  ;;  %v857_v47 = vadd.f32 %v856_v33, %v6511_v1  ;;  %v906_v59 = vadd.f32 %v905_v34, %v6517_v21  ;;  %v6578_v9 = vpack.c.bf16 %v1611_v37, %v1610_v32  ;;  %v758_v18 = vpop.f32.mrf.mxu2 }
 0x116   : > { %5476 = vtanh.f32 %v1230_v17  ;;  %v1388_v52 = vunpack.c.l.bf16 %v1371_v51  ;;  %v1389_v19 = vunpack.c.h.bf16 %v1371_v51  ;;  %v1291_v22 = vpack.c.bf16 %v5471_v54, %v5469_v39  ;;  %v807_v17 = vpop.f32.mrf.mxu3 }
 0x117   : > { %5478 = vtanh.f32 %v1231_v31  ;;  %v1212_v2 = vpack.c.bf16 %v6484_v46, %v6482_v45  ;;  %v949_v11 = vpack.c.bf16 %v906_v59, %v857_v47  ;;  %v4683_v28 = vor.u32 %v5221_v0, %v4680_v48 }
 0x118   : > { %v1420_v60 = vadd.f32 1.0, %v1388_v52  ;;  %v1421_v7 = vadd.f32 1.0, %v1389_v19  ;;  %v1580_v8 = vunpack.c.l.bf16 %v1291_v22  ;;  %v1581_v16 = vunpack.c.h.bf16 %v1291_v22  ;;  %v859_v22 = vpop.f32.mrf.mxu0 }
 0x119   : > { %v1466_v34 = vunpack.c.l.bf16 %v1450_v55  ;;  %v1312_v29 = vunpack.c.l.bf16 %v949_v11  ;;  %v1313_v39 = vunpack.c.h.bf16 %v949_v11  ;;  %2544 = vmatpush.bf16.msra.mxu0 %v4683_v28  ;;  %v4875_v31 = vor.u32 %v5269_v6, %v4872_v57  ;;  %v908_v6 = vpop.f32.mrf.mxu1 }
 0x11a   : > { %v5473_v33 = vpop.eup %5472  ;;  %v1467_v32 = vunpack.c.h.bf16 %v1450_v55  ;;  %v1451_v37 = vpack.c.bf16 %v1421_v7, %v1420_v60  ;;  %v1612_v54 = vmul.f32 %v1580_v8, %v1548_v53  ;;  %v1613_v30 = vmul.f32 %v1581_v16, %v1549_v12 }
 0x11b   : > { %v5475_v51 = vpop.eup %5474  ;;  %5480 = vtanh.f32 %v1312_v29  ;;  %2593 = vmatpush.bf16.msra.mxu1 %v4875_v31  ;;  %v759_v0 = vadd.f32 %v758_v18, %v6525_v38  ;;  %v808_v48 = vadd.f32 %v807_v17, %v6528_v40  ;;  %v1658_v59 = vunpack.c.l.bf16 %v6578_v9 }
 0x11c   : > { %v5477_v45 = vpop.eup %5476  ;;  %v1372_v46 = vpack.c.bf16 %v5475_v51, %v5473_v33  ;;  %v1468_v52 = vunpack.c.l.bf16 %v1451_v37  ;;  %v1643_v19 = vpack.c.bf16 %v1613_v30, %v1612_v54  ;;  %5482 = vtanh.f32 %v1313_v39 }
 0x11d   : > { %v5479_v47 = vpop.eup %5478  ;;  %v948_v12 = vpack.c.bf16 %v808_v48, %v759_v0  ;;  %v6587_v11 = vmul.f32 0.5, %v1176_v24  ;;  %v1498_v28 = vmul.f32 0.5, %v1466_v34  ;;  %v1499_v60 = vmul.f32 0.5, %v1467_v32  ;;  %v5218_v24 = vld [vmem:[#allocation2 + $0x14] sm:$0xf0]  ;;  %v761_v48 = vpop.f32.mrf.mxu2 }
 0x11e   : > { %v1390_v55 = vunpack.c.l.bf16 %v1372_v46  ;;  %v1391_v57 = vunpack.c.h.bf16 %v1372_v46  ;;  %v1292_v53 = vpack.c.bf16 %v5479_v47, %v5477_v45  ;;  %v1469_v7 = vunpack.c.h.bf16 %v1451_v37  ;;  %v4654_v46 = vld [vmem:[#allocation2] sm:$0xf]  ;;  %v810_v47 = vpop.f32.mrf.mxu3 }
 0x11f   : > { %7719 = vst [vmem:[#allocation9_spill] sm:$0xff] %v6587_v11  ;;  %v1659_v30 = vunpack.c.h.bf16 %v6578_v9  ;;  %v1550_v33 = vunpack.c.l.bf16 %v1212_v2  ;;  %v1551_v29 = vunpack.c.h.bf16 %v1212_v2  ;;  %v1232_v39 = vunpack.c.l.bf16 %v948_v12 }
 0x120   : > { %v1422_v8 = vadd.f32 1.0, %v1390_v55  ;;  %v1423_v16 = vadd.f32 1.0, %v1391_v57  ;;  %v1582_v18 = vunpack.c.l.bf16 %v1292_v53  ;;  %v1583_v17 = vunpack.c.h.bf16 %v1292_v53 }
 0x121   : > { %v5481_v31 = vpop.eup %5480  ;;  %5484 = vtanh.f32 %v1658_v59  ;;  %v1500_v51 = vmul.f32 0.5, %v1468_v52  ;;  %v1660_v54 = vunpack.c.l.bf16 %v1643_v19  ;;  %v1233_v37 = vunpack.c.h.bf16 %v948_v12 }
 0x122   : > { %v1452_v45 = vpack.c.bf16 %v1423_v16, %v1422_v8  ;;  %v5483_v0 = vpop.eup %5482  ;;  %v1614_v34 = vmul.f32 %v1582_v18, %v1550_v33  ;;  %v1615_v32 = vmul.f32 %v1583_v17, %v1551_v29  ;;  %5486 = vtanh.f32 %v1232_v39  ;;  %v910_v17 = vpop.f32.mrf.mxu1 }
 0x123   : > { %v1501_v55 = vmul.f32 0.5, %v1469_v7  ;;  %v1661_v57 = vunpack.c.h.bf16 %v1643_v19  ;;  %v6592_v2 = vpack.c.bf16 %v6497_v63, %v6494_v15  ;;  %5488 = vtanh.f32 %v1233_v37  ;;  %v861_v63 = vpop.f32.mrf.mxu0 }
 0x124   : > { %v1470_v9 = vunpack.c.l.bf16 %v1452_v45  ;;  %v860_v59 = vadd.f32 %v859_v22, %v6511_v1  ;;  %v909_v52 = vadd.f32 %v908_v6, %v6517_v21  ;;  %v4655_v53 = vor.u32 %v5218_v24, %v4654_v46 }
 0x125   : > { %v7720_v8 = vunpack.c.h.bf16 %v6562_v56  ;;  %v6600_v12 = vpack.c.bf16 %v1499_v60, %v1498_v28  ;;  %5490 = vtanh.f32 %v1659_v30  ;;  %v1373_v7 = vpack.c.bf16 %v5483_v0, %v5481_v31  ;;  %v4846_v60 = vld [vmem:[#allocation2 + $0x180] sm:$0xf]  ;;  %v5266_v30 = vld [vmem:[#allocation2 + $0x194] sm:$0xf0] }
 0x126   : > { %5492 = vtanh.f32 %v1660_v54  ;;  %v1644_v19 = vpack.c.bf16 %v1615_v32, %v1614_v34  ;;  %v952_v18 = vpack.c.bf16 %v909_v52, %v860_v59  ;;  %2447 = vmatpush.bf16.msra.mxu2 %v4655_v53  ;;  %v762_v15 = vadd.f32 %v761_v48, %v6525_v38  ;;  %v5215_v32 = vld [vmem:[#allocation2 + $0x4] sm:$0xf]  ;;  %v4848_v59 = vld [vmem:[#allocation2 + $0x198] sm:$0xf0] }
 0x127   : > { %v6598_v16 = vmul.f32 0.5, %v7720_v8  ;;  %v6603_v22 = vpop.eup %5484  ;;  %v6605_v6 = vpack.c.bf16 %v1501_v55, %v1500_v51  ;;  %5494 = vtanh.f32 %v1661_v57  ;;  %v1552_v56 = vunpack.c.l.bf16 %v6592_v2  ;;  %v4656_v51 = vld [vmem:[#allocation2 + $0x18] sm:$0xf0]  ;;  %v5263_v57 = vld [vmem:[#allocation2 + $0x184] sm:$0xf] }
 0x128   : > { %v811_v28 = vadd.f32 %v810_v47, %v6528_v40  ;;  %v5487_v33 = vpop.eup %5486  ;;  %v1471_v29 = vunpack.c.h.bf16 %v1452_v45  ;;  %v1502_v39 = vmul.f32 0.5, %v1470_v9  ;;  %v1553_v31 = vunpack.c.h.bf16 %v6592_v2 }
 0x129   : > { %7721 = vst [vmem:[#allocation10_spill] sm:$0xff] %v6598_v16  ;;  %v1314_v54 = vunpack.c.l.bf16 %v952_v18  ;;  %v1392_v46 = vunpack.c.l.bf16 %v1373_v7  ;;  %v1393_v24 = vunpack.c.h.bf16 %v1373_v7  ;;  %v1315_v0 = vunpack.c.h.bf16 %v952_v18  ;;  %v5489_v37 = vpop.eup %5488  ;;  %v812_v16 = vpop.f32.mrf.mxu3 }
 0x12a   : > { %v951_v34 = vpack.c.bf16 %v811_v28, %v762_v15  ;;  %v1662_v48 = vunpack.c.l.bf16 %v1644_v19  ;;  %v4847_v55 = vor.u32 %v5266_v30, %v4846_v60  ;;  %v862_v47 = vadd.f32 %v861_v63, %v6511_v1  ;;  %v763_v28 = vpop.f32.mrf.mxu2 }
 0x12b   : > { %5496 = vtanh.f32 %v1314_v54  ;;  %v5491_v52 = vpop.eup %5490  ;;  %v1293_v45 = vpack.c.bf16 %v5489_v37, %v5487_v33  ;;  %v1503_v8 = vmul.f32 0.5, %v1471_v29  ;;  %v1663_v7 = vunpack.c.h.bf16 %v1644_v19 }
 0x12c   : > { %5498 = vtanh.f32 %v1315_v0  ;;  %v1234_v9 = vunpack.c.l.bf16 %v951_v34  ;;  %v1235_v2 = vunpack.c.h.bf16 %v951_v34  ;;  %v5493_v53 = vpop.eup %5492  ;;  %2496 = vmatpush.bf16.msra.mxu3 %v4847_v55  ;;  %v911_v18 = vadd.f32 %v910_v17, %v6517_v21 }
 0x12d   : > { %v4659_v15 = vor.u32 %v5215_v32, %v4656_v51  ;;  %v5495_v54 = vpop.eup %5494  ;;  %v1424_v60 = vadd.f32 1.0, %v1392_v46  ;;  %v1425_v30 = vadd.f32 1.0, %v1393_v24  ;;  %v4851_v63 = vor.u32 %v5263_v57, %v4848_v59  ;;  %v864_v32 = vpop.f32.mrf.mxu0 }
 0x12e   : > { %5500 = vtanh.f32 %v1234_v9  ;;  %v1584_v11 = vunpack.c.l.bf16 %v1293_v45  ;;  %v1585_v35 = vunpack.c.h.bf16 %v1293_v45  ;;  %v955_v33 = vpack.c.bf16 %v911_v18, %v862_v47  ;;  %v913_v51 = vpop.f32.mrf.mxu1 }
 0x12f   : > { %5502 = vtanh.f32 %v1235_v2  ;;  %2545 = vmatpush.bf16.msra.mxu0 %v4659_v15  ;;  %v1214_v19 = vpack.c.bf16 %v6513_v58, %v6506_v44  ;;  %2594 = vmatpush.bf16.msra.mxu1 %v4851_v63  ;;  %v764_v17 = vadd.f32 %v763_v28, %v6525_v38  ;;  %v813_v29 = vadd.f32 %v812_v16, %v6528_v40 }
 0x130   : > { %5504 = vtanh.f32 %v1662_v48  ;;  %v6616_v34 = vpack.c.bf16 %v1503_v8, %v1502_v39  ;;  %v1316_v46 = vunpack.c.l.bf16 %v955_v33  ;;  %v1317_v24 = vunpack.c.h.bf16 %v955_v33 }
 0x131   : > { %v5497_v0 = vpop.eup %5496  ;;  %5506 = vtanh.f32 %v1663_v7  ;;  %v1453_v55 = vpack.c.bf16 %v1425_v30, %v1424_v60  ;;  %v954_v47 = vpack.c.bf16 %v813_v29, %v764_v17  ;;  %v865_v48 = vadd.f32 %v864_v32, %v6511_v1 }
 0x132   : > { %v5499_v37 = vpop.eup %5498  ;;  %v914_v44 = vadd.f32 %v913_v51, %v6517_v21  ;;  %v1616_v58 = vmul.f32 %v1584_v11, %v1552_v56  ;;  %v1617_v57 = vmul.f32 %v1585_v35, %v1553_v31  ;;  %5508 = vtanh.f32 %v1316_v46 }
 0x133   : > { %v1374_v59 = vpack.c.bf16 %v5499_v37, %v5497_v0  ;;  %v1554_v45 = vunpack.c.l.bf16 %v1214_v19  ;;  %v1555_v39 = vunpack.c.h.bf16 %v1214_v19  ;;  %5510 = vtanh.f32 %v1317_v24 }
 0x134   : > { %v5501_v16 = vpop.eup %5500  ;;  %v1236_v9 = vunpack.c.l.bf16 %v954_v47  ;;  %v1237_v18 = vunpack.c.h.bf16 %v954_v47  ;;  %v958_v15 = vpack.c.bf16 %v914_v44, %v865_v48  ;;  %v1472_v60 = vunpack.c.l.bf16 %v1453_v55 }
 0x135   : > { %v5503_v2 = vpop.eup %5502  ;;  %v1394_v8 = vunpack.c.l.bf16 %v1374_v59  ;;  %v1395_v7 = vunpack.c.h.bf16 %v1374_v59  ;;  %v1473_v30 = vunpack.c.h.bf16 %v1453_v55  ;;  %v6623_v11 = vpack.c.bf16 %v5491_v52, %v6603_v22 }
 0x136   : > { %v6620_v28 = vpop.eup %5504  ;;  %v1294_v63 = vpack.c.bf16 %v5503_v2, %v5501_v16  ;;  %v6627_v56 = vpack.c.bf16 %v1617_v57, %v1616_v58  ;;  %v6631_v31 = vpack.c.bf16 %v6536_v42, %v6534_v41  ;;  %v1318_v33 = vunpack.c.l.bf16 %v958_v15 }
 0x137   : > { %v6625_v35 = vpop.eup %5506  ;;  %v1723_v19 = vpack.c.bf16 %v5495_v54, %v5493_v53  ;;  %5512 = vtanh.f32 %v1236_v9  ;;  %v1319_v0 = vunpack.c.h.bf16 %v958_v15  ;;  %v1426_v24 = vadd.f32 1.0, %v1394_v8  ;;  %v766_v15 = vpop.f32.mrf.mxu2 }
 0x138   : > { %v1586_v17 = vunpack.c.l.bf16 %v1294_v63  ;;  %v1587_v29 = vunpack.c.h.bf16 %v1294_v63  ;;  %v5509_v46 = vpop.eup %5508  ;;  %v1427_v32 = vadd.f32 1.0, %v1395_v7  ;;  %5514 = vtanh.f32 %v1237_v18  ;;  %v4830_v7 = vld [vmem:[#allocation2 + $0x158] sm:$0xf]  ;;  %v5261_v18 = vld [vmem:[#allocation2 + $0x16c] sm:$0xf0] }
 0x139   : > { %v1738_v22 = vunpack.c.l.bf16 %v6600_v12  ;;  %v5511_v52 = vpop.eup %5510  ;;  %5516 = vtanh.f32 %v1318_v33  ;;  %v1770_v55 = vunpack.c.l.bf16 %v6623_v11  ;;  %v1504_v41 = vmul.f32 0.5, %v1472_v60 }
 0x13a   : > { %v1618_v51 = vmul.f32 %v1586_v17, %v1554_v45  ;;  %v1619_v37 = vmul.f32 %v1587_v29, %v1555_v39  ;;  %v1505_v42 = vmul.f32 0.5, %v1473_v30  ;;  %v1375_v47 = vpack.c.bf16 %v5511_v52, %v5509_v46  ;;  %v815_v17 = vpop.f32.mrf.mxu3 }
 0x13b   : > { %5518 = vtanh.f32 %v1319_v0  ;;  %v1556_v53 = vunpack.c.l.bf16 %v6631_v31  ;;  %v1557_v54 = vunpack.c.h.bf16 %v6631_v31  ;;  %v1740_v48 = vunpack.c.l.bf16 %v6605_v6 }
 0x13c   : > { %v1772_v44 = vunpack.c.l.bf16 %v1723_v19  ;;  %v1664_v58 = vunpack.c.l.bf16 %v6627_v56  ;;  %v6639_v57 = vpack.c.bf16 %v1427_v32, %v1426_v24  ;;  %v1396_v59 = vunpack.c.l.bf16 %v1375_v47 }
 0x13d   : > { %v1397_v16 = vunpack.c.h.bf16 %v1375_v47  ;;  %v5513_v45 = vpop.eup %5512  ;;  %v1665_v39 = vunpack.c.h.bf16 %v6627_v56  ;;  %v1646_v9 = vpack.c.bf16 %v1619_v37, %v1618_v51  ;;  %v1802_v2 = vmul.f32 %v1770_v55, %v1738_v22 }
 0x13e   : > { %v1804_v8 = vmul.f32 %v1772_v44, %v1740_v48  ;;  %v5515_v60 = vpop.eup %5514  ;;  %v1428_v30 = vadd.f32 1.0, %v1396_v59  ;;  %v1739_v31 = vunpack.c.h.bf16 %v6600_v12  ;;  %v1771_v33 = vunpack.c.h.bf16 %v6623_v11  ;;  %v866_v11 = vpop.f32.mrf.mxu0 }
 0x13f   : > { %v1429_v63 = vadd.f32 1.0, %v1397_v16  ;;  %v5517_v29 = vpop.eup %5516  ;;  %v1295_v0 = vpack.c.bf16 %v5515_v60, %v5513_v45  ;;  %v1741_v56 = vunpack.c.h.bf16 %v6605_v6  ;;  %v1773_v24 = vunpack.c.h.bf16 %v1723_v19 }
 0x140   : > { %v6644_v46 = vpack.c.bf16 %v1804_v8, %v1802_v2  ;;  %5520 = vtanh.f32 %v1664_v58  ;;  %v1474_v22 = vunpack.c.l.bf16 %v6639_v57  ;;  %v4831_v51 = vor.u32 %v5261_v18, %v4830_v7  ;;  %v915_v58 = vpop.f32.mrf.mxu1  ;;  %v5022_v8 = vld [vmem:[#allocation2 + $0x2d8] sm:$0xf]  ;;  %v5309_v7 = vld [vmem:[#allocation2 + $0x2ec] sm:$0xf0] }
 0x141   : > { %v5519_v32 = vpop.eup %5518  ;;  %v1455_v52 = vpack.c.bf16 %v1429_v63, %v1428_v30  ;;  %v1588_v37 = vunpack.c.l.bf16 %v1295_v0  ;;  %v1589_v55 = vunpack.c.h.bf16 %v1295_v0  ;;  %v1805_v12 = vmul.f32 %v1773_v24, %v1741_v56  ;;  %v5024_v56 = vld [vmem:[#allocation2 + $0x2f0] sm:$0xf0]  ;;  %v768_v24 = vpop.f32.mrf.mxu2 }
 0x142   : > { %v1376_v47 = vpack.c.bf16 %v5519_v32, %v5517_v29  ;;  %2448 = vmatmul.bf16.vlgmr.msra.gmra.mxu2 %v6644_v46  ;;  %2546 = vmatmul.bf16.vlgmr.msra.gmra.mxu0 %v6644_v46  ;;  %v1666_v48 = vunpack.c.l.bf16 %v1646_v9  ;;  %v1803_v44 = vmul.f32 %v1771_v33, %v1739_v31  ;;  %v767_v6 = vadd.f32 %v766_v15, %v6525_v38 }
 0x143   : > { %2636 = vmatpush.bf16.msrb.mxu2 %v4831_v51  ;;  %v816_v19 = vadd.f32 %v815_v17, %v6528_v40  ;;  %v1475_v59 = vunpack.c.h.bf16 %v6639_v57  ;;  %v1667_v16 = vunpack.c.h.bf16 %v1646_v9  ;;  %v1620_v45 = vmul.f32 %v1588_v37, %v1556_v53  ;;  %v5258_v57 = vld [vmem:[#allocation2 + $0x15c] sm:$0xf]  ;;  %v4832_v9 = vld [vmem:[#allocation2 + $0x170] sm:$0xf0]  ;;  %v817_v37 = vpop.f32.mrf.mxu3 }
 0x144   : > { %v1621_v2 = vmul.f32 %v1589_v55, %v1557_v54  ;;  %v1398_v18 = vunpack.c.l.bf16 %v1376_v47  ;;  %v1399_v60 = vunpack.c.h.bf16 %v1376_v47  ;;  %v6653_v30 = vpack.c.bf16 %v1805_v12, %v1803_v44 }
 0x145   : > { %v957_v63 = vpack.c.bf16 %v816_v19, %v767_v6  ;;  %v6655_v29 = vpack.c.bf16 %v1505_v42, %v1504_v41  ;;  %5522 = vtanh.f32 %v1665_v39  ;;  %v6657_v31 = vmul.f32 0.5, %v1474_v22  ;;  %v5306_v39 = vld [vmem:[#allocation2 + $0x2dc] sm:$0xf] }
 0x146   : > { %v1476_v15 = vunpack.c.l.bf16 %v1455_v52  ;;  %v5521_v33 = vpop.eup %5520  ;;  %5524 = vtanh.f32 %v1666_v48  ;;  %v1477_v17 = vunpack.c.h.bf16 %v1455_v52  ;;  %2497 = vmatmul.bf16.vlgmr.msra.gmra.mxu3 %v6653_v30  ;;  %2595 = vmatmul.bf16.vlgmr.msra.gmra.mxu1 %v6653_v30  ;;  %v5023_v54 = vor.u32 %v5309_v7, %v5022_v8 }
 0x147   : > { %v1238_v53 = vunpack.c.l.bf16 %v957_v63  ;;  %v6661_v0 = vmul.f32 0.5, %v1475_v59  ;;  %5526 = vtanh.f32 %v1667_v16  ;;  %v6663_v41 = vpack.c.bf16 %v1621_v2, %v1620_v45  ;;  %v869_v45 = vpop.f32.mrf.mxu0 }
 0x148   : > { %v1239_v42 = vunpack.c.h.bf16 %v957_v63  ;;  %v1430_v32 = vadd.f32 1.0, %v1398_v18  ;;  %v1431_v22 = vadd.f32 1.0, %v1399_v60  ;;  %2685 = vmatpush.bf16.msrb.mxu3 %v5023_v54  ;;  %v867_v52 = vadd.f32 %v866_v11, %v6511_v1  ;;  %v918_v18 = vpop.f32.mrf.mxu1 }
 0x149   : > { %v916_v51 = vadd.f32 %v915_v58, %v6517_v21  ;;  %v6667_v55 = vmul.f32 0.5, %v1476_v15  ;;  %v6671_v47 = vpack.c.bf16 %v6547_v62, %v6545_v61  ;;  %5528 = vtanh.f32 %v1238_v53 }
 0x14a   : > { %v4835_v12 = vor.u32 %v5258_v57, %v4832_v9  ;;  %v6673_v48 = vmul.f32 0.5, %v1477_v17  ;;  %v5027_v6 = vor.u32 %v5306_v39, %v5024_v56  ;;  %v769_v19 = vadd.f32 %v768_v24, %v6525_v38 }
 0x14b   : > { %v961_v44 = vpack.c.bf16 %v916_v51, %v867_v52  ;;  %v5523_v59 = vpop.eup %5522  ;;  %v1668_v11 = vunpack.c.l.bf16 %v6663_v41  ;;  %v1669_v58 = vunpack.c.h.bf16 %v6663_v41  ;;  %5530 = vtanh.f32 %v1239_v42 }
 0x14c   : > { %2734 = vmatpush.bf16.msrb.mxu0 %v4835_v12  ;;  %v818_v16 = vadd.f32 %v817_v37, %v6528_v40  ;;  %v6679_v61 = vpop.eup %5524  ;;  %v6681_v62 = vpack.c.bf16 %v1431_v22, %v1430_v32  ;;  %2783 = vmatpush.bf16.msrb.mxu1 %v5027_v6  ;;  %v870_v7 = vadd.f32 %v869_v45, %v6511_v1  ;;  %v1558_v63 = vunpack.c.l.bf16 %v6671_v47  ;;  %v4806_v12 = vld [vmem:[#allocation2 + $0x128] sm:$0xf]  ;;  %v771_v6 = vpop.f32.mrf.mxu2 }
 0x14d   : > { %v1320_v2 = vunpack.c.l.bf16 %v961_v44  ;;  %v1321_v8 = vunpack.c.h.bf16 %v961_v44  ;;  %v6684_v60 = vpop.eup %5526  ;;  %v919_v17 = vadd.f32 %v918_v18, %v6517_v21  ;;  %v1724_v53 = vpack.c.bf16 %v6625_v35, %v6620_v28  ;;  %v5255_v44 = vld [vmem:[#allocation2 + $0x13c] sm:$0xf0]  ;;  %v820_v18 = vpop.f32.mrf.mxu3 }
 0x14e   : > { %v960_v15 = vpack.c.bf16 %v818_v16, %v769_v19  ;;  %v1559_v54 = vunpack.c.h.bf16 %v6671_v47  ;;  %v6693_v57 = vpack.c.bf16 %v6570_v27, %v6559_v50  ;;  %v1725_v9 = vpack.c.bf16 %v5523_v59, %v5521_v33 }
 0x14f   : > { %5532 = vtanh.f32 %v1320_v2  ;;  %v5529_v42 = vpop.eup %5528  ;;  %v964_v24 = vpack.c.bf16 %v919_v17, %v870_v7  ;;  %v1742_v32 = vunpack.c.l.bf16 %v6616_v34  ;;  %v1744_v22 = vunpack.c.l.bf16 %v6655_v29 }
 0x150   : > { %5534 = vtanh.f32 %v1321_v8  ;;  %v1240_v39 = vunpack.c.l.bf16 %v960_v15  ;;  %v1241_v56 = vunpack.c.h.bf16 %v960_v15  ;;  %v1774_v52 = vunpack.c.l.bf16 %v1724_v53  ;;  %v5303_v15 = vld [vmem:[#allocation2 + $0x2bc] sm:$0xf0] }
 0x151   : > { %v1776_v51 = vunpack.c.l.bf16 %v1725_v9  ;;  %v5531_v28 = vpop.eup %5530  ;;  %v1322_v35 = vunpack.c.l.bf16 %v964_v24  ;;  %v1323_v37 = vunpack.c.h.bf16 %v964_v24  ;;  %v1743_v47 = vunpack.c.h.bf16 %v6616_v34  ;;  %v4998_v34 = vld [vmem:[#allocation2 + $0x2a8] sm:$0xf] }
 0x152   : > { %5536 = vtanh.f32 %v1240_v39  ;;  %v1296_v50 = vpack.c.bf16 %v5531_v28, %v5529_v42  ;;  %v1806_v27 = vmul.f32 %v1774_v52, %v1742_v32  ;;  %v1745_v19 = vunpack.c.h.bf16 %v6655_v29 }
 0x153   : > { %5538 = vtanh.f32 %v1241_v56  ;;  %v1808_v33 = vmul.f32 %v1776_v51, %v1744_v22  ;;  %v1775_v59 = vunpack.c.h.bf16 %v1724_v53  ;;  %v1777_v16 = vunpack.c.h.bf16 %v1725_v9 }
 0x154   : > { %5540 = vtanh.f32 %v1322_v35  ;;  %v1590_v2 = vunpack.c.l.bf16 %v1296_v50  ;;  %v1591_v8 = vunpack.c.h.bf16 %v1296_v50  ;;  %v4807_v56 = vor.u32 %v5255_v44, %v4806_v12  ;;  %v871_v35 = vpop.f32.mrf.mxu0  ;;  %v920_v44 = vpop.f32.mrf.mxu1 }
 0x155   : > { %v5533_v45 = vpop.eup %5532  ;;  %5542 = vtanh.f32 %v1323_v37  ;;  %v6699_v7 = vpack.c.bf16 %v1808_v33, %v1806_v27  ;;  %v1807_v42 = vmul.f32 %v1775_v59, %v1743_v47  ;;  %v1809_v39 = vmul.f32 %v1777_v16, %v1745_v19 }
 0x156   : > { %v5535_v17 = vpop.eup %5534  ;;  %v772_v24 = vadd.f32 %v771_v6, %v6525_v38  ;;  %5544 = vtanh.f32 %v1668_v11  ;;  %v1622_v32 = vmul.f32 %v1590_v2, %v1558_v63  ;;  %v1623_v29 = vmul.f32 %v1591_v8, %v1559_v54  ;;  %2637 = vmatpush.bf16.msrb.mxu2 %v4807_v56 }
 0x157   : > { %v1377_v53 = vpack.c.bf16 %v5535_v17, %v5533_v45  ;;  %2453 = vmatmul.bf16.gmra.mxu2 %v6699_v7  ;;  %2551 = vmatmul.bf16.gmra.mxu0 %v6699_v7  ;;  %v1478_v22 = vunpack.c.l.bf16 %v6681_v62  ;;  %v6705_v52 = vpack.c.bf16 %v1809_v39, %v1807_v42  ;;  %v821_v51 = vadd.f32 %v820_v18, %v6528_v40 }
 0x158   : > { %v5537_v9 = vpop.eup %5536  ;;  %v4999_v28 = vor.u32 %v5303_v15, %v4998_v34  ;;  %5546 = vtanh.f32 %v1669_v58  ;;  %v1479_v11 = vunpack.c.h.bf16 %v6681_v62  ;;  %v1560_v27 = vunpack.c.l.bf16 %v6693_v57 }
 0x159   : > { %v5539_v37 = vpop.eup %5538  ;;  %v1400_v63 = vunpack.c.l.bf16 %v1377_v53  ;;  %v1401_v54 = vunpack.c.h.bf16 %v1377_v53  ;;  %v1561_v33 = vunpack.c.h.bf16 %v6693_v57  ;;  %2502 = vmatmul.bf16.gmra.mxu3 %v6705_v52  ;;  %2600 = vmatmul.bf16.gmra.mxu1 %v6705_v52  ;;  %v963_v12 = vpack.c.bf16 %v821_v51, %v772_v24  ;;  %v5252_v24 = vld [vmem:[#allocation2 + $0x12c] sm:$0xf] }
 0x15a   : > { %v5541_v47 = vpop.eup %5540  ;;  %v1297_v50 = vpack.c.bf16 %v5539_v37, %v5537_v9  ;;  %v1648_v19 = vpack.c.bf16 %v1623_v29, %v1622_v32  ;;  %2686 = vmatpush.bf16.msrb.mxu3 %v4999_v28  ;;  %v872_v62 = vadd.f32 %v871_v35, %v6511_v1  ;;  %v1510_v57 = vmul.f32 0.5, %v1478_v22  ;;  %v4808_v32 = vld [vmem:[#allocation2 + $0x140] sm:$0xf0]  ;;  %v5300_v37 = vld [vmem:[#allocation2 + $0x2ac] sm:$0xf] }
 0x15b   : > { %v5543_v6 = vpop.eup %5542  ;;  %v1432_v41 = vadd.f32 1.0, %v1400_v63  ;;  %v1433_v58 = vadd.f32 1.0, %v1401_v54  ;;  %v1242_v2 = vunpack.c.l.bf16 %v963_v12  ;;  %v1511_v18 = vmul.f32 0.5, %v1479_v11  ;;  %v5000_v11 = vld [vmem:[#allocation2 + $0x2c0] sm:$0xf0]  ;;  %v773_v63 = vpop.f32.mrf.mxu2 }
 0x15c   : > { %v1592_v59 = vunpack.c.l.bf16 %v1297_v50  ;;  %v1593_v16 = vunpack.c.h.bf16 %v1297_v50  ;;  %v1378_v45 = vpack.c.bf16 %v5543_v6, %v5541_v47  ;;  %v6716_v8 = vpop.eup %5544  ;;  %v1243_v34 = vunpack.c.h.bf16 %v963_v12  ;;  %v822_v50 = vpop.f32.mrf.mxu3 }
 0x15d   : > { %v921_v15 = vadd.f32 %v920_v44, %v6517_v21  ;;  %v1457_v17 = vpack.c.bf16 %v1433_v58, %v1432_v41  ;;  %v6721_v53 = vpack.c.bf16 %v6661_v0, %v6657_v31  ;;  %v6725_v9 = vpack.c.bf16 %v6673_v48, %v6667_v55  ;;  %v874_v6 = vpop.f32.mrf.mxu0 }
 0x15e   : > { %v1624_v42 = vmul.f32 %v1592_v59, %v1560_v27  ;;  %v1625_v39 = vmul.f32 %v1593_v16, %v1561_v33  ;;  %v1402_v56 = vunpack.c.l.bf16 %v1378_v45  ;;  %v5547_v29 = vpop.eup %5546  ;;  %v1403_v22 = vunpack.c.h.bf16 %v1378_v45 }
 0x15f   : > { %5548 = vtanh.f32 %v1242_v2  ;;  %v1670_v51 = vunpack.c.l.bf16 %v1648_v19  ;;  %v1218_v28 = vpack.c.bf16 %v6457_v20, %v6452_v4  ;;  %v967_v35 = vpack.c.bf16 %v921_v15, %v872_v62  ;;  %v923_v62 = vpop.f32.mrf.mxu1 }
 0x160   : > { %5550 = vtanh.f32 %v1243_v34  ;;  %v6729_v54 = vpack.c.bf16 %v1511_v18, %v1510_v57  ;;  %v1671_v47 = vunpack.c.h.bf16 %v1648_v19  ;;  %v6731_v31 = vpack.c.bf16 %v1625_v39, %v1624_v42 }
 0x161   : > { %v4811_v0 = vor.u32 %v5252_v24, %v4808_v32  ;;  %v1480_v55 = vunpack.c.l.bf16 %v1457_v17  ;;  %v1481_v48 = vunpack.c.h.bf16 %v1457_v17  ;;  %v1434_v27 = vadd.f32 1.0, %v1402_v56 }
 0x162   : > { %v1324_v33 = vunpack.c.l.bf16 %v967_v35  ;;  %v1435_v12 = vadd.f32 1.0, %v1403_v22  ;;  %v1325_v44 = vunpack.c.h.bf16 %v967_v35  ;;  %v5003_v4 = vor.u32 %v5300_v37, %v5000_v11 }
 0x163   : > { %2735 = vmatpush.bf16.msrb.mxu0 %v4811_v0  ;;  %v774_v20 = vadd.f32 %v773_v63, %v6525_v38  ;;  %5552 = vtanh.f32 %v1670_v51  ;;  %v1562_v41 = vunpack.c.l.bf16 %v1218_v28  ;;  %v823_v58 = vadd.f32 %v822_v50, %v6528_v40 }
 0x164   : > { %v875_v19 = vadd.f32 %v874_v6, %v6511_v1  ;;  %5554 = vtanh.f32 %v1671_v47  ;;  %v1672_v16 = vunpack.c.l.bf16 %v6731_v31  ;;  %v1563_v45 = vunpack.c.h.bf16 %v1218_v28  ;;  %2784 = vmatpush.bf16.msrb.mxu1 %v5003_v4 }
 0x165   : > { %v5549_v59 = vpop.eup %5548  ;;  %v924_v2 = vadd.f32 %v923_v62, %v6517_v21  ;;  %v1512_v18 = vmul.f32 0.5, %v1480_v55  ;;  %v1513_v34 = vmul.f32 0.5, %v1481_v48  ;;  %5556 = vtanh.f32 %v1324_v33  ;;  %v825_v62 = vpop.f32.mrf.mxu3 }
 0x166   : > { %v5551_v57 = vpop.eup %5550  ;;  %v966_v15 = vpack.c.bf16 %v823_v58, %v774_v20  ;;  %v1673_v17 = vunpack.c.h.bf16 %v6731_v31  ;;  %v6739_v42 = vpack.c.bf16 %v1435_v12, %v1434_v27  ;;  %5558 = vtanh.f32 %v1325_v44  ;;  %v5249_v27 = vld [vmem:[#allocation2 + $0x10c] sm:$0xf0] }
 0x167   : > { %v1298_v39 = vpack.c.bf16 %v5551_v57, %v5549_v59  ;;  %v970_v32 = vpack.c.bf16 %v924_v2, %v875_v19  ;;  %v1726_v22 = vpack.c.bf16 %v6684_v60, %v6679_v61  ;;  %5560 = vtanh.f32 %v1672_v16  ;;  %v776_v19 = vpop.f32.mrf.mxu2 }
 0x168   : > { %v1244_v56 = vunpack.c.l.bf16 %v966_v15  ;;  %v1245_v24 = vunpack.c.h.bf16 %v966_v15  ;;  %v1727_v35 = vpack.c.bf16 %v5547_v29, %v6716_v8  ;;  %v1746_v47 = vunpack.c.l.bf16 %v6721_v53  ;;  %v4782_v29 = vld [vmem:[#allocation2 + $0xf8] sm:$0xf] }
 0x169   : > { %v1594_v51 = vunpack.c.l.bf16 %v1298_v39  ;;  %v1595_v28 = vunpack.c.h.bf16 %v1298_v39  ;;  %v6744_v37 = vpop.eup %5552  ;;  %v1326_v11 = vunpack.c.l.bf16 %v970_v32  ;;  %v1327_v63 = vunpack.c.h.bf16 %v970_v32 }
 0x16a   : > { %5562 = vtanh.f32 %v1244_v56  ;;  %v6747_v31 = vpop.eup %5554  ;;  %v1748_v55 = vunpack.c.l.bf16 %v6725_v9  ;;  %v1778_v60 = vunpack.c.l.bf16 %v1726_v22  ;;  %v1780_v48 = vunpack.c.l.bf16 %v1727_v35 }
 0x16b   : > { %v1626_v0 = vmul.f32 %v1594_v51, %v1562_v41  ;;  %v1627_v50 = vmul.f32 %v1595_v28, %v1563_v45  ;;  %5564 = vtanh.f32 %v1245_v24  ;;  %v5557_v61 = vpop.eup %5556  ;;  %v1747_v8 = vunpack.c.h.bf16 %v6721_v53 }
 0x16c   : > { %5566 = vtanh.f32 %v1326_v11  ;;  %v5559_v33 = vpop.eup %5558  ;;  %v1749_v44 = vunpack.c.h.bf16 %v6725_v9  ;;  %v1779_v4 = vunpack.c.h.bf16 %v1726_v22  ;;  %v1810_v6 = vmul.f32 %v1778_v60, %v1746_v47  ;;  %v5297_v11 = vld [vmem:[#allocation2 + $0x28c] sm:$0xf0] }
 0x16d   : > { %v6751_v12 = vpack.c.bf16 %v1627_v50, %v1626_v0  ;;  %5568 = vtanh.f32 %v1327_v63  ;;  %v1379_v20 = vpack.c.bf16 %v5559_v33, %v5557_v61  ;;  %v1812_v41 = vmul.f32 %v1780_v48, %v1748_v55  ;;  %v6754_v59 = vpop.eup %5560  ;;  %v925_v63 = vpop.f32.mrf.mxu1 }
 0x16e   : > { %v1781_v58 = vunpack.c.h.bf16 %v1727_v35  ;;  %v6756_v16 = vpack.c.bf16 %v1513_v34, %v1512_v18  ;;  %5570 = vtanh.f32 %v1673_v17  ;;  %v1219_v53 = vpack.c.bf16 %v6471_v5, %v6469_v3  ;;  %v876_v34 = vpop.f32.mrf.mxu0  ;;  %v4974_v35 = vld [vmem:[#allocation2 + $0x278] sm:$0xf] }
 0x16f   : > { %v4783_v45 = vor.u32 %v5249_v27, %v4782_v29  ;;  %v1404_v57 = vunpack.c.l.bf16 %v1379_v20  ;;  %v1405_v15 = vunpack.c.h.bf16 %v1379_v20  ;;  %v6760_v9 = vpack.c.bf16 %v1812_v41, %v1810_v6 }
 0x170   : > { %v5563_v2 = vpop.eup %5562  ;;  %v1813_v39 = vmul.f32 %v1781_v58, %v1749_v44  ;;  %v1482_v24 = vunpack.c.l.bf16 %v6739_v42  ;;  %v1811_v32 = vmul.f32 %v1779_v4, %v1747_v8  ;;  %v777_v22 = vadd.f32 %v776_v19, %v6525_v38  ;;  %v5246_v58 = vld [vmem:[#allocation2 + $0xfc] sm:$0xf]  ;;  %v4784_v19 = vld [vmem:[#allocation2 + $0x110] sm:$0xf0] }
 0x171   : > { %v5565_v56 = vpop.eup %5564  ;;  %2638 = vmatpush.bf16.msrb.mxu2 %v4783_v45  ;;  %v826_v18 = vadd.f32 %v825_v62, %v6528_v40  ;;  %v1674_v3 = vunpack.c.l.bf16 %v6751_v12  ;;  %v1436_v5 = vadd.f32 1.0, %v1404_v57  ;;  %v1437_v51 = vadd.f32 1.0, %v1405_v15  ;;  %2556 = vmatmul.bf16.gmra.mxu0 %v6760_v9  ;;  %v4976_v57 = vld [vmem:[#allocation2 + $0x290] sm:$0xf0] }
 0x172   : > { %v5567_v17 = vpop.eup %5566  ;;  %v1299_v28 = vpack.c.bf16 %v5565_v56, %v5563_v2  ;;  %2458 = vmatmul.bf16.gmra.mxu2 %v6760_v9  ;;  %v1483_v0 = vunpack.c.h.bf16 %v6739_v42  ;;  %v1564_v50 = vunpack.c.l.bf16 %v1219_v53  ;;  %v6769_v55 = vpack.c.bf16 %v1813_v39, %v1811_v32  ;;  %v5294_v2 = vld [vmem:[#allocation2 + $0x27c] sm:$0xf]  ;;  %v778_v32 = vpop.f32.mrf.mxu2 }
 0x173   : > { %v5569_v47 = vpop.eup %5568  ;;  %v969_v61 = vpack.c.bf16 %v826_v18, %v777_v22  ;;  %v1565_v60 = vunpack.c.h.bf16 %v1219_v53  ;;  %v4975_v4 = vor.u32 %v5297_v11, %v4974_v35  ;;  %v877_v20 = vadd.f32 %v876_v34, %v6511_v1 }
 0x174   : > { %v1596_v48 = vunpack.c.l.bf16 %v1299_v28  ;;  %v1597_v8 = vunpack.c.h.bf16 %v1299_v28  ;;  %v1380_v29 = vpack.c.bf16 %v5569_v47, %v5567_v17  ;;  %v6771_v27 = vpop.eup %5570  ;;  %2507 = vmatmul.bf16.gmra.mxu3 %v6769_v55  ;;  %2605 = vmatmul.bf16.gmra.mxu1 %v6769_v55  ;;  %5572 = vtanh.f32 %v1674_v3  ;;  %v827_v3 = vpop.f32.mrf.mxu3 }
 0x175   : > { %v1246_v33 = vunpack.c.l.bf16 %v969_v61  ;;  %v1247_v44 = vunpack.c.h.bf16 %v969_v61  ;;  %v1459_v42 = vpack.c.bf16 %v1437_v51, %v1436_v5  ;;  %2687 = vmatpush.bf16.msrb.mxu3 %v4975_v4  ;;  %v926_v45 = vadd.f32 %v925_v63, %v6517_v21  ;;  %v928_v61 = vpop.f32.mrf.mxu1 }
 0x176   : > { %v1628_v6 = vmul.f32 %v1596_v48, %v1564_v50  ;;  %v1629_v41 = vmul.f32 %v1597_v8, %v1565_v60  ;;  %v1406_v62 = vunpack.c.l.bf16 %v1380_v29  ;;  %v1407_v53 = vunpack.c.h.bf16 %v1380_v29  ;;  %v879_v47 = vpop.f32.mrf.mxu0 }
 0x177   : > { %5574 = vtanh.f32 %v1246_v33  ;;  %v1514_v15 = vmul.f32 0.5, %v1482_v24  ;;  %v1515_v39 = vmul.f32 0.5, %v1483_v0  ;;  %v1675_v56 = vunpack.c.h.bf16 %v6751_v12 }
 0x178   : > { %5576 = vtanh.f32 %v1247_v44  ;;  %v6778_v22 = vpack.c.bf16 %v1629_v41, %v1628_v6  ;;  %v1220_v18 = vpack.c.bf16 %v6492_v14, %v6490_v13  ;;  %v973_v34 = vpack.c.bf16 %v926_v45, %v877_v20 }
 0x179   : > { %v4787_v17 = vor.u32 %v5246_v58, %v4784_v19  ;;  %v1484_v5 = vunpack.c.l.bf16 %v1459_v42  ;;  %v1485_v51 = vunpack.c.h.bf16 %v1459_v42  ;;  %v1438_v28 = vadd.f32 1.0, %v1406_v62 }
 0x17a   : > { %v4979_v35 = vor.u32 %v5294_v2, %v4976_v57  ;;  %v1439_v11 = vadd.f32 1.0, %v1407_v53  ;;  %v1328_v63 = vunpack.c.l.bf16 %v973_v34  ;;  %v1329_v24 = vunpack.c.h.bf16 %v973_v34  ;;  %v6783_v0 = vpop.eup %5572 }
 0x17b   : > { %2736 = vmatpush.bf16.msrb.mxu0 %v4787_v17  ;;  %v779_v12 = vadd.f32 %v778_v32, %v6525_v38  ;;  %v6785_v50 = vpack.c.bf16 %v1515_v39, %v1514_v15  ;;  %5578 = vtanh.f32 %v1675_v56  ;;  %v828_v13 = vadd.f32 %v827_v3, %v6528_v40 }
 0x17c   : > { %2785 = vmatpush.bf16.msrb.mxu1 %v4979_v35  ;;  %v880_v14 = vadd.f32 %v879_v47, %v6511_v1  ;;  %v1676_v48 = vunpack.c.l.bf16 %v6778_v22  ;;  %v1566_v8 = vunpack.c.l.bf16 %v1220_v18  ;;  %v1567_v29 = vunpack.c.h.bf16 %v1220_v18 }
 0x17d   : > { %v5575_v60 = vpop.eup %5574  ;;  %v929_v33 = vadd.f32 %v928_v61, %v6517_v21  ;;  %v1516_v4 = vmul.f32 0.5, %v1484_v5  ;;  %v1517_v20 = vmul.f32 0.5, %v1485_v51  ;;  %5580 = vtanh.f32 %v1328_v63  ;;  %v4758_v51 = vld [vmem:[#allocation2 + $0xc8] sm:$0xf] }
 0x17e   : > { %v5577_v44 = vpop.eup %5576  ;;  %v972_v42 = vpack.c.bf16 %v828_v13, %v779_v12  ;;  %v1677_v6 = vunpack.c.h.bf16 %v6778_v22  ;;  %v6792_v41 = vpack.c.bf16 %v1439_v11, %v1438_v28  ;;  %5582 = vtanh.f32 %v1329_v24  ;;  %v781_v13 = vpop.f32.mrf.mxu2 }
 0x17f   : > { %v1300_v58 = vpack.c.bf16 %v5577_v44, %v5575_v60  ;;  %v976_v53 = vpack.c.bf16 %v929_v33, %v880_v14  ;;  %v1728_v45 = vpack.c.bf16 %v6747_v31, %v6744_v37  ;;  %5584 = vtanh.f32 %v1676_v48  ;;  %v830_v14 = vpop.f32.mrf.mxu3 }
 0x180   : > { %v1248_v19 = vunpack.c.l.bf16 %v972_v42  ;;  %v1249_v62 = vunpack.c.h.bf16 %v972_v42  ;;  %v1729_v15 = vpack.c.bf16 %v6771_v27, %v6754_v59  ;;  %v1750_v22 = vunpack.c.l.bf16 %v6729_v54  ;;  %v5243_v59 = vld [vmem:[#allocation2 + $0xdc] sm:$0xf0] }
 0x181   : > { %v1598_v2 = vunpack.c.l.bf16 %v1300_v58  ;;  %v1599_v57 = vunpack.c.h.bf16 %v1300_v58  ;;  %v6798_v39 = vpop.eup %5578  ;;  %v1330_v56 = vunpack.c.l.bf16 %v976_v53  ;;  %v1331_v32 = vunpack.c.h.bf16 %v976_v53 }
 0x182   : > { %5586 = vtanh.f32 %v1248_v19  ;;  %v1752_v17 = vunpack.c.l.bf16 %v6756_v16  ;;  %v1782_v37 = vunpack.c.l.bf16 %v1728_v45  ;;  %v1784_v31 = vunpack.c.l.bf16 %v1729_v15 }
 0x183   : > { %v1630_v18 = vmul.f32 %v1598_v2, %v1566_v8  ;;  %v1631_v34 = vmul.f32 %v1599_v57, %v1567_v29  ;;  %5588 = vtanh.f32 %v1249_v62  ;;  %v5581_v3 = vpop.eup %5580  ;;  %v1751_v5 = vunpack.c.h.bf16 %v6729_v54  ;;  %v4950_v2 = vld [vmem:[#allocation2 + $0x248] sm:$0xf]  ;;  %v5291_v57 = vld [vmem:[#allocation2 + $0x25c] sm:$0xf0] }
 0x184   : > { %5590 = vtanh.f32 %v1330_v56  ;;  %v5583_v27 = vpop.eup %5582  ;;  %v1753_v35 = vunpack.c.h.bf16 %v6756_v16  ;;  %v1783_v11 = vunpack.c.h.bf16 %v1728_v45  ;;  %v1814_v24 = vmul.f32 %v1782_v37, %v1750_v22 }
 0x185   : > { %v6803_v28 = vpack.c.bf16 %v1631_v34, %v1630_v18  ;;  %5592 = vtanh.f32 %v1331_v32  ;;  %v1381_v63 = vpack.c.bf16 %v5583_v27, %v5581_v3  ;;  %v1816_v12 = vmul.f32 %v1784_v31, %v1752_v17  ;;  %v6806_v61 = vpop.eup %5584 }
 0x186   : > { %v1785_v47 = vunpack.c.h.bf16 %v1729_v15  ;;  %v6808_v60 = vpack.c.bf16 %v1517_v20, %v1516_v4  ;;  %5594 = vtanh.f32 %v1677_v6  ;;  %v1221_v54 = vpack.c.bf16 %v6502_v26, %v6500_v25  ;;  %v881_v20 = vpop.f32.mrf.mxu0  ;;  %v930_v15 = vpop.f32.mrf.mxu1 }
 0x187   : > { %v4759_v48 = vor.u32 %v5243_v59, %v4758_v51  ;;  %v1408_v29 = vunpack.c.l.bf16 %v1381_v63  ;;  %v1409_v33 = vunpack.c.h.bf16 %v1381_v63  ;;  %v6812_v16 = vpack.c.bf16 %v1816_v12, %v1814_v24  ;;  %v5240_v24 = vld [vmem:[#allocation2 + $0xcc] sm:$0xf]  ;;  %v4760_v12 = vld [vmem:[#allocation2 + $0xe0] sm:$0xf0] }
 0x188   : > { %v5587_v8 = vpop.eup %5586  ;;  %v1817_v44 = vmul.f32 %v1785_v47, %v1753_v35  ;;  %v1486_v58 = vunpack.c.l.bf16 %v6792_v41  ;;  %v1815_v19 = vmul.f32 %v1783_v11, %v1751_v5  ;;  %v782_v62 = vadd.f32 %v781_v13, %v6525_v38 }
 0x189   : > { %v5589_v42 = vpop.eup %5588  ;;  %2639 = vmatpush.bf16.msrb.mxu2 %v4759_v48  ;;  %v831_v4 = vadd.f32 %v830_v14, %v6528_v40  ;;  %v1678_v25 = vunpack.c.l.bf16 %v6803_v28  ;;  %v1440_v26 = vadd.f32 1.0, %v1408_v29  ;;  %v1441_v53 = vadd.f32 1.0, %v1409_v33  ;;  %2561 = vmatmul.bf16.gmra.mxu0 %v6812_v16  ;;  %v4952_v48 = vld [vmem:[#allocation2 + $0x260] sm:$0xf0] }
 0x18a   : > { %v5591_v6 = vpop.eup %5590  ;;  %v1301_v45 = vpack.c.bf16 %v5589_v42, %v5587_v8  ;;  %2463 = vmatmul.bf16.gmra.mxu2 %v6812_v16  ;;  %v1487_v32 = vunpack.c.h.bf16 %v6792_v41  ;;  %v1568_v22 = vunpack.c.l.bf16 %v1221_v54  ;;  %v6821_v18 = vpack.c.bf16 %v1817_v44, %v1815_v19  ;;  %v783_v44 = vpop.f32.mrf.mxu2 }
 0x18b   : > { %v5593_v56 = vpop.eup %5592  ;;  %v975_v34 = vpack.c.bf16 %v831_v4, %v782_v62  ;;  %v1569_v17 = vunpack.c.h.bf16 %v1221_v54  ;;  %v4951_v27 = vor.u32 %v5291_v57, %v4950_v2  ;;  %v882_v35 = vadd.f32 %v881_v20, %v6511_v1  ;;  %v5288_v54 = vld [vmem:[#allocation2 + $0x24c] sm:$0xf]  ;;  %v832_v20 = vpop.f32.mrf.mxu3 }
 0x18c   : > { %v1600_v3 = vunpack.c.l.bf16 %v1301_v45  ;;  %v1601_v37 = vunpack.c.h.bf16 %v1301_v45  ;;  %v1382_v31 = vpack.c.bf16 %v5593_v56, %v5591_v6  ;;  %v6823_v5 = vpop.eup %5594  ;;  %2512 = vmatmul.bf16.gmra.mxu3 %v6821_v18  ;;  %2610 = vmatmul.bf16.gmra.mxu1 %v6821_v18  ;;  %5596 = vtanh.f32 %v1678_v25 }
 0x18d   : > { %v1250_v51 = vunpack.c.l.bf16 %v975_v34  ;;  %v1251_v59 = vunpack.c.h.bf16 %v975_v34  ;;  %v1461_v41 = vpack.c.bf16 %v1441_v53, %v1440_v26  ;;  %2688 = vmatpush.bf16.msrb.mxu3 %v4951_v27  ;;  %v931_v14 = vadd.f32 %v930_v15, %v6517_v21 }
 0x18e   : > { %v1632_v11 = vmul.f32 %v1600_v3, %v1568_v22  ;;  %v1633_v63 = vmul.f32 %v1601_v37, %v1569_v17  ;;  %v1410_v47 = vunpack.c.l.bf16 %v1382_v31  ;;  %v1411_v13 = vunpack.c.h.bf16 %v1382_v31  ;;  %v884_v57 = vpop.f32.mrf.mxu0 }
 0x18f   : > { %5598 = vtanh.f32 %v1250_v51  ;;  %v1518_v8 = vmul.f32 0.5, %v1486_v58  ;;  %v1519_v29 = vmul.f32 0.5, %v1487_v32  ;;  %v1679_v33 = vunpack.c.h.bf16 %v6803_v28  ;;  %v933_v32 = vpop.f32.mrf.mxu1 }
 0x190   : > { %5600 = vtanh.f32 %v1251_v59  ;;  %v6830_v42 = vpack.c.bf16 %v1633_v63, %v1632_v11  ;;  %v1222_v19 = vpack.c.bf16 %v6522_v36, %v6519_v23  ;;  %v979_v62 = vpack.c.bf16 %v931_v14, %v882_v35 }
 0x191   : > { %v4763_v4 = vor.u32 %v5240_v24, %v4760_v12  ;;  %v1488_v6 = vunpack.c.l.bf16 %v1461_v41  ;;  %v1489_v25 = vunpack.c.h.bf16 %v1461_v41  ;;  %v1442_v26 = vadd.f32 1.0, %v1410_v47 }
 0x192   : > { %v4955_v53 = vor.u32 %v5288_v54, %v4952_v48  ;;  %v1443_v45 = vadd.f32 1.0, %v1411_v13  ;;  %v1332_v2 = vunpack.c.l.bf16 %v979_v62  ;;  %v1333_v58 = vunpack.c.h.bf16 %v979_v62  ;;  %v6835_v15 = vpop.eup %5596 }
 0x193   : > { %2737 = vmatpush.bf16.msrb.mxu0 %v4763_v4  ;;  %v784_v28 = vadd.f32 %v783_v44, %v6525_v38  ;;  %v6837_v56 = vpack.c.bf16 %v1519_v29, %v1518_v8  ;;  %5602 = vtanh.f32 %v1679_v33  ;;  %v833_v23 = vadd.f32 %v832_v20, %v6528_v40  ;;  %v4734_v20 = vld [vmem:[#allocation2 + $0x98] sm:$0xf] }
 0x194   : > { %2786 = vmatpush.bf16.msrb.mxu1 %v4955_v53  ;;  %v885_v36 = vadd.f32 %v884_v57, %v6511_v1  ;;  %v1680_v34 = vunpack.c.l.bf16 %v6830_v42  ;;  %v1570_v17 = vunpack.c.l.bf16 %v1222_v19  ;;  %v1571_v3 = vunpack.c.h.bf16 %v1222_v19  ;;  %v835_v57 = vpop.f32.mrf.mxu3 }
 0x195   : > { %v5599_v22 = vpop.eup %5598  ;;  %v934_v37 = vadd.f32 %v933_v32, %v6517_v21  ;;  %v1520_v51 = vmul.f32 0.5, %v1488_v6  ;;  %v1521_v59 = vmul.f32 0.5, %v1489_v25  ;;  %5604 = vtanh.f32 %v1332_v2 }
 0x196   : > { %v5601_v31 = vpop.eup %5600  ;;  %v978_v27 = vpack.c.bf16 %v833_v23, %v784_v28  ;;  %v1681_v35 = vunpack.c.h.bf16 %v6830_v42  ;;  %v6844_v41 = vpack.c.bf16 %v1443_v45, %v1442_v26  ;;  %5606 = vtanh.f32 %v1333_v58  ;;  %v786_v28 = vpop.f32.mrf.mxu2 }
 0x197   : > { %v1302_v11 = vpack.c.bf16 %v5601_v31, %v5599_v22  ;;  %v982_v12 = vpack.c.bf16 %v934_v37, %v885_v36  ;;  %v1730_v47 = vpack.c.bf16 %v6798_v39, %v6783_v0  ;;  %5608 = vtanh.f32 %v1680_v34 }
 0x198   : > { %v1252_v63 = vunpack.c.l.bf16 %v978_v27  ;;  %v1253_v24 = vunpack.c.h.bf16 %v978_v27  ;;  %v1731_v54 = vpack.c.bf16 %v6823_v5, %v6806_v61  ;;  %v1754_v33 = vunpack.c.l.bf16 %v6785_v50  ;;  %v5237_v61 = vld [vmem:[#allocation2 + $0xac] sm:$0xf0] }
 0x199   : > { %v1602_v13 = vunpack.c.l.bf16 %v1302_v11  ;;  %v1603_v14 = vunpack.c.h.bf16 %v1302_v11  ;;  %v6850_v48 = vpop.eup %5602  ;;  %v1334_v8 = vunpack.c.l.bf16 %v982_v12  ;;  %v1335_v29 = vunpack.c.h.bf16 %v982_v12  ;;  %v5285_v12 = vld [vmem:[#allocation2 + $0x22c] sm:$0xf0] }
 0x19a   : > { %5610 = vtanh.f32 %v1252_v63  ;;  %v1756_v19 = vunpack.c.l.bf16 %v6808_v60  ;;  %v1786_v0 = vunpack.c.l.bf16 %v1730_v47  ;;  %v1788_v39 = vunpack.c.l.bf16 %v1731_v54 }
 0x19b   : > { %v1634_v44 = vmul.f32 %v1602_v13, %v1570_v17  ;;  %v1635_v42 = vmul.f32 %v1603_v14, %v1571_v3  ;;  %5612 = vtanh.f32 %v1253_v24  ;;  %v5605_v62 = vpop.eup %5604  ;;  %v1755_v4 = vunpack.c.h.bf16 %v6785_v50  ;;  %v4926_v24 = vld [vmem:[#allocation2 + $0x218] sm:$0xf] }
 0x19c   : > { %5614 = vtanh.f32 %v1334_v8  ;;  %v5607_v5 = vpop.eup %5606  ;;  %v1757_v25 = vunpack.c.h.bf16 %v6808_v60  ;;  %v1787_v26 = vunpack.c.h.bf16 %v1730_v47  ;;  %v1818_v45 = vmul.f32 %v1786_v0, %v1754_v33  ;;  %v886_v47 = vpop.f32.mrf.mxu0 }
 0x19d   : > { %v6855_v6 = vpack.c.bf16 %v1635_v42, %v1634_v44  ;;  %5616 = vtanh.f32 %v1335_v29  ;;  %v1383_v53 = vpack.c.bf16 %v5607_v5, %v5605_v62  ;;  %v1820_v2 = vmul.f32 %v1788_v39, %v1756_v19  ;;  %v6858_v23 = vpop.eup %5608  ;;  %v935_v62 = vpop.f32.mrf.mxu1 }
 0x19e   : > { %v1789_v58 = vunpack.c.h.bf16 %v1731_v54  ;;  %v6860_v36 = vpack.c.bf16 %v1521_v59, %v1520_v51  ;;  %5618 = vtanh.f32 %v1681_v35  ;;  %v1223_v50 = vpack.c.bf16 %v6540_v49, %v6538_v43 }
 0x19f   : > { %v4735_v32 = vor.u32 %v5237_v61, %v4734_v20  ;;  %v1412_v34 = vunpack.c.l.bf16 %v1383_v53  ;;  %v1413_v17 = vunpack.c.h.bf16 %v1383_v53  ;;  %v6864_v60 = vpack.c.bf16 %v1820_v2, %v1818_v45  ;;  %v5234_v53 = vld [vmem:[#allocation2 + $0x9c] sm:$0xf] }
 0x1a0   : > { %v5611_v22 = vpop.eup %5610  ;;  %v1821_v3 = vmul.f32 %v1789_v58, %v1757_v25  ;;  %v1490_v31 = vunpack.c.l.bf16 %v6844_v41  ;;  %v1819_v27 = vmul.f32 %v1787_v26, %v1755_v4  ;;  %v787_v11 = vadd.f32 %v786_v28, %v6525_v38  ;;  %v5282_v28 = vld [vmem:[#allocation2 + $0x21c] sm:$0xf] }
 0x1a1   : > { %v5613_v37 = vpop.eup %5612  ;;  %2640 = vmatpush.bf16.msrb.mxu2 %v4735_v32  ;;  %v836_v51 = vadd.f32 %v835_v57, %v6528_v40  ;;  %v1682_v35 = vunpack.c.l.bf16 %v6855_v6  ;;  %v1444_v43 = vadd.f32 1.0, %v1412_v34  ;;  %v1445_v49 = vadd.f32 1.0, %v1413_v17  ;;  %2566 = vmatmul.bf16.gmra.mxu0 %v6864_v60  ;;  %v4928_v57 = vld [vmem:[#allocation2 + $0x230] sm:$0xf0]  ;;  %v7722_v34 = vld [vmem:[#allocation8_spill] sm:$0xff] }
 0x1a2   : > { %v5615_v59 = vpop.eup %5614  ;;  %v1303_v63 = vpack.c.bf16 %v5613_v37, %v5611_v22  ;;  %2468 = vmatmul.bf16.gmra.mxu2 %v6864_v60  ;;  %v1572_v14 = vunpack.c.l.bf16 %v1223_v50  ;;  %v1573_v54 = vunpack.c.h.bf16 %v1223_v50  ;;  %v6872_v8 = vpack.c.bf16 %v1821_v3, %v1819_v27 }
 0x1a3   : > { %v5617_v13 = vpop.eup %5616  ;;  %v981_v29 = vpack.c.bf16 %v836_v51, %v787_v11  ;;  %v1683_v33 = vunpack.c.h.bf16 %v6855_v6  ;;  %v4927_v20 = vor.u32 %v5285_v12, %v4926_v24  ;;  %v887_v61 = vadd.f32 %v886_v47, %v6511_v1  ;;  %v4736_v6 = vld [vmem:[#allocation2 + $0xb0] sm:$0xf0]  ;;  %v788_v1 = vpop.f32.mrf.mxu2 }
 0x1a4   : > { %v1604_v44 = vunpack.c.l.bf16 %v1303_v63  ;;  %v1605_v42 = vunpack.c.h.bf16 %v1303_v63  ;;  %v1384_v19 = vpack.c.bf16 %v5617_v13, %v5615_v59  ;;  %v5619_v0 = vpop.eup %5618  ;;  %2517 = vmatmul.bf16.gmra.mxu3 %v6872_v8  ;;  %2615 = vmatmul.bf16.gmra.mxu1 %v6872_v8  ;;  %5620 = vtanh.f32 %v1682_v35 }
 0x1a5   : > { %v1254_v39 = vunpack.c.l.bf16 %v981_v29  ;;  %v1255_v4 = vunpack.c.h.bf16 %v981_v29  ;;  %v1463_v5 = vpack.c.bf16 %v1445_v49, %v1444_v43  ;;  %v1491_v45 = vunpack.c.h.bf16 %v6844_v41  ;;  %2689 = vmatpush.bf16.msrb.mxu3 %v4927_v20  ;;  %v837_v41 = vpop.f32.mrf.mxu3 }
 0x1a6   : > { %v1636_v25 = vmul.f32 %v1604_v44, %v1572_v14  ;;  %v1637_v26 = vmul.f32 %v1605_v42, %v1573_v54  ;;  %v6879_v2 = vmul.f32 0.5, %v1490_v31  ;;  %v936_v58 = vadd.f32 %v935_v62, %v6517_v21 }
 0x1a7   : > { %5622 = vtanh.f32 %v1254_v39  ;;  %v1414_v32 = vunpack.c.l.bf16 %v1384_v19  ;;  %v1415_v22 = vunpack.c.h.bf16 %v1384_v19  ;;  %v1224_v17 = vpack.c.bf16 %v7722_v34, %v6550_v10 }
 0x1a8   : > { %v1655_v50 = vpack.c.bf16 %v1637_v26, %v1636_v25  ;;  %5624 = vtanh.f32 %v1255_v4  ;;  %v985_v3 = vpack.c.bf16 %v936_v58, %v887_v61  ;;  %v4739_v37 = vor.u32 %v5234_v53, %v4736_v6  ;;  %v4710_v61 = vld [vmem:[#allocation2 + $0x68] sm:$0xf] }
 0x1a9   : > { %5626 = vtanh.f32 %v1683_v33  ;;  %v1492_v31 = vunpack.c.l.bf16 %v1463_v5  ;;  %v4931_v51 = vor.u32 %v5282_v28, %v4928_v57  ;;  %v1493_v59 = vunpack.c.h.bf16 %v1463_v5  ;;  %v5231_v5 = vld [vmem:[#allocation2 + $0x7c] sm:$0xf0]  ;;  %v4902_v53 = vld [vmem:[#allocation2 + $0x1e8] sm:$0xf]  ;;  %v4712_v57 = vld [vmem:[#allocation2 + $0x80] sm:$0xf0] }
 0x1aa   : > { %v1684_v27 = vunpack.c.l.bf16 %v1655_v50  ;;  %v1685_v11 = vunpack.c.h.bf16 %v1655_v50  ;;  %v1336_v21 = vunpack.c.l.bf16 %v985_v3  ;;  %v1337_v35 = vunpack.c.h.bf16 %v985_v3  ;;  %2738 = vmatpush.bf16.msrb.mxu0 %v4739_v37  ;;  %v6885_v49 = vpop.eup %5620  ;;  %v5276_v50 = vld [vmem:[#allocation2 + $0x1ec] sm:$0xf] }
 0x1ab   : > { %v789_v43 = vadd.f32 %v788_v1, %v6525_v38  ;;  %v1446_v63 = vadd.f32 1.0, %v1414_v32  ;;  %v1447_v24 = vadd.f32 1.0, %v1415_v22  ;;  %2787 = vmatpush.bf16.msrb.mxu1 %v4931_v51  ;;  %v838_v10 = vadd.f32 %v837_v41, %v6528_v40  ;;  %v4904_v32 = vld [vmem:[#allocation2 + $0x200] sm:$0xf0] }
 0x1ac   : > { %5628 = vtanh.f32 %v1684_v27  ;;  %v1523_v47 = vmul.f32 0.5, %v1491_v45  ;;  %v1574_v13 = vunpack.c.l.bf16 %v1224_v17  ;;  %v1732_v14 = vpack.c.bf16 %v6850_v48, %v6835_v15 }
 0x1ad   : > { %v5623_v12 = vpop.eup %5622  ;;  %5630 = vtanh.f32 %v1685_v11  ;;  %v1575_v29 = vunpack.c.h.bf16 %v1224_v17  ;;  %v984_v33 = vpack.c.bf16 %v838_v10, %v789_v43  ;;  %v1733_v38 = vpack.c.bf16 %v5619_v0, %v6858_v23  ;;  %v5279_v23 = vld [vmem:[#allocation2 + $0x1fc] sm:$0xf0]  ;;  %v5228_v0 = vld [vmem:[#allocation2 + $0x6c] sm:$0xf] }
 0x1ae   : > { %v5625_v54 = vpop.eup %5624  ;;  %5632 = vtanh.f32 %v1336_v21  ;;  %v1524_v42 = vmul.f32 0.5, %v1492_v31  ;;  %v1525_v19 = vmul.f32 0.5, %v1493_v59  ;;  %v6891_v39 = vpack.c.bf16 %v1447_v24, %v1446_v63  ;;  %v7723_v10 = vld [vmem:[#allocation9_spill] sm:$0xff] }
 0x1af   : > { %v5627_v44 = vpop.eup %5626  ;;  %v1304_v62 = vpack.c.bf16 %v5625_v54, %v5623_v12  ;;  %5634 = vtanh.f32 %v1337_v35  ;;  %v1256_v40 = vunpack.c.l.bf16 %v984_v33  ;;  %v1257_v4 = vunpack.c.h.bf16 %v984_v33  ;;  %v7724_v12 = vld [vmem:[#allocation10_spill] sm:$0xff] }
 0x1b0   : > { %v1758_v20 = vunpack.c.l.bf16 %v6837_v56  ;;  %v1760_v25 = vunpack.c.l.bf16 %v6860_v36  ;;  %v1790_v26 = vunpack.c.l.bf16 %v1732_v14  ;;  %v1792_v45 = vunpack.c.l.bf16 %v1733_v38 }
 0x1b1   : > { %v1606_v15 = vunpack.c.l.bf16 %v1304_v62  ;;  %v1607_v48 = vunpack.c.h.bf16 %v1304_v62  ;;  %5636 = vtanh.f32 %v1256_v40  ;;  %v1759_v58 = vunpack.c.h.bf16 %v6837_v56 }
 0x1b2   : > { %v5629_v6 = vpop.eup %5628  ;;  %v1761_v28 = vunpack.c.h.bf16 %v6860_v36  ;;  %5638 = vtanh.f32 %v1257_v4  ;;  %v1822_v17 = vmul.f32 %v1790_v26, %v1758_v20  ;;  %v1824_v37 = vmul.f32 %v1792_v45, %v1760_v25  ;;  %v4686_v20 = vld [vmem:[#allocation2 + $0x38] sm:$0xf]  ;;  %v5273_v25 = vld [vmem:[#allocation2 + $0x1cc] sm:$0xf0] }
 0x1b3   : > { %v5631_v22 = vpop.eup %5630  ;;  %v1638_v1 = vmul.f32 %v1606_v15, %v1574_v13  ;;  %v1639_v34 = vmul.f32 %v1607_v48, %v1575_v29  ;;  %v1791_v41 = vunpack.c.h.bf16 %v1732_v14  ;;  %v1793_v31 = vunpack.c.h.bf16 %v1733_v38  ;;  %v4878_v48 = vld [vmem:[#allocation2 + $0x1b8] sm:$0xf] }
 0x1b4   : > { %v5633_v3 = vpop.eup %5632  ;;  %v4711_v27 = vor.u32 %v5231_v5, %v4710_v61  ;;  %v4903_v59 = vor.u32 %v5279_v23, %v4902_v53  ;;  %v4715_v21 = vor.u32 %v5228_v0, %v4712_v57  ;;  %v4907_v56 = vor.u32 %v5276_v50, %v4904_v32 }
 0x1b5   : > { %v5635_v11 = vpop.eup %5634  ;;  %v1656_v51 = vpack.c.bf16 %v1639_v34, %v1638_v1  ;;  %v6897_v36 = vpack.c.bf16 %v1824_v37, %v1822_v17  ;;  %v1823_v43 = vmul.f32 %v1791_v41, %v1759_v58  ;;  %v1825_v63 = vmul.f32 %v1793_v31, %v1761_v28  ;;  %v5222_v58 = vld [vmem:[#allocation2 + $0x3c] sm:$0xf]  ;;  %v4688_v28 = vld [vmem:[#allocation2 + $0x50] sm:$0xf0]  ;;  %v4662_v41 = vld [vmem:[#allocation2 + $0x8] sm:$0xf] }
 0x1b6   : > { %v1385_v35 = vpack.c.bf16 %v5635_v11, %v5633_v3  ;;  %2641 = vmatpush.bf16.msrb.mxu2 %v4711_v27  ;;  %v6900_v24 = vpack.c.bf16 %v1523_v47, %v6879_v2  ;;  %v1225_v13 = vpack.c.bf16 %v7724_v12, %v7723_v10  ;;  %2690 = vmatpush.bf16.msrb.mxu3 %v4903_v59  ;;  %v1494_v47 = vunpack.c.l.bf16 %v6891_v39  ;;  %v5270_v1 = vld [vmem:[#allocation2 + $0x1bc] sm:$0xf]  ;;  %v4880_v34 = vld [vmem:[#allocation2 + $0x1d0] sm:$0xf0]  ;;  %v5219_v31 = vld [vmem:[#allocation2 + $0x1c] sm:$0xf0] }
 0x1b7   : > { %2739 = vmatpush.bf16.msrb.mxu0 %v4715_v21  ;;  %v6904_v14 = vpack.c.bf16 %v5631_v22, %v5629_v6  ;;  %v5637_v54 = vpop.eup %5636  ;;  %v6906_v29 = vpack.c.bf16 %v1525_v19, %v1524_v42  ;;  %2473 = vmatmul.bf16.gmra.mxu2 %v6897_v36  ;;  %v6909_v62 = vpack.c.bf16 %v1825_v63, %v1823_v43  ;;  %v1495_v40 = vunpack.c.h.bf16 %v6891_v39  ;;  %v5225_v42 = vld [vmem:[#allocation2 + $0x4c] sm:$0xf0]  ;;  %v4854_v59 = vld [vmem:[#allocation2 + $0x188] sm:$0xf]  ;;  %v5267_v21 = vld [vmem:[#allocation2 + $0x19c] sm:$0xf0] }
 0x1b8   : > { %v1416_v33 = vunpack.c.l.bf16 %v1385_v35  ;;  %v1417_v38 = vunpack.c.h.bf16 %v1385_v35  ;;  %2571 = vmatmul.bf16.gmra.mxu0 %v6897_v36  ;;  %v5639_v2 = vpop.eup %5638  ;;  %2788 = vmatpush.bf16.msrb.mxu1 %v4907_v56  ;;  %v6915_v4 = vpack.c.bf16 %v5627_v44, %v6885_v49  ;;  %v1686_v19 = vunpack.c.l.bf16 %v1656_v51  ;;  %v5216_v56 = vld [vmem:[#allocation2 + $0xc] sm:$0xf]  ;;  %v4664_v12 = vld [vmem:[#allocation2 + $0x20] sm:$0xf0] }
 0x1b9   : > { %v1305_v15 = vpack.c.bf16 %v5639_v2, %v5637_v54  ;;  %2522 = vmatmul.bf16.gmra.mxu3 %v6909_v62  ;;  %2620 = vmatmul.bf16.gmra.mxu1 %v6909_v62  ;;  %v1687_v26 = vunpack.c.h.bf16 %v1656_v51  ;;  %v1576_v53 = vunpack.c.l.bf16 %v1225_v13  ;;  %v1577_v23 = vunpack.c.h.bf16 %v1225_v13  ;;  %v5264_v13 = vld [vmem:[#allocation2 + $0x18c] sm:$0xf]  ;;  %v6930_v2 = vld [vmem:[%s7712_s4] sm:$0x3f] }
 0x1ba   : > { %v1448_v61 = vadd.f32 1.0, %v1416_v33  ;;  %v1449_v5 = vadd.f32 1.0, %v1417_v38  ;;  %v1796_v0 = vunpack.c.l.bf16 %v6904_v14  ;;  %v1762_v44 = vunpack.c.l.bf16 %v6900_v24 }
 0x1bb   : > { %v1608_v6 = vunpack.c.l.bf16 %v1305_v15  ;;  %v1609_v49 = vunpack.c.h.bf16 %v1305_v15  ;;  %v1764_v45 = vunpack.c.l.bf16 %v6906_v29  ;;  %v1794_v50 = vunpack.c.l.bf16 %v6915_v4 }
 0x1bc   : > { %v1465_v57 = vpack.c.bf16 %v1449_v5, %v1448_v61  ;;  %v4687_v32 = vor.u32 %v5225_v42, %v4686_v20  ;;  %v4879_v22 = vor.u32 %v5273_v25, %v4878_v48  ;;  %5640 = vtanh.f32 %v1686_v19 }
 0x1bd   : > { %v1640_v17 = vmul.f32 %v1608_v6, %v1576_v53  ;;  %v1641_v3 = vmul.f32 %v1609_v49, %v1577_v23  ;;  %v1797_v37 = vunpack.c.h.bf16 %v6904_v14  ;;  %5642 = vtanh.f32 %v1687_v26  ;;  %v4856_v14 = vld [vmem:[#allocation2 + $0x1a0] sm:$0xf0] }
 0x1be   : > { %v1828_v27 = vmul.f32 %v1796_v0, %v1764_v45  ;;  %v1763_v11 = vunpack.c.h.bf16 %v6900_v24  ;;  %2642 = vmatpush.bf16.msrb.mxu2 %v4687_v32  ;;  %2691 = vmatpush.bf16.msrb.mxu3 %v4879_v22  ;;  %v4691_v51 = vor.u32 %v5222_v58, %v4688_v28  ;;  %v1765_v43 = vunpack.c.h.bf16 %v6906_v29  ;;  %v5262_v32 = vld [vmem:[#allocation2 + $0x174] sm:$0xf0]  ;;  %v5030_v22 = vld [vmem:[#allocation2 + $0x2e0] sm:$0xf] }
 0x1bf   : > { %v1657_v35 = vpack.c.bf16 %v1641_v3, %v1640_v17  ;;  %v1795_v63 = vunpack.c.h.bf16 %v6915_v4  ;;  %v4883_v10 = vor.u32 %v5270_v1, %v4880_v34  ;;  %v1496_v54 = vunpack.c.l.bf16 %v1465_v57  ;;  %v2547_v20 = vpop.f32.mrf.mxu0 }
 0x1c0   : > { %v1497_v33 = vunpack.c.h.bf16 %v1465_v57  ;;  %v1826_v38 = vmul.f32 %v1794_v50, %v1762_v44  ;;  %2740 = vmatpush.bf16.msrb.mxu0 %v4691_v51  ;;  %v4663_v24 = vor.u32 %v5219_v31, %v4662_v41  ;;  %v1829_v29 = vmul.f32 %v1797_v37, %v1765_v43  ;;  %v5310_v37 = vld [vmem:[#allocation2 + $0x2f4] sm:$0xf0] }
 0x1c1   : > { %v1688_v42 = vunpack.c.l.bf16 %v1657_v35  ;;  %v1689_v19 = vunpack.c.h.bf16 %v1657_v35  ;;  %2789 = vmatpush.bf16.msrb.mxu1 %v4883_v10  ;;  %v4855_v4 = vor.u32 %v5267_v21, %v4854_v59  ;;  %v4667_v61 = vor.u32 %v5216_v56, %v4664_v12  ;;  %v4840_v59 = vld [vmem:[#allocation2 + $0x178] sm:$0xf0]  ;;  %v5307_v21 = vld [vmem:[#allocation2 + $0x2e4] sm:$0xf] }
 0x1c2   : > { %2643 = vmatpush.bf16.msrb.mxu2 %v4663_v24  ;;  %v4859_v5 = vor.u32 %v5264_v13, %v4856_v14  ;;  %v5641_v15 = vpop.eup %5640  ;;  %v6932_v48 = vpack.c.bf16 %v1828_v27, %v1826_v38  ;;  %v1827_v25 = vmul.f32 %v1795_v63, %v1763_v11  ;;  %v6935_v26 = vperm.slane %v6930_v2, 1  ;;  %v5259_v27 = vld [vmem:[#allocation2 + $0x164] sm:$0xf]  ;;  %v5032_v56 = vld [vmem:[#allocation2 + $0x2f8] sm:$0xf0] }
 0x1c3   : > { %5644 = vtanh.f32 %v1688_v42  ;;  %2692 = vmatpush.bf16.msrb.mxu3 %v4855_v4  ;;  %v2596_v53 = vpop.f32.mrf.mxu1  ;;  %v5643_v23 = vpop.eup %5642  ;;  %v1526_v0 = vmul.f32 0.5, %v1494_v47  ;;  %v1527_v6 = vmul.f32 0.5, %v1495_v40  ;;  %v1528_v49 = vmul.f32 0.5, %v1496_v54  ;;  %v4838_v40 = vld [vmem:[#allocation2 + $0x160] sm:$0xf] }
 0x1c4   : > { %5646 = vtanh.f32 %v1689_v19  ;;  %2741 = vmatpush.bf16.msrb.mxu0 %v4667_v61  ;;  %v1529_v44 = vmul.f32 0.5, %v1497_v33  ;;  %v6941_v45 = vpack.c.bf16 %v1829_v29, %v1827_v25  ;;  %v2548_v58 = vadd.f32 %v2547_v20, %v6935_v26 }
 0x1c5   : > { %2790 = vmatpush.bf16.msrb.mxu1 %v4859_v5  ;;  %v1544_v57 = vpack.c.bf16 %v1527_v6, %v1526_v0  ;;  %v1736_v39 = vpack.c.bf16 %v5643_v23, %v5641_v15  ;;  %v2449_v1 = vpop.f32.mrf.mxu2  ;;  %v4839_v3 = vor.u32 %v5262_v32, %v4838_v40  ;;  %v6949_v41 = vperm.slane %v6930_v2, 0  ;;  %v5253_v32 = vld [vmem:[#allocation2 + $0x134] sm:$0xf] }
 0x1c6   : > { %v2597_v28 = vadd.f32 %v2596_v53, %v2548_v58  ;;  %v1545_v47 = vpack.c.bf16 %v1529_v44, %v1528_v49  ;;  %v5031_v51 = vor.u32 %v5310_v37, %v5030_v22  ;;  %v4843_v10 = vor.u32 %v5259_v27, %v4840_v59  ;;  %v4814_v58 = vld [vmem:[#allocation2 + $0x130] sm:$0xf]  ;;  %v4816_v22 = vld [vmem:[#allocation2 + $0x148] sm:$0xf0] }
 0x1c7   : > { %2478 = vmatmul.bf16.gmra.mxu2 %v6932_v48  ;;  %v6951_v31 = vpop.f32.mrf.mxu0  ;;  %v1766_v35 = vunpack.c.l.bf16 %v1544_v57  ;;  %v2450_v43 = vadd.f32 %v2449_v1, %v6949_v41  ;;  %v5035_v12 = vor.u32 %v5307_v21, %v5032_v56  ;;  %v1798_v14 = vunpack.c.l.bf16 %v1736_v39  ;;  %v4790_v56 = vld [vmem:[#allocation2 + $0x100] sm:$0xf] }
 0x1c8   : > { %2576 = vmatmul.bf16.gmra.mxu0 %v6932_v48  ;;  %2832 = vmatpush.bf16.msra.mxu2 %v4839_v3  ;;  %v1768_v13 = vunpack.c.l.bf16 %v1545_v47  ;;  %v1767_v20 = vunpack.c.h.bf16 %v1544_v57  ;;  %v1769_v42 = vunpack.c.h.bf16 %v1545_v47  ;;  %v1799_v19 = vunpack.c.h.bf16 %v1736_v39  ;;  %v5006_v57 = vld [vmem:[#allocation2 + $0x2b0] sm:$0xf]  ;;  %v5304_v39 = vld [vmem:[#allocation2 + $0x2c4] sm:$0xf0]  ;;  %v5008_v3 = vld [vmem:[#allocation2 + $0x2c8] sm:$0xf0] }
 0x1c9   : > { %v5645_v50 = vpop.eup %5644  ;;  %2527 = vmatmul.bf16.gmra.mxu3 %v6941_v45  ;;  %2625 = vmatmul.bf16.gmra.mxu1 %v6941_v45  ;;  %v2498_v34 = vpop.f32.mrf.mxu3  ;;  %v1830_v4 = vmul.f32 %v1798_v14, %v1766_v35  ;;  %v5007_v1 = vor.u32 %v5304_v39, %v5006_v57  ;;  %v5250_v35 = vld [vmem:[#allocation2 + $0x114] sm:$0xf0]  ;;  %v5244_v57 = vld [vmem:[#allocation2 + $0xe4] sm:$0xf0] }
 0x1ca   : > { %v5647_v17 = vpop.eup %5646  ;;  %2881 = vmatpush.bf16.msra.mxu3 %v5031_v51  ;;  %v2499_v38 = vadd.f32 %v2498_v34, %v2450_v43  ;;  %2930 = vmatpush.bf16.msra.mxu0 %v4843_v10  ;;  %v1831_v53 = vmul.f32 %v1799_v19, %v1767_v20  ;;  %v4819_v34 = vor.u32 %v5253_v32, %v4816_v22  ;;  %v4982_v43 = vld [vmem:[#allocation2 + $0x280] sm:$0xf]  ;;  %v4792_v20 = vld [vmem:[#allocation2 + $0x118] sm:$0xf0] }
 0x1cb   : > { %v1737_v11 = vpack.c.bf16 %v5647_v17, %v5645_v50  ;;  %v6954_v63 = vpop.f32.mrf.mxu1  ;;  %2979 = vmatpush.bf16.msra.mxu1 %v5035_v12  ;;  %v5301_v17 = vld [vmem:[#allocation2 + $0x2b4] sm:$0xf]  ;;  %v4791_v12 = vor.u32 %v5250_v35, %v4790_v56  ;;  %v4768_v56 = vld [vmem:[#allocation2 + $0xe8] sm:$0xf0] }
 0x1cc   : > { %v6956_v29 = vpack.c.bf16 %v2597_v28, %v2499_v38  ;;  %v5256_v28 = vld [vmem:[#allocation2 + $0x144] sm:$0xf0]  ;;  %v5011_v27 = vor.u32 %v5301_v17, %v5008_v3  ;;  %v5289_v35 = vld [vmem:[#allocation2 + $0x254] sm:$0xf] }
 0x1cd   : > { %v1800_v54 = vunpack.c.l.bf16 %v1737_v11  ;;  %v1801_v33 = vunpack.c.h.bf16 %v1737_v11  ;;  %v6958_v5 = vpop.f32.mrf.mxu2  ;;  %v4815_v47 = vor.u32 %v5256_v28, %v4814_v58  ;;  %v4766_v28 = vld [vmem:[#allocation2 + $0xd0] sm:$0xf] }
 0x1ce   : > { %2882 = vmatpush.bf16.msra.mxu3 %v5007_v1  ;;  %2931 = vmatpush.bf16.msra.mxu0 %v4819_v34  ;;  %v4767_v39 = vor.u32 %v5244_v57, %v4766_v28 }
 0x1cf   : > { %v1832_v24 = vmul.f32 %v1800_v54, %v1768_v13  ;;  %v1833_v61 = vmul.f32 %v1801_v33, %v1769_v42  ;;  %2833 = vmatpush.bf16.msra.mxu2 %v4815_v47  ;;  %2980 = vmatpush.bf16.msra.mxu1 %v5011_v27  ;;  %v5298_v13 = vld [vmem:[#allocation2 + $0x294] sm:$0xf0] }
 0x1d0   : > { %v4983_v14 = vor.u32 %v5298_v13, %v4982_v43  ;;  %v4960_v13 = vld [vmem:[#allocation2 + $0x268] sm:$0xf0] }
 0x1d1   : > { %v6960_v15 = vpop.f32.mrf.mxu3  ;;  %v6962_v25 = vpack.c.bf16 %v1832_v24, %v1830_v4  ;;  %v6965_v6 = vpack.c.bf16 %v1833_v61, %v1831_v53  ;;  %v5247_v24 = vld [vmem:[#allocation2 + $0x104] sm:$0xf]  ;;  %v4984_v61 = vld [vmem:[#allocation2 + $0x298] sm:$0xf0] }
 0x1d2   : > { %2883 = vmatpush.bf16.msra.mxu3 %v4983_v14  ;;  %v4795_v19 = vor.u32 %v5247_v24, %v4792_v20  ;;  %v5295_v4 = vld [vmem:[#allocation2 + $0x284] sm:$0xf]  ;;  %v4963_v14 = vor.u32 %v5289_v35, %v4960_v13  ;;  %v4742_v20 = vld [vmem:[#allocation2 + $0xa0] sm:$0xf] }
 0x1d3   : > { %2834 = vmatpush.bf16.msra.mxu2 %v4791_v12 }
 0x1d4   : > { %v2552_v23 = vpop.f32.mrf.mxu0  ;;  %2932 = vmatpush.bf16.msra.mxu0 %v4795_v19 }
 0x1d5   : > { %v2553_v0 = vadd.f32 %v2552_v23, %v6935_v26  ;;  %v4987_v23 = vor.u32 %v5295_v4, %v4984_v61  ;;  %v4934_v61 = vld [vmem:[#allocation2 + $0x220] sm:$0xf] }
 0x1d6   : > { %v2601_v49 = vpop.f32.mrf.mxu1 }
 0x1d7   : > { %2483 = vmatmul.bf16.gmra.mxu2 %v6962_v25  ;;  %v2602_v44 = vadd.f32 %v2601_v49, %v2553_v0  ;;  %2981 = vmatpush.bf16.msra.mxu1 %v4987_v23 }
 0x1d8   : > { %2581 = vmatmul.bf16.gmra.mxu0 %v6962_v25  ;;  %2835 = vmatpush.bf16.msra.mxu2 %v4767_v39  ;;  %v5235_v39 = vld [vmem:[#allocation2 + $0xa4] sm:$0xf] }
 0x1d9   : > { %2532 = vmatmul.bf16.gmra.mxu3 %v6965_v6  ;;  %2630 = vmatmul.bf16.gmra.mxu1 %v6965_v6 }
 0x1da   : > { %v2454_v50 = vpop.f32.mrf.mxu2 }
 0x1db   : > { %v2455_v40 = vadd.f32 %v2454_v50, %v6949_v41  ;;  %v4958_v50 = vld [vmem:[#allocation2 + $0x250] sm:$0xf]  ;;  %2982 = vmatpush.bf16.msra.mxu1 %v4963_v14 }
 0x1dc   : > { %v2503_v37 = vpop.f32.mrf.mxu3  ;;  %v6974_v59 = vpop.f32.mrf.mxu0 }
 0x1dd   : > { %v2504_v11 = vadd.f32 %v2503_v37, %v2455_v40  ;;  %v5292_v40 = vld [vmem:[#allocation2 + $0x264] sm:$0xf0] }
 0x1de   : > { %v6978_v21 = vpop.f32.mrf.mxu1  ;;  %v4959_v32 = vor.u32 %v5292_v40, %v4958_v50  ;;  %v4744_v40 = vld [vmem:[#allocation2 + $0xb8] sm:$0xf0] }
 0x1df   : > { %v6972_v51 = vpack.c.bf16 %v2602_v44, %v2504_v11  ;;  %v5241_v11 = vld [vmem:[#allocation2 + $0xd4] sm:$0xf] }
 0x1e0   : > { %2884 = vmatpush.bf16.msra.mxu3 %v4959_v32  ;;  %v4771_v12 = vor.u32 %v5241_v11, %v4768_v56  ;;  %v5283_v32 = vld [vmem:[#allocation2 + $0x224] sm:$0xf] }
 0x1e2   : > { %v6982_v10 = vpop.f32.mrf.mxu2  ;;  %2933 = vmatpush.bf16.msra.mxu0 %v4771_v12 }
 0x1e4   : > { %v6984_v54 = vpop.f32.mrf.mxu3 }
 0x1e7   : > { %2644 = vmatmul.bf16.vlgmr.msrb.gmra.mxu2 %v6644_v46 }
 0x1e8   : > { %2742 = vmatmul.bf16.vlgmr.msrb.gmra.mxu0 %v6644_v46 }
 0x1e9   : > { %2693 = vmatmul.bf16.vlgmr.msrb.gmra.mxu3 %v6653_v30  ;;  %2791 = vmatmul.bf16.vlgmr.msrb.gmra.mxu1 %v6653_v30 }
 0x1ee   : > { %v2557_v33 = vpop.f32.mrf.mxu0 }
 0x1ef   : > { %v2558_v38 = vadd.f32 %v2557_v33, %v6935_v26 }
 0x1f1   : > { %v2606_v42 = vpop.f32.mrf.mxu1 }
 0x1f2   : > { %v2607_v53 = vadd.f32 %v2606_v42, %v2558_v38  ;;  %v5238_v42 = vld [vmem:[#allocation2 + $0xb4] sm:$0xf0] }
 0x1f3   : > { %v4743_v4 = vor.u32 %v5238_v42, %v4742_v20  ;;  %v4910_v20 = vld [vmem:[#allocation2 + $0x1f0] sm:$0xf] }
 0x1f5   : > { %v2459_v0 = vpop.f32.mrf.mxu2  ;;  %2836 = vmatpush.bf16.msra.mxu2 %v4743_v4  ;;  %v5280_v4 = vld [vmem:[#allocation2 + $0x204] sm:$0xf0] }
 0x1f6   : > { %v2460_v49 = vadd.f32 %v2459_v0, %v6949_v41  ;;  %v6994_v22 = vpop.f32.mrf.mxu0 }
 0x1f7   : > { %2649 = vmatmul.bf16.gmra.mxu2 %v6699_v7  ;;  %v2508_v44 = vpop.f32.mrf.mxu3 }
 0x1f8   : > { %2747 = vmatmul.bf16.gmra.mxu0 %v6699_v7  ;;  %v2509_v58 = vadd.f32 %v2508_v44, %v2460_v49 }
 0x1f9   : > { %2698 = vmatmul.bf16.gmra.mxu3 %v6705_v52  ;;  %2796 = vmatmul.bf16.gmra.mxu1 %v6705_v52  ;;  %v6996_v1 = vpop.f32.mrf.mxu1 }
 0x1fa   : > { %v6992_v47 = vpack.c.bf16 %v2607_v53, %v2509_v58  ;;  %v5286_v53 = vld [vmem:[#allocation2 + $0x234] sm:$0xf0] }
 0x1fb   : > { %v4935_v23 = vor.u32 %v5286_v53, %v4934_v61 }
 0x1fd   : > { %v6998_v34 = vpop.f32.mrf.mxu2  ;;  %2885 = vmatpush.bf16.msra.mxu3 %v4935_v23  ;;  %v4911_v23 = vor.u32 %v5280_v4, %v4910_v20  ;;  %v4694_v4 = vld [vmem:[#allocation2 + $0x40] sm:$0xf] }
 0x1ff   : > { %v7000_v17 = vpop.f32.mrf.mxu3 }
 0x201   : > { %2886 = vmatpush.bf16.msra.mxu3 %v4911_v23  ;;  %v4886_v23 = vld [vmem:[#allocation2 + $0x1c0] sm:$0xf] }
 0x206   : > { %v2562_v3 = vpop.f32.mrf.mxu0 }
 0x207   : > { %2654 = vmatmul.bf16.gmra.mxu2 %v6760_v9  ;;  %v2563_v37 = vadd.f32 %v2562_v3, %v6935_v26 }
 0x208   : > { %2752 = vmatmul.bf16.gmra.mxu0 %v6760_v9 }
 0x209   : > { %2703 = vmatmul.bf16.gmra.mxu3 %v6769_v55  ;;  %2801 = vmatmul.bf16.gmra.mxu1 %v6769_v55  ;;  %v2611_v27 = vpop.f32.mrf.mxu1 }
 0x20a   : > { %v2612_v43 = vadd.f32 %v2611_v27, %v2563_v37  ;;  %v4747_v37 = vor.u32 %v5235_v39, %v4744_v40  ;;  %v4936_v27 = vld [vmem:[#allocation2 + $0x238] sm:$0xf0] }
 0x20b   : > { %v4939_v56 = vor.u32 %v5283_v32, %v4936_v27  ;;  %v5229_v27 = vld [vmem:[#allocation2 + $0x74] sm:$0xf] }
 0x20c   : > { %2934 = vmatpush.bf16.msra.mxu0 %v4747_v37 }
 0x20d   : > { %v2464_v33 = vpop.f32.mrf.mxu2  ;;  %2983 = vmatpush.bf16.msra.mxu1 %v4939_v56  ;;  %v4720_v56 = vld [vmem:[#allocation2 + $0x88] sm:$0xf0] }
 0x20e   : > { %v2465_v38 = vadd.f32 %v2464_v33, %v6949_v41  ;;  %v7010_v49 = vpop.f32.mrf.mxu0 }
 0x20f   : > { %v2513_v24 = vpop.f32.mrf.mxu3 }
 0x210   : > { %v2514_v19 = vadd.f32 %v2513_v24, %v2465_v38  ;;  %v4718_v38 = vld [vmem:[#allocation2 + $0x70] sm:$0xf]  ;;  %v5232_v24 = vld [vmem:[#allocation2 + $0x84] sm:$0xf0] }
 0x211   : > { %v7014_v44 = vpop.f32.mrf.mxu1 }
 0x212   : > { %v7008_v0 = vpack.c.bf16 %v2612_v43, %v2514_v19  ;;  %v4719_v19 = vor.u32 %v5232_v24, %v4718_v38 }
 0x214   : > { %2837 = vmatpush.bf16.msra.mxu2 %v4719_v19 }
 0x215   : > { %v7018_v58 = vpop.f32.mrf.mxu2 }
 0x217   : > { %2659 = vmatmul.bf16.gmra.mxu2 %v6812_v16  ;;  %v7020_v28 = vpop.f32.mrf.mxu3 }
 0x218   : > { %2757 = vmatmul.bf16.gmra.mxu0 %v6812_v16 }
 0x219   : > { %2708 = vmatmul.bf16.gmra.mxu3 %v6821_v18  ;;  %2806 = vmatmul.bf16.gmra.mxu1 %v6821_v18 }
 0x21e   : > { %v2567_v57 = vpop.f32.mrf.mxu0 }
 0x21f   : > { %v2568_v50 = vadd.f32 %v2567_v57, %v6935_v26 }
 0x221   : > { %v2616_v3 = vpop.f32.mrf.mxu1 }
 0x222   : > { %v2617_v11 = vadd.f32 %v2616_v3, %v2568_v50 }
 0x225   : > { %v2469_v35 = vpop.f32.mrf.mxu2 }
 0x226   : > { %v2470_v43 = vadd.f32 %v2469_v35, %v6949_v41  ;;  %v2569_v12 = vpop.f32.mrf.mxu0  ;;  %v5277_v35 = vld [vmem:[#allocation2 + $0x1f4] sm:$0xf] }
 0x227   : > { %2664 = vmatmul.bf16.gmra.mxu2 %v6864_v60  ;;  %v2518_v13 = vpop.f32.mrf.mxu3  ;;  %v2570_v14 = vadd.f32 %v2569_v12, %v6935_v26  ;;  %v4912_v12 = vld [vmem:[#allocation2 + $0x208] sm:$0xf0] }
 0x228   : > { %2762 = vmatmul.bf16.gmra.mxu0 %v6864_v60  ;;  %v2519_v33 = vadd.f32 %v2518_v13, %v2470_v43 }
 0x229   : > { %2713 = vmatmul.bf16.gmra.mxu3 %v6872_v8  ;;  %2811 = vmatmul.bf16.gmra.mxu1 %v6872_v8  ;;  %v2618_v42 = vpop.f32.mrf.mxu1 }
 0x22a   : > { %v7029_v61 = vpack.c.bf16 %v2617_v11, %v2519_v33  ;;  %v2619_v53 = vadd.f32 %v2618_v42, %v2570_v14  ;;  %v4723_v11 = vor.u32 %v5229_v27, %v4720_v56  ;;  %v4915_v14 = vor.u32 %v5277_v35, %v4912_v12 }
 0x22c   : > { %2935 = vmatpush.bf16.msra.mxu0 %v4723_v11  ;;  %2984 = vmatpush.bf16.msra.mxu1 %v4915_v14  ;;  %v5223_v14 = vld [vmem:[#allocation2 + $0x44] sm:$0xf] }
 0x22d   : > { %v2471_v57 = vpop.f32.mrf.mxu2 }
 0x22e   : > { %v2472_v50 = vadd.f32 %v2471_v57, %v6949_v41 }
 0x22f   : > { %v2520_v39 = vpop.f32.mrf.mxu3 }
 0x230   : > { %v2521_v40 = vadd.f32 %v2520_v39, %v2472_v50  ;;  %v5274_v39 = vld [vmem:[#allocation2 + $0x1d4] sm:$0xf0] }
 0x232   : > { %v7032_v32 = vpack.c.bf16 %v2619_v53, %v2521_v40  ;;  %v5226_v53 = vld [vmem:[#allocation2 + $0x54] sm:$0xf0] }
 0x233   : > { %v4695_v50 = vor.u32 %v5226_v53, %v4694_v4  ;;  %v4888_v4 = vld [vmem:[#allocation2 + $0x1d8] sm:$0xf0] }
 0x235   : > { %v2572_v3 = vpop.f32.mrf.mxu0  ;;  %2838 = vmatpush.bf16.msra.mxu2 %v4695_v50 }
 0x236   : > { %v2573_v37 = vadd.f32 %v2572_v3, %v6935_v26  ;;  %v2621_v43 = vpop.f32.mrf.mxu1 }
 0x237   : > { %2669 = vmatmul.bf16.gmra.mxu2 %v6897_v36 }
 0x238   : > { %v2622_v13 = vadd.f32 %v2621_v43, %v2573_v37  ;;  %2767 = vmatmul.bf16.gmra.mxu0 %v6897_v36  ;;  %v4887_v37 = vor.u32 %v5274_v39, %v4886_v23 }
 0x239   : > { %2718 = vmatmul.bf16.gmra.mxu3 %v6909_v62  ;;  %2816 = vmatmul.bf16.gmra.mxu1 %v6909_v62 }
 0x23a   : > { %v2474_v33 = vpop.f32.mrf.mxu2  ;;  %2887 = vmatpush.bf16.msra.mxu3 %v4887_v37 }
 0x23b   : > { %v2475_v38 = vadd.f32 %v2474_v33, %v6949_v41  ;;  %v4696_v33 = vld [vmem:[#allocation2 + $0x58] sm:$0xf0] }
 0x23c   : > { %v2523_v24 = vpop.f32.mrf.mxu3 }
 0x23d   : > { %v2574_v20 = vpop.f32.mrf.mxu0  ;;  %v2524_v42 = vadd.f32 %v2523_v24, %v2475_v38  ;;  %v5271_v38 = vld [vmem:[#allocation2 + $0x1c4] sm:$0xf] }
 0x23e   : > { %v2575_v19 = vadd.f32 %v2574_v20, %v6935_v26  ;;  %v2623_v57 = vpop.f32.mrf.mxu1  ;;  %v4699_v20 = vor.u32 %v5223_v14, %v4696_v33  ;;  %v4862_v14 = vld [vmem:[#allocation2 + $0x190] sm:$0xf]  ;;  %v5268_v33 = vld [vmem:[#allocation2 + $0x1a4] sm:$0xf0] }
 0x23f   : > { %v7041_v40 = vpack.c.bf16 %v2622_v13, %v2524_v42 }
 0x240   : > { %v2624_v3 = vadd.f32 %v2623_v57, %v2575_v19  ;;  %v4891_v19 = vor.u32 %v5271_v38, %v4888_v4  ;;  %2936 = vmatpush.bf16.msra.mxu0 %v4699_v20  ;;  %v3077_v38 = vunpack.c.h.bf16 %v6956_v29 }
 0x242   : > { %v2476_v27 = vpop.f32.mrf.mxu2  ;;  %2985 = vmatpush.bf16.msra.mxu1 %v4891_v19 }
 0x243   : > { %v2477_v56 = vadd.f32 %v2476_v27, %v6949_v41 }
 0x244   : > { %v2525_v35 = vpop.f32.mrf.mxu3 }
 0x245   : > { %v2577_v43 = vpop.f32.mrf.mxu0  ;;  %v2526_v11 = vadd.f32 %v2525_v35, %v2477_v56  ;;  %v4670_v35 = vld [vmem:[#allocation2 + $0x10] sm:$0xf] }
 0x246   : > { %v2578_v12 = vadd.f32 %v2577_v43, %v6935_v26  ;;  %v2626_v24 = vpop.f32.mrf.mxu1  ;;  %v5220_v43 = vld [vmem:[#allocation2 + $0x24] sm:$0xf0] }
 0x247   : > { %v7045_v13 = vpack.c.bf16 %v2624_v3, %v2526_v11  ;;  %2674 = vmatmul.bf16.gmra.mxu2 %v6932_v48  ;;  %v3076_v11 = vunpack.c.l.bf16 %v6956_v29 }
 0x248   : > { %v2627_v42 = vadd.f32 %v2626_v24, %v2578_v12  ;;  %2772 = vmatmul.bf16.gmra.mxu0 %v6932_v48  ;;  %v4671_v12 = vor.u32 %v5220_v43, %v4670_v35  ;;  %v4863_v24 = vor.u32 %v5268_v33, %v4862_v14 }
 0x249   : > { %2723 = vmatmul.bf16.gmra.mxu3 %v6941_v45  ;;  %2821 = vmatmul.bf16.gmra.mxu1 %v6941_v45  ;;  %5648 = vtanh.f32 %v3076_v11 }
 0x24a   : > { %v2479_v53 = vpop.f32.mrf.mxu2  ;;  %2839 = vmatpush.bf16.msra.mxu2 %v4671_v12  ;;  %2888 = vmatpush.bf16.msra.mxu3 %v4863_v24  ;;  %5650 = vtanh.f32 %v3077_v38 }
 0x24b   : > { %v2480_v23 = vadd.f32 %v2479_v53, %v6949_v41 }
 0x24c   : > { %v2528_v57 = vpop.f32.mrf.mxu3 }
 0x24d   : > { %v2579_v50 = vpop.f32.mrf.mxu0  ;;  %v2529_v39 = vadd.f32 %v2528_v57, %v2480_v23 }
 0x24e   : > { %v2580_v3 = vadd.f32 %v2579_v50, %v6935_v26  ;;  %v2628_v37 = vpop.f32.mrf.mxu1  ;;  %v5217_v50 = vld [vmem:[#allocation2 + $0x14] sm:$0xf] }
 0x24f   : > { %v7053_v27 = vpack.c.bf16 %v2627_v42, %v2529_v39  ;;  %v4672_v39 = vld [vmem:[#allocation2 + $0x28] sm:$0xf0]  ;;  %v5649_v12 = vpop.eup %5648 }
 0x250   : > { %v2629_v56 = vadd.f32 %v2628_v37, %v2580_v3  ;;  %v5265_v3 = vld [vmem:[#allocation2 + $0x194] sm:$0xf]  ;;  %v4675_v29 = vor.u32 %v5217_v50, %v4672_v39  ;;  %v4864_v37 = vld [vmem:[#allocation2 + $0x1a8] sm:$0xf0]  ;;  %v5651_v33 = vpop.eup %5650 }
 0x251   : > { %v4867_v11 = vor.u32 %v5265_v3, %v4864_v37 }
 0x252   : > { %v2481_v20 = vpop.f32.mrf.mxu2  ;;  %2937 = vmatpush.bf16.msra.mxu0 %v4675_v29  ;;  %v3080_v29 = vunpack.c.l.bf16 %v6972_v51 }
 0x253   : > { %v2482_v4 = vadd.f32 %v2481_v20, %v6949_v41  ;;  %2986 = vmatpush.bf16.msra.mxu1 %v4867_v11  ;;  %v7076_v11 = vperm.slane %v6930_v2, 3 }
 0x254   : > { %v2530_v19 = vpop.f32.mrf.mxu3  ;;  %5652 = vtanh.f32 %v3080_v29 }
 0x255   : > { %v2582_v42 = vpop.f32.mrf.mxu0  ;;  %v2531_v53 = vadd.f32 %v2530_v19, %v2482_v4  ;;  %v2452_v4 = vadd.f32 %v6958_v5, %v6949_v41 }
 0x256   : > { %v2583_v23 = vadd.f32 %v2582_v42, %v6935_v26  ;;  %v2631_v57 = vpop.f32.mrf.mxu1 }
 0x257   : > { %2679 = vmatmul.bf16.gmra.mxu2 %v6962_v25  ;;  %v7061_v35 = vpack.c.bf16 %v2629_v56, %v2531_v53  ;;  %v3140_v56 = vpack.c.bf16 %v5651_v33, %v5649_v12  ;;  %v2501_v39 = vadd.f32 %v6960_v15, %v2452_v4 }
 0x258   : > { %2777 = vmatmul.bf16.gmra.mxu0 %v6962_v25  ;;  %v2632_v43 = vadd.f32 %v2631_v57, %v2583_v23  ;;  %v2550_v23 = vadd.f32 %v6951_v31, %v6935_v26 }
 0x259   : > { %2728 = vmatmul.bf16.gmra.mxu3 %v6965_v6  ;;  %2826 = vmatmul.bf16.gmra.mxu1 %v6965_v6  ;;  %v3156_v3 = vunpack.c.l.bf16 %v3140_v56  ;;  %v3157_v5 = vunpack.c.h.bf16 %v3140_v56  ;;  %v2457_v56 = vadd.f32 %v6982_v10, %v6949_v41 }
 0x25a   : > { %v2484_v14 = vpop.f32.mrf.mxu2  ;;  %v2599_v12 = vadd.f32 %v6954_v63, %v2550_v23  ;;  %v7087_v63 = vperm.slane %v6930_v2, 2  ;;  %v2555_v23 = vadd.f32 %v6974_v59, %v6935_v26  ;;  %v5653_v2 = vpop.eup %5652  ;;  %v3084_v59 = vunpack.c.l.bf16 %v6992_v47 }
 0x25b   : > { %v2485_v38 = vadd.f32 %v2484_v14, %v6949_v41  ;;  %v3081_v14 = vunpack.c.h.bf16 %v6972_v51  ;;  %v2506_v29 = vadd.f32 %v6984_v54, %v2457_v56 }
 0x25c   : > { %v2533_v24 = vpop.f32.mrf.mxu3 }
 0x25d   : > { %v2584_v20 = vpop.f32.mrf.mxu0  ;;  %v2534_v19 = vadd.f32 %v2533_v24, %v2485_v38  ;;  %v3031_v38 = vpack.c.bf16 %v2599_v12, %v2501_v39  ;;  %v3188_v24 = vadd.f32 1.0, %v3156_v3  ;;  %5654 = vtanh.f32 %v3081_v14 }
 0x25e   : > { %v2585_v42 = vadd.f32 %v2584_v20, %v6935_v26  ;;  %v2633_v53 = vpop.f32.mrf.mxu1  ;;  %v2604_v12 = vadd.f32 %v6978_v21, %v2555_v23 }
 0x25f   : > { %v7071_v57 = vpack.c.bf16 %v2632_v43, %v2534_v19  ;;  %v3189_v19 = vadd.f32 1.0, %v3157_v5  ;;  %v3079_v39 = vunpack.c.h.bf16 %v3031_v38 }
 0x260   : > { %v2634_v50 = vadd.f32 %v2633_v53, %v2585_v42  ;;  %v3078_v53 = vunpack.c.l.bf16 %v3031_v38 }
 0x261   : > { %v3220_v3 = vpack.c.bf16 %v3189_v19, %v3188_v24 }
 0x262   : > { %v2486_v37 = vpop.f32.mrf.mxu2  ;;  %5656 = vtanh.f32 %v3078_v53 }
 0x263   : > { %v2487_v33 = vadd.f32 %v2486_v37, %v6949_v41  ;;  %v5655_v5 = vpop.eup %5654  ;;  %5658 = vtanh.f32 %v3079_v39  ;;  %v3237_v54 = vunpack.c.h.bf16 %v3220_v3 }
 0x264   : > { %v2535_v31 = vpop.f32.mrf.mxu3  ;;  %v3142_v24 = vpack.c.bf16 %v5655_v5, %v5653_v2  ;;  %5660 = vtanh.f32 %v3084_v59 }
 0x265   : > { %v2743_v43 = vpop.f32.mrf.mxu0  ;;  %v2536_v15 = vadd.f32 %v2535_v31, %v2487_v33  ;;  %v3236_v31 = vunpack.c.l.bf16 %v3220_v3 }
 0x266   : > { %v2744_v20 = vadd.f32 %v2743_v43, %v7076_v11  ;;  %v2792_v4 = vpop.f32.mrf.mxu1  ;;  %v3037_v43 = vpack.c.bf16 %v2604_v12, %v2506_v29  ;;  %v3161_v29 = vunpack.c.h.bf16 %v3142_v24 }
 0x267   : > { %2840 = vmatmul.bf16.vlgmr.msra.gmra.mxu2 %v6644_v46  ;;  %v7089_v51 = vpack.c.bf16 %v2634_v50, %v2536_v15  ;;  %v3268_v53 = vmul.f32 0.5, %v3236_v31 }
 0x268   : > { %2938 = vmatmul.bf16.vlgmr.msra.gmra.mxu0 %v6644_v46  ;;  %v2793_v42 = vadd.f32 %v2792_v4, %v2744_v20  ;;  %v3085_v20 = vunpack.c.h.bf16 %v6992_v47  ;;  %v5657_v21 = vpop.eup %5656  ;;  %v3082_v23 = vunpack.c.l.bf16 %v3037_v43  ;;  %v3083_v2 = vunpack.c.h.bf16 %v3037_v43 }
 0x269   : > { %2889 = vmatmul.bf16.vlgmr.msra.gmra.mxu3 %v6653_v30  ;;  %2987 = vmatmul.bf16.vlgmr.msra.gmra.mxu1 %v6653_v30  ;;  %v3193_v31 = vadd.f32 1.0, %v3161_v29  ;;  %v2462_v43 = vadd.f32 %v6998_v34, %v6949_v41 }
 0x26a   : > { %v2645_v10 = vpop.f32.mrf.mxu2 }
 0x26b   : > { %v2646_v46 = vadd.f32 %v2645_v10, %v7087_v63  ;;  %v5659_v10 = vpop.eup %5658  ;;  %v2511_v34 = vadd.f32 %v7000_v17, %v2462_v43 }
 0x26c   : > { %v2694_v37 = vpop.f32.mrf.mxu3  ;;  %v3141_v12 = vpack.c.bf16 %v5659_v10, %v5657_v21 }
 0x26d   : > { %v2745_v50 = vpop.f32.mrf.mxu0  ;;  %v2695_v14 = vadd.f32 %v2694_v37, %v2646_v46  ;;  %v3269_v46 = vmul.f32 0.5, %v3237_v54  ;;  %v3160_v37 = vunpack.c.l.bf16 %v3142_v24 }
 0x26e   : > { %v2746_v30 = vadd.f32 %v2745_v50, %v7076_v11  ;;  %v2794_v33 = vpop.f32.mrf.mxu1 }
 0x26f   : > { %v3029_v38 = vpack.c.bf16 %v2793_v42, %v2695_v14 }
 0x270   : > { %v2795_v15 = vadd.f32 %v2794_v33, %v2746_v30  ;;  %v5661_v30 = vpop.eup %5660  ;;  %v3192_v33 = vadd.f32 1.0, %v3160_v37 }
 0x271   : > { %v3316_v4 = vunpack.c.l.bf16 %v3029_v38  ;;  %v3317_v19 = vunpack.c.h.bf16 %v3029_v38  ;;  %v3300_v38 = vpack.c.bf16 %v3269_v46, %v3268_v53 }
 0x272   : > { %v2647_v56 = vpop.f32.mrf.mxu2 }
 0x273   : > { %5662 = vtanh.f32 %v3316_v4  ;;  %v2648_v39 = vadd.f32 %v2647_v56, %v7087_v63  ;;  %v3636_v53 = vunpack.c.l.bf16 %v3300_v38 }
 0x274   : > { %5664 = vtanh.f32 %v3317_v19  ;;  %v2696_v42 = vpop.f32.mrf.mxu3  ;;  %v3159_v19 = vunpack.c.h.bf16 %v3141_v12 }
 0x275   : > { %v2748_v3 = vpop.f32.mrf.mxu0  ;;  %5666 = vtanh.f32 %v3085_v20  ;;  %v2697_v47 = vadd.f32 %v2696_v42, %v2648_v39  ;;  %v3637_v39 = vunpack.c.h.bf16 %v3300_v38 }
 0x276   : > { %v2749_v50 = vadd.f32 %v2748_v3, %v7076_v11  ;;  %v2797_v5 = vpop.f32.mrf.mxu1  ;;  %5668 = vtanh.f32 %v3082_v23  ;;  %v3222_v23 = vpack.c.bf16 %v3193_v31, %v3192_v33 }
 0x277   : > { %v7103_v14 = vpack.c.bf16 %v2795_v15, %v2697_v47  ;;  %2845 = vmatmul.bf16.gmra.mxu2 %v6699_v7  ;;  %5670 = vtanh.f32 %v3083_v2  ;;  %v2560_v15 = vadd.f32 %v6994_v22, %v6935_v26  ;;  %v3088_v47 = vunpack.c.l.bf16 %v7008_v0 }
 0x278   : > { %v2798_v59 = vadd.f32 %v2797_v5, %v2749_v50  ;;  %2943 = vmatmul.bf16.gmra.mxu0 %v6699_v7  ;;  %v3158_v7 = vunpack.c.l.bf16 %v3141_v12  ;;  %v2467_v50 = vadd.f32 %v7018_v58, %v6949_v41  ;;  %v3240_v38 = vunpack.c.l.bf16 %v3222_v23 }
 0x279   : > { %v5663_v54 = vpop.eup %5662  ;;  %2894 = vmatmul.bf16.gmra.mxu3 %v6705_v52  ;;  %2992 = vmatmul.bf16.gmra.mxu1 %v6705_v52  ;;  %v2609_v2 = vadd.f32 %v6996_v1, %v2560_v15  ;;  %v3191_v41 = vadd.f32 1.0, %v3159_v19  ;;  %5672 = vtanh.f32 %v3088_v47 }
 0x27a   : > { %v5665_v24 = vpop.eup %5664  ;;  %v2650_v20 = vpop.f32.mrf.mxu2 }
 0x27b   : > { %v5667_v4 = vpop.eup %5666  ;;  %v3380_v56 = vpack.c.bf16 %v5665_v24, %v5663_v54  ;;  %v2651_v21 = vadd.f32 %v2650_v20, %v7087_v63  ;;  %v3241_v54 = vunpack.c.h.bf16 %v3222_v23  ;;  %v3043_v24 = vpack.c.bf16 %v2609_v2, %v2511_v34 }
 0x27c   : > { %v2699_v10 = vpop.f32.mrf.mxu3  ;;  %v5669_v37 = vpop.eup %5668  ;;  %v3144_v3 = vpack.c.bf16 %v5667_v4, %v5661_v30  ;;  %v2565_v20 = vadd.f32 %v7010_v49, %v6935_v26  ;;  %v3089_v30 = vunpack.c.h.bf16 %v7008_v0  ;;  %v3272_v23 = vmul.f32 0.5, %v3240_v38 }
 0x27d   : > { %v2750_v46 = vpop.f32.mrf.mxu0  ;;  %v3668_v52 = vunpack.c.l.bf16 %v3380_v56  ;;  %v3669_v29 = vunpack.c.h.bf16 %v3380_v56  ;;  %v2700_v42 = vadd.f32 %v2699_v10, %v2651_v21  ;;  %v5671_v17 = vpop.eup %5670  ;;  %v3190_v56 = vadd.f32 1.0, %v3158_v7 }
 0x27e   : > { %v2751_v22 = vadd.f32 %v2750_v46, %v7076_v11  ;;  %v2799_v5 = vpop.f32.mrf.mxu1  ;;  %v3143_v58 = vpack.c.bf16 %v5671_v17, %v5669_v37  ;;  %v3273_v34 = vmul.f32 0.5, %v3241_v54  ;;  %v3086_v10 = vunpack.c.l.bf16 %v3043_v24  ;;  %v5094_v17 = vld [vmem:[#allocation4 + $0x70] sm:$0xf] }
 0x27f   : > { %v3700_v12 = vmul.f32 %v3668_v52, %v3636_v53  ;;  %v3701_v33 = vmul.f32 %v3669_v29, %v3637_v39  ;;  %v3035_v31 = vpack.c.bf16 %v2798_v59, %v2700_v42  ;;  %v3164_v53 = vunpack.c.l.bf16 %v3144_v3  ;;  %v5673_v2 = vpop.eup %5672 }
 0x280   : > { %v2800_v43 = vadd.f32 %v2799_v5, %v2751_v22  ;;  %v3165_v59 = vunpack.c.h.bf16 %v3144_v3  ;;  %v2516_v39 = vadd.f32 %v7020_v28, %v2467_v50  ;;  %v2614_v7 = vadd.f32 %v7014_v44, %v2565_v20  ;;  %v5342_v20 = vld [vmem:[#allocation4 + $0xf4] sm:$0xf0] }
 0x281   : > { %v7123_v1 = vpack.c.bf16 %v3701_v33, %v3700_v12  ;;  %v3320_v15 = vunpack.c.l.bf16 %v3035_v31  ;;  %v3321_v4 = vunpack.c.h.bf16 %v3035_v31  ;;  %v3162_v46 = vunpack.c.l.bf16 %v3143_v58  ;;  %v5326_v12 = vld [vmem:[#allocation4 + $0x74] sm:$0xf0]  ;;  %v5158_v33 = vld [vmem:[#allocation4 + $0xf0] sm:$0xf] }
 0x282   : > { %v2652_v21 = vpop.f32.mrf.mxu2  ;;  %v3087_v37 = vunpack.c.h.bf16 %v3043_v24  ;;  %v3196_v42 = vadd.f32 1.0, %v3164_v53  ;;  %v3197_v28 = vadd.f32 1.0, %v3165_v59  ;;  %v3049_v22 = vpack.c.bf16 %v2614_v7, %v2516_v39 }
 0x283   : > { %5674 = vtanh.f32 %v3320_v15  ;;  %v2653_v26 = vadd.f32 %v2652_v21, %v7087_v63  ;;  %v3302_v47 = vpack.c.bf16 %v3273_v34, %v3272_v23  ;;  %v7133_v44 = vpack.c.bf16 %v3191_v41, %v3190_v56 }
 0x284   : > { %5676 = vtanh.f32 %v3321_v4  ;;  %v2701_v0 = vpop.f32.mrf.mxu3  ;;  %v3163_v38 = vunpack.c.h.bf16 %v3143_v58  ;;  %v3194_v54 = vadd.f32 1.0, %v3162_v46  ;;  %v5095_v24 = vor.u32 %v5326_v12, %v5094_v17  ;;  %v5096_v12 = vld [vmem:[#allocation4 + $0x78] sm:$0xf0] }
 0x285   : > { %v2753_v49 = vpop.f32.mrf.mxu0  ;;  %5678 = vtanh.f32 %v3089_v30  ;;  %v2702_v52 = vadd.f32 %v2701_v0, %v2653_v26  ;;  %v3224_v30 = vpack.c.bf16 %v3197_v28, %v3196_v42  ;;  %v3090_v15 = vunpack.c.l.bf16 %v3049_v22 }
 0x286   : > { %v2754_v19 = vadd.f32 %v2753_v49, %v7076_v11  ;;  %v2802_v29 = vpop.f32.mrf.mxu1  ;;  %5680 = vtanh.f32 %v3086_v10  ;;  %v3091_v41 = vunpack.c.h.bf16 %v3049_v22  ;;  %v3092_v21 = vunpack.c.l.bf16 %v7029_v61  ;;  %4138 = vmatpush.bf16.msrb.mxu2 %v5095_v24 }
 0x287   : > { %2850 = vmatmul.bf16.gmra.mxu2 %v6760_v9  ;;  %v7131_v50 = vpack.c.bf16 %v2800_v43, %v2702_v52  ;;  %5682 = vtanh.f32 %v3087_v37  ;;  %v5159_v39 = vor.u32 %v5342_v20, %v5158_v33  ;;  %v3641_v58 = vunpack.c.h.bf16 %v3302_v47  ;;  %v5341_v33 = vld [vmem:[#allocation4 + $0xf4] sm:$0xf]  ;;  %v5160_v20 = vld [vmem:[#allocation4 + $0xf8] sm:$0xf0] }
 0x288   : > { %v2803_v3 = vadd.f32 %v2802_v29, %v2754_v19  ;;  %2948 = vmatmul.bf16.gmra.mxu0 %v6760_v9  ;;  %v3195_v0 = vadd.f32 1.0, %v3163_v38  ;;  %v3093_v10 = vunpack.c.h.bf16 %v7029_v61  ;;  %5684 = vtanh.f32 %v3090_v15  ;;  %v5325_v61 = vld [vmem:[#allocation4 + $0x74] sm:$0xf] }
 0x289   : > { %v5675_v5 = vpop.eup %5674  ;;  %2899 = vmatmul.bf16.gmra.mxu3 %v6769_v55  ;;  %2997 = vmatmul.bf16.gmra.mxu1 %v6769_v55  ;;  %v3640_v55 = vunpack.c.l.bf16 %v3302_v47  ;;  %v3244_v28 = vunpack.c.l.bf16 %v3224_v30  ;;  %v3245_v22 = vunpack.c.h.bf16 %v3224_v30  ;;  %5686 = vtanh.f32 %v3091_v41 }
 0x28a   : > { %v5677_v31 = vpop.eup %5676  ;;  %v2655_v9 = vpop.f32.mrf.mxu2  ;;  %4187 = vmatpush.bf16.msrb.mxu3 %v5159_v39  ;;  %5688 = vtanh.f32 %v3092_v21  ;;  %v5099_v24 = vor.u32 %v5325_v61, %v5096_v12  ;;  %v5163_v30 = vor.u32 %v5341_v33, %v5160_v20  ;;  %v7145_v15 = vpack.c.bf16 %v3195_v0, %v3194_v54 }
 0x28b   : > { %v5679_v43 = vpop.eup %5678  ;;  %v3382_v4 = vpack.c.bf16 %v5677_v31, %v5675_v5  ;;  %v2656_v56 = vadd.f32 %v2655_v9, %v7087_v63  ;;  %5690 = vtanh.f32 %v3093_v10  ;;  %v3095_v54 = vunpack.c.h.bf16 %v7032_v32 }
 0x28c   : > { %v2704_v53 = vpop.f32.mrf.mxu3  ;;  %v3146_v49 = vpack.c.bf16 %v5679_v43, %v5673_v2  ;;  %v5681_v46 = vpop.eup %5680  ;;  %4236 = vmatpush.bf16.msrb.mxu0 %v5099_v24  ;;  %4285 = vmatpush.bf16.msrb.mxu1 %v5163_v30  ;;  %v3096_v10 = vunpack.c.l.bf16 %v7041_v40 }
 0x28d   : > { %v2755_v59 = vpop.f32.mrf.mxu0  ;;  %v3672_v23 = vunpack.c.l.bf16 %v3382_v4  ;;  %v3673_v34 = vunpack.c.h.bf16 %v3382_v4  ;;  %v2705_v26 = vadd.f32 %v2704_v53, %v2656_v56  ;;  %v5683_v42 = vpop.eup %5682  ;;  %v3276_v4 = vmul.f32 0.5, %v3244_v28 }
 0x28e   : > { %v2756_v7 = vadd.f32 %v2755_v59, %v7076_v11  ;;  %v2804_v19 = vpop.f32.mrf.mxu1  ;;  %v3168_v31 = vunpack.c.l.bf16 %v3146_v49  ;;  %v3169_v38 = vunpack.c.h.bf16 %v3146_v49  ;;  %v3277_v56 = vmul.f32 0.5, %v3245_v22 }
 0x28f   : > { %v3704_v37 = vmul.f32 %v3672_v23, %v3640_v55  ;;  %v3705_v52 = vmul.f32 %v3673_v34, %v3641_v58  ;;  %v3041_v29 = vpack.c.bf16 %v2803_v3, %v2705_v26  ;;  %v3238_v3 = vunpack.c.l.bf16 %v7133_v44  ;;  %v5685_v55 = vpop.eup %5684 }
 0x290   : > { %v2805_v47 = vadd.f32 %v2804_v19, %v2756_v7  ;;  %v3145_v53 = vpack.c.bf16 %v5683_v42, %v5681_v46  ;;  %v3094_v59 = vunpack.c.l.bf16 %v7032_v32  ;;  %v5687_v23 = vpop.eup %5686  ;;  %v3200_v34 = vadd.f32 1.0, %v3168_v31 }
 0x291   : > { %v7141_v5 = vpack.c.bf16 %v3705_v52, %v3704_v37  ;;  %v3324_v2 = vunpack.c.l.bf16 %v3041_v29  ;;  %v3325_v17 = vunpack.c.h.bf16 %v3041_v29  ;;  %v3201_v26 = vadd.f32 1.0, %v3169_v38  ;;  %v5689_v49 = vpop.eup %5688  ;;  %v5340_v38 = vld [vmem:[#allocation4 + $0xe4] sm:$0xf0] }
 0x292   : > { %v2657_v9 = vpop.f32.mrf.mxu2  ;;  %v5691_v46 = vpop.eup %5690  ;;  %v3239_v37 = vunpack.c.h.bf16 %v7133_v44  ;;  %v7156_v52 = vmul.f32 0.5, %v3238_v3  ;;  %v3097_v29 = vunpack.c.h.bf16 %v7041_v40  ;;  %v3304_v42 = vpack.c.bf16 %v3277_v56, %v3276_v4 }
 0x293   : > { %5692 = vtanh.f32 %v3324_v2  ;;  %v2658_v43 = vadd.f32 %v2657_v9, %v7087_v63  ;;  %v3242_v28 = vunpack.c.l.bf16 %v7145_v15  ;;  %v3166_v22 = vunpack.c.l.bf16 %v3145_v53 }
 0x294   : > { %5694 = vtanh.f32 %v3325_v17  ;;  %v2706_v41 = vpop.f32.mrf.mxu3  ;;  %v3167_v2 = vunpack.c.h.bf16 %v3145_v53  ;;  %v5150_v17 = vld [vmem:[#allocation4 + $0xe0] sm:$0xf]  ;;  %v3226_v12 = vpack.c.bf16 %v3201_v26, %v3200_v34  ;;  %v3147_v33 = vpack.c.bf16 %v5687_v23, %v5685_v55 }
 0x295   : > { %v2758_v21 = vpop.f32.mrf.mxu0  ;;  %v2707_v39 = vadd.f32 %v2706_v41, %v2658_v43  ;;  %5696 = vtanh.f32 %v3094_v59  ;;  %v5151_v20 = vor.u32 %v5340_v38, %v5150_v17  ;;  %v3148_v3 = vpack.c.bf16 %v5691_v46, %v5689_v49 }
 0x296   : > { %v2759_v58 = vadd.f32 %v2758_v21, %v7076_v11  ;;  %v2807_v0 = vpop.f32.mrf.mxu1  ;;  %5698 = vtanh.f32 %v3095_v54  ;;  %v3644_v43 = vunpack.c.l.bf16 %v3304_v42  ;;  %v3645_v30 = vunpack.c.h.bf16 %v3304_v42 }
 0x297   : > { %v7151_v7 = vpack.c.bf16 %v2805_v47, %v2707_v39  ;;  %2855 = vmatmul.bf16.gmra.mxu2 %v6812_v16  ;;  %v5086_v47 = vld [vmem:[#allocation4 + $0x60] sm:$0xf]  ;;  %5700 = vtanh.f32 %v3096_v10  ;;  %4188 = vmatpush.bf16.msrb.mxu3 %v5151_v20  ;;  %v3243_v53 = vunpack.c.h.bf16 %v7145_v15  ;;  %v3198_v59 = vadd.f32 1.0, %v3166_v22  ;;  %v5323_v22 = vld [vmem:[#allocation4 + $0x64] sm:$0xf] }
 0x298   : > { %v2808_v19 = vadd.f32 %v2807_v0, %v2759_v58  ;;  %2953 = vmatmul.bf16.gmra.mxu0 %v6812_v16  ;;  %v5324_v16 = vld [vmem:[#allocation4 + $0x64] sm:$0xf0]  ;;  %5702 = vtanh.f32 %v3097_v29  ;;  %v3199_v39 = vadd.f32 1.0, %v3167_v2  ;;  %v3248_v58 = vunpack.c.l.bf16 %v3226_v12  ;;  %v5088_v2 = vld [vmem:[#allocation4 + $0x68] sm:$0xf0] }
 0x299   : > { %v5693_v32 = vpop.eup %5692  ;;  %2904 = vmatmul.bf16.gmra.mxu3 %v6821_v18  ;;  %3002 = vmatmul.bf16.gmra.mxu1 %v6821_v18  ;;  %v5087_v40 = vor.u32 %v5324_v16, %v5086_v47  ;;  %v3249_v46 = vunpack.c.h.bf16 %v3226_v12  ;;  %v3170_v29 = vunpack.c.l.bf16 %v3147_v33  ;;  %v3171_v42 = vunpack.c.h.bf16 %v3147_v33  ;;  %v5078_v15 = vld [vmem:[#allocation4 + $0x50] sm:$0xf] }
 0x29a   : > { %v5695_v61 = vpop.eup %5694  ;;  %v2660_v31 = vpop.f32.mrf.mxu2  ;;  %v3173_v16 = vunpack.c.h.bf16 %v3148_v3  ;;  %v5091_v12 = vor.u32 %v5323_v22, %v5088_v2  ;;  %v3099_v33 = vunpack.c.h.bf16 %v7045_v13  ;;  %v3101_v44 = vunpack.c.h.bf16 %v7053_v27 }
 0x29b   : > { %v3384_v9 = vpack.c.bf16 %v5695_v61, %v5693_v32  ;;  %v2661_v24 = vadd.f32 %v2660_v31, %v7087_v63  ;;  %4139 = vmatpush.bf16.msrb.mxu2 %v5087_v40  ;;  %v5697_v34 = vpop.eup %5696  ;;  %v3172_v32 = vunpack.c.l.bf16 %v3148_v3  ;;  %v5339_v40 = vld [vmem:[#allocation4 + $0xe4] sm:$0xf] }
 0x29c   : > { %v2709_v18 = vpop.f32.mrf.mxu3  ;;  %v5699_v10 = vpop.eup %5698  ;;  %4237 = vmatpush.bf16.msrb.mxu0 %v5091_v12 }
 0x29d   : > { %v2760_v4 = vpop.f32.mrf.mxu0  ;;  %v3676_v56 = vunpack.c.l.bf16 %v3384_v9  ;;  %v3677_v41 = vunpack.c.h.bf16 %v3384_v9  ;;  %v2710_v21 = vadd.f32 %v2709_v18, %v2661_v24  ;;  %v5701_v47 = vpop.eup %5700  ;;  %v7167_v9 = vpack.c.bf16 %v3199_v39, %v3198_v59 }
 0x29e   : > { %v2761_v55 = vadd.f32 %v2760_v4, %v7076_v11  ;;  %v2809_v23 = vpop.f32.mrf.mxu1  ;;  %v5703_v38 = vpop.eup %5702  ;;  %v3280_v24 = vmul.f32 0.5, %v3248_v58  ;;  %v3281_v18 = vmul.f32 0.5, %v3249_v46  ;;  %v3202_v4 = vadd.f32 1.0, %v3170_v29 }
 0x29f   : > { %v3708_v26 = vmul.f32 %v3676_v56, %v3644_v43  ;;  %v3709_v54 = vmul.f32 %v3677_v41, %v3645_v30  ;;  %v3047_v0 = vpack.c.bf16 %v2808_v19, %v2710_v21  ;;  %v3098_v19 = vunpack.c.l.bf16 %v7045_v13  ;;  %v5152_v43 = vld [vmem:[#allocation4 + $0xe8] sm:$0xf0] }
 0x2a0   : > { %v2810_v49 = vadd.f32 %v2809_v23, %v2761_v55  ;;  %v5155_v30 = vor.u32 %v5339_v40, %v5152_v43  ;;  %v3203_v56 = vadd.f32 1.0, %v3171_v42  ;;  %v3204_v55 = vadd.f32 1.0, %v3172_v32  ;;  %v5338_v40 = vld [vmem:[#allocation4 + $0xd4] sm:$0xf0] }
 0x2a1   : > { %v7165_v17 = vpack.c.bf16 %v3709_v54, %v3708_v26  ;;  %v3328_v61 = vunpack.c.l.bf16 %v3047_v0  ;;  %v3329_v31 = vunpack.c.h.bf16 %v3047_v0  ;;  %v3205_v59 = vadd.f32 1.0, %v3173_v16 }
 0x2a2   : > { %v2662_v20 = vpop.f32.mrf.mxu2  ;;  %4286 = vmatpush.bf16.msrb.mxu1 %v5155_v30  ;;  %v7175_v13 = vmul.f32 0.5, %v3239_v37  ;;  %v3149_v23 = vpack.c.bf16 %v5699_v10, %v5697_v34  ;;  %v3150_v26 = vpack.c.bf16 %v5703_v38, %v5701_v47  ;;  %v3100_v0 = vunpack.c.l.bf16 %v7053_v27 }
 0x2a3   : > { %5704 = vtanh.f32 %v3328_v61  ;;  %v2663_v3 = vadd.f32 %v2662_v20, %v7087_v63  ;;  %v7183_v42 = vmul.f32 0.5, %v3242_v28  ;;  %v7185_v32 = vmul.f32 0.5, %v3243_v53  ;;  %v5322_v28 = vld [vmem:[#allocation4 + $0x54] sm:$0xf0]  ;;  %v5142_v53 = vld [vmem:[#allocation4 + $0xd0] sm:$0xf] }
 0x2a4   : > { %5706 = vtanh.f32 %v3329_v31  ;;  %v2711_v41 = vpop.f32.mrf.mxu3  ;;  %v3306_v37 = vpack.c.bf16 %v3281_v18, %v3280_v24  ;;  %v3246_v10 = vunpack.c.l.bf16 %v7167_v9  ;;  %v7191_v47 = vpack.c.bf16 %v3203_v56, %v3202_v4 }
 0x2a5   : > { %v2763_v21 = vpop.f32.mrf.mxu0  ;;  %v2712_v39 = vadd.f32 %v2711_v41, %v2663_v3  ;;  %5708 = vtanh.f32 %v3098_v19  ;;  %v7193_v16 = vpack.c.bf16 %v3205_v59, %v3204_v55  ;;  %v3174_v61 = vunpack.c.l.bf16 %v3149_v23 }
 0x2a6   : > { %v2764_v58 = vadd.f32 %v2763_v21, %v7076_v11  ;;  %v2812_v54 = vpop.f32.mrf.mxu1  ;;  %5710 = vtanh.f32 %v3099_v33  ;;  %v3175_v31 = vunpack.c.h.bf16 %v3149_v23  ;;  %v5079_v2 = vor.u32 %v5322_v28, %v5078_v15 }
 0x2a7   : > { %v7178_v46 = vpack.c.bf16 %v2810_v49, %v2712_v39  ;;  %2860 = vmatmul.bf16.gmra.mxu2 %v6864_v60  ;;  %v3247_v49 = vunpack.c.h.bf16 %v7167_v9  ;;  %5712 = vtanh.f32 %v3100_v0  ;;  %v5143_v19 = vor.u32 %v5338_v40, %v5142_v53 }
 0x2a8   : > { %v2813_v29 = vadd.f32 %v2812_v54, %v2764_v58  ;;  %2958 = vmatmul.bf16.gmra.mxu0 %v6864_v60  ;;  %v3176_v60 = vunpack.c.l.bf16 %v3150_v26  ;;  %v3177_v12 = vunpack.c.h.bf16 %v3150_v26  ;;  %5714 = vtanh.f32 %v3101_v44  ;;  %4140 = vmatpush.bf16.msrb.mxu2 %v5079_v2 }
 0x2a9   : > { %v5705_v34 = vpop.eup %5704  ;;  %2909 = vmatmul.bf16.gmra.mxu3 %v6872_v8  ;;  %3007 = vmatmul.bf16.gmra.mxu1 %v6872_v8  ;;  %v3102_v8 = vunpack.c.l.bf16 %v7061_v35  ;;  %v3648_v43 = vunpack.c.l.bf16 %v3306_v37  ;;  %v3649_v18 = vunpack.c.h.bf16 %v3306_v37  ;;  %v3252_v21 = vunpack.c.l.bf16 %v7193_v16 }
 0x2aa   : > { %v5707_v27 = vpop.eup %5706  ;;  %v2665_v22 = vpop.f32.mrf.mxu2  ;;  %4189 = vmatpush.bf16.msrb.mxu3 %v5143_v19  ;;  %v3253_v55 = vunpack.c.h.bf16 %v7193_v16  ;;  %v3206_v59 = vadd.f32 1.0, %v3174_v61  ;;  %v3103_v39 = vunpack.c.h.bf16 %v7061_v35  ;;  %v3207_v23 = vadd.f32 1.0, %v3175_v31  ;;  %v5321_v61 = vld [vmem:[#allocation4 + $0x54] sm:$0xf] }
 0x2ab   : > { %v3386_v38 = vpack.c.bf16 %v5707_v27, %v5705_v34  ;;  %v2666_v24 = vadd.f32 %v2665_v22, %v7087_v63  ;;  %v5709_v20 = vpop.eup %5708  ;;  %v3208_v44 = vadd.f32 1.0, %v3176_v60  ;;  %v3209_v34 = vadd.f32 1.0, %v3177_v12  ;;  %v5080_v22 = vld [vmem:[#allocation4 + $0x58] sm:$0xf0]  ;;  %v5337_v35 = vld [vmem:[#allocation4 + $0xd4] sm:$0xf] }
 0x2ac   : > { %v2714_v33 = vpop.f32.mrf.mxu3  ;;  %v5711_v30 = vpop.eup %5710  ;;  %5716 = vtanh.f32 %v3102_v8  ;;  %v3104_v28 = vunpack.c.l.bf16 %v7071_v57  ;;  %v3250_v31 = vunpack.c.l.bf16 %v7191_v47  ;;  %v5083_v40 = vor.u32 %v5321_v61, %v5080_v22 }
 0x2ad   : > { %v7199_v3 = vpop.f32.mrf.mxu0  ;;  %v3680_v4 = vunpack.c.l.bf16 %v3386_v38  ;;  %v3681_v56 = vunpack.c.h.bf16 %v3386_v38  ;;  %v2715_v41 = vadd.f32 %v2714_v33, %v2666_v24  ;;  %v3151_v37 = vpack.c.bf16 %v5711_v30, %v5709_v20  ;;  %v5713_v15 = vpop.eup %5712  ;;  %v5144_v38 = vld [vmem:[#allocation4 + $0xd8] sm:$0xf0] }
 0x2ae   : > { %v7204_v58 = vpop.f32.mrf.mxu1  ;;  %v5715_v2 = vpop.eup %5714  ;;  %5718 = vtanh.f32 %v3103_v39  ;;  %v3251_v24 = vunpack.c.h.bf16 %v7191_v47  ;;  %v3284_v19 = vmul.f32 0.5, %v3252_v21  ;;  %v5147_v20 = vor.u32 %v5337_v35, %v5144_v38  ;;  %4238 = vmatpush.bf16.msrb.mxu0 %v5083_v40 }
 0x2af   : > { %v3712_v26 = vmul.f32 %v3680_v4, %v3648_v43  ;;  %v3713_v54 = vmul.f32 %v3681_v56, %v3649_v18  ;;  %v3053_v0 = vpack.c.bf16 %v2813_v29, %v2715_v41  ;;  %v3105_v29 = vunpack.c.h.bf16 %v7071_v57 }
 0x2b0   : > { %v3285_v12 = vmul.f32 0.5, %v3253_v55  ;;  %v3178_v8 = vunpack.c.l.bf16 %v3151_v37  ;;  %v3179_v43 = vunpack.c.h.bf16 %v3151_v37  ;;  %v7216_v18 = vpack.c.bf16 %v3207_v23, %v3206_v59  ;;  %4287 = vmatpush.bf16.msrb.mxu1 %v5147_v20 }
 0x2b1   : > { %v7207_v53 = vpack.c.bf16 %v3713_v54, %v3712_v26  ;;  %v3332_v27 = vunpack.c.l.bf16 %v3053_v0  ;;  %v3333_v16 = vunpack.c.h.bf16 %v3053_v0  ;;  %v7218_v57 = vpack.c.bf16 %v3209_v34, %v3208_v44 }
 0x2b2   : > { %v7211_v60 = vpop.f32.mrf.mxu2  ;;  %v5717_v47 = vpop.eup %5716  ;;  %v7223_v56 = vmul.f32 0.5, %v3246_v10  ;;  %v3152_v41 = vpack.c.bf16 %v5715_v2, %v5713_v15  ;;  %v3106_v21 = vunpack.c.l.bf16 %v7089_v51  ;;  %v7228_v59 = vmul.f32 0.5, %v3247_v49  ;;  %v5336_v2 = vld [vmem:[#allocation4 + $0xc4] sm:$0xf0] }
 0x2b3   : > { %5720 = vtanh.f32 %v3332_v27  ;;  %v7230_v39 = vmul.f32 0.5, %v3250_v31  ;;  %v3107_v23 = vunpack.c.h.bf16 %v7089_v51  ;;  %v7234_v0 = vmul.f32 0.5, %v3251_v24  ;;  %v5070_v51 = vld [vmem:[#allocation4 + $0x40] sm:$0xf] }
 0x2b4   : > { %5722 = vtanh.f32 %v3333_v16  ;;  %v7214_v33 = vpop.f32.mrf.mxu3  ;;  %v5719_v54 = vpop.eup %5718  ;;  %v3210_v10 = vadd.f32 1.0, %v3178_v8  ;;  %v3211_v44 = vadd.f32 1.0, %v3179_v43  ;;  %v3308_v34 = vpack.c.bf16 %v3285_v12, %v3284_v19  ;;  %v5134_v27 = vld [vmem:[#allocation4 + $0xc0] sm:$0xf] }
 0x2b5   : > { %v2768_v30 = vpop.f32.mrf.mxu0  ;;  %5724 = vtanh.f32 %v3104_v28  ;;  %v3254_v9 = vunpack.c.l.bf16 %v7216_v18  ;;  %v3255_v49 = vunpack.c.h.bf16 %v7216_v18  ;;  %v3256_v15 = vunpack.c.l.bf16 %v7218_v57  ;;  %v5320_v28 = vld [vmem:[#allocation4 + $0x44] sm:$0xf0] }
 0x2b6   : > { %v2769_v4 = vadd.f32 %v2768_v30, %v7076_v11  ;;  %5726 = vtanh.f32 %v3105_v29  ;;  %v2817_v55 = vpop.f32.mrf.mxu1  ;;  %v3180_v61 = vunpack.c.l.bf16 %v3152_v41  ;;  %v3181_v22 = vunpack.c.h.bf16 %v3152_v41 }
 0x2b7   : > { %2865 = vmatmul.bf16.gmra.mxu2 %v6897_v36  ;;  %5728 = vtanh.f32 %v3106_v21  ;;  %v5135_v38 = vor.u32 %v5336_v2, %v5134_v27  ;;  %v7243_v19 = vpack.c.bf16 %v3211_v44, %v3210_v10  ;;  %v3319_v20 = vunpack.c.h.bf16 %v7103_v14  ;;  %v5335_v2 = vld [vmem:[#allocation4 + $0xc4] sm:$0xf] }
 0x2b8   : > { %v2818_v26 = vadd.f32 %v2817_v55, %v2769_v4  ;;  %2963 = vmatmul.bf16.gmra.mxu0 %v6897_v36  ;;  %v5071_v36 = vor.u32 %v5320_v28, %v5070_v51  ;;  %5730 = vtanh.f32 %v3107_v23  ;;  %v3652_v12 = vunpack.c.l.bf16 %v3308_v34 }
 0x2b9   : > { %v5721_v37 = vpop.eup %5720  ;;  %2914 = vmatmul.bf16.gmra.mxu3 %v6909_v62  ;;  %3012 = vmatmul.bf16.gmra.mxu1 %v6909_v62  ;;  %v3318_v62 = vunpack.c.l.bf16 %v7103_v14  ;;  %v3653_v30 = vunpack.c.h.bf16 %v3308_v34  ;;  %v3212_v55 = vadd.f32 1.0, %v3180_v61  ;;  %v3213_v23 = vadd.f32 1.0, %v3181_v22  ;;  %v5072_v22 = vld [vmem:[#allocation4 + $0x48] sm:$0xf0] }
 0x2ba   : > { %v5723_v16 = vpop.eup %5722  ;;  %v2670_v35 = vpop.f32.mrf.mxu2  ;;  %4141 = vmatpush.bf16.msrb.mxu2 %v5071_v36  ;;  %4190 = vmatpush.bf16.msrb.mxu3 %v5135_v38  ;;  %v7251_v10 = vpack.c.bf16 %v7175_v13, %v7156_v52  ;;  %v3257_v34 = vunpack.c.h.bf16 %v7218_v57  ;;  %v3258_v36 = vunpack.c.l.bf16 %v7243_v19  ;;  %v5319_v13 = vld [vmem:[#allocation4 + $0x44] sm:$0xf] }
 0x2bb   : > { %v5725_v31 = vpop.eup %5724  ;;  %v3388_v29 = vpack.c.bf16 %v5723_v16, %v5721_v37  ;;  %v2671_v40 = vadd.f32 %v2670_v35, %v7087_v63  ;;  %v3153_v37 = vpack.c.bf16 %v5719_v54, %v5717_v47  ;;  %v3288_v35 = vmul.f32 0.5, %v3256_v15  ;;  %v5136_v15 = vld [vmem:[#allocation4 + $0xc8] sm:$0xf0] }
 0x2bc   : > { %v5727_v24 = vpop.eup %5726  ;;  %v2719_v8 = vpop.f32.mrf.mxu3  ;;  %5732 = vtanh.f32 %v3318_v62  ;;  %v5075_v57 = vor.u32 %v5319_v13, %v5072_v22  ;;  %v5139_v62 = vor.u32 %v5335_v2, %v5136_v15  ;;  %v3639_v22 = vunpack.c.h.bf16 %v7251_v10 }
 0x2bd   : > { %v7247_v43 = vpop.f32.mrf.mxu0  ;;  %v3684_v4 = vunpack.c.l.bf16 %v3388_v29  ;;  %v3685_v41 = vunpack.c.h.bf16 %v3388_v29  ;;  %v2720_v21 = vadd.f32 %v2719_v8, %v2671_v40  ;;  %v3154_v14 = vpack.c.bf16 %v5727_v24, %v5725_v31  ;;  %v5729_v16 = vpop.eup %5728 }
 0x2be   : > { %v7253_v44 = vpop.f32.mrf.mxu1  ;;  %v5731_v61 = vpop.eup %5730  ;;  %5734 = vtanh.f32 %v3319_v20  ;;  %v7259_v31 = vpack.c.bf16 %v3213_v23, %v3212_v55  ;;  %v3182_v29 = vunpack.c.l.bf16 %v3153_v37  ;;  %v3289_v20 = vmul.f32 0.5, %v3257_v34  ;;  %4239 = vmatpush.bf16.msrb.mxu0 %v5075_v57  ;;  %4288 = vmatpush.bf16.msrb.mxu1 %v5139_v62  ;;  %v5126_v57 = vld [vmem:[#allocation4 + $0xb0] sm:$0xf]  ;;  %v5334_v62 = vld [vmem:[#allocation4 + $0xb4] sm:$0xf0] }
 0x2bf   : > { %v3716_v51 = vmul.f32 %v3684_v4, %v3652_v12  ;;  %v3717_v28 = vmul.f32 %v3685_v41, %v3653_v30  ;;  %v3059_v27 = vpack.c.bf16 %v2818_v26, %v2720_v21  ;;  %v3183_v26 = vunpack.c.h.bf16 %v3153_v37 }
 0x2c0   : > { %v3184_v38 = vunpack.c.l.bf16 %v3154_v14  ;;  %v3185_v24 = vunpack.c.h.bf16 %v3154_v14  ;;  %v3259_v12 = vunpack.c.h.bf16 %v7243_v19  ;;  %v3155_v8 = vpack.c.bf16 %v5731_v61, %v5729_v16 }
 0x2c1   : > { %v7257_v47 = vpack.c.bf16 %v3717_v28, %v3716_v51  ;;  %v3336_v54 = vunpack.c.l.bf16 %v3059_v27  ;;  %v3337_v52 = vunpack.c.h.bf16 %v3059_v27  ;;  %v7268_v41 = vmul.f32 0.5, %v3254_v9 }
 0x2c2   : > { %v7261_v40 = vpop.f32.mrf.mxu2  ;;  %v7272_v21 = vmul.f32 0.5, %v3255_v49  ;;  %v7276_v55 = vpack.c.bf16 %v7185_v32, %v7183_v42  ;;  %v5733_v23 = vpop.eup %5732  ;;  %v3260_v37 = vunpack.c.l.bf16 %v7259_v31  ;;  %v3214_v14 = vadd.f32 1.0, %v3182_v29  ;;  %v5062_v29 = vld [vmem:[#allocation4 + $0x30] sm:$0xf] }
 0x2c3   : > { %5736 = vtanh.f32 %v3336_v54  ;;  %v3215_v51 = vadd.f32 1.0, %v3183_v26  ;;  %v7281_v16 = vmul.f32 0.5, %v3258_v36  ;;  %v3216_v18 = vadd.f32 1.0, %v3184_v38  ;;  %v5318_v26 = vld [vmem:[#allocation4 + $0x34] sm:$0xf0] }
 0x2c4   : > { %5738 = vtanh.f32 %v3337_v52  ;;  %v7264_v30 = vpop.f32.mrf.mxu3  ;;  %v5735_v27 = vpop.eup %5734  ;;  %v3217_v49 = vadd.f32 1.0, %v3185_v24  ;;  %v7284_v42 = vmul.f32 0.5, %v3259_v12  ;;  %v3186_v32 = vunpack.c.l.bf16 %v3155_v8 }
 0x2c5   : > { %v2773_v4 = vpop.f32.mrf.mxu0  ;;  %v3187_v61 = vunpack.c.h.bf16 %v3155_v8  ;;  %v3310_v54 = vpack.c.bf16 %v3289_v20, %v3288_v35  ;;  %v3261_v13 = vunpack.c.h.bf16 %v7259_v31  ;;  %v7293_v35 = vmul.f32 0.5, %v3260_v37 }
 0x2c6   : > { %v2774_v19 = vadd.f32 %v2773_v4, %v7076_v11  ;;  %v2822_v9 = vpop.f32.mrf.mxu1  ;;  %v3381_v38 = vpack.c.bf16 %v5735_v27, %v5733_v23  ;;  %v5063_v31 = vor.u32 %v5318_v26, %v5062_v29  ;;  %v7295_v20 = vpack.c.bf16 %v3217_v49, %v3216_v18 }
 0x2c7   : > { %2870 = vmatmul.bf16.gmra.mxu2 %v6932_v48  ;;  %v5127_v4 = vor.u32 %v5334_v62, %v5126_v57  ;;  %v3656_v2 = vunpack.c.l.bf16 %v3310_v54  ;;  %v3657_v37 = vunpack.c.h.bf16 %v3310_v54  ;;  %v3293_v27 = vmul.f32 0.5, %v3261_v13  ;;  %v5317_v62 = vld [vmem:[#allocation4 + $0x34] sm:$0xf] }
 0x2c8   : > { %v2823_v34 = vadd.f32 %v2822_v9, %v2774_v19  ;;  %2968 = vmatmul.bf16.gmra.mxu0 %v6932_v48  ;;  %v3233_v48 = vpack.c.bf16 %v3215_v51, %v3214_v14  ;;  %v3218_v19 = vadd.f32 1.0, %v3186_v32  ;;  %v3219_v9 = vadd.f32 1.0, %v3187_v61  ;;  %4142 = vmatpush.bf16.msrb.mxu2 %v5063_v31 }
 0x2c9   : > { %v5737_v52 = vpop.eup %5736  ;;  %2919 = vmatmul.bf16.gmra.mxu3 %v6941_v45  ;;  %3017 = vmatmul.bf16.gmra.mxu1 %v6941_v45  ;;  %v3322_v45 = vunpack.c.l.bf16 %v7131_v50  ;;  %v3670_v49 = vunpack.c.l.bf16 %v3381_v38  ;;  %v3671_v32 = vunpack.c.h.bf16 %v3381_v38  ;;  %v7309_v54 = vpack.c.bf16 %v7228_v59, %v7223_v56  ;;  %v5333_v38 = vld [vmem:[#allocation4 + $0xb4] sm:$0xf] }
 0x2ca   : > { %v5739_v15 = vpop.eup %5738  ;;  %v2675_v24 = vpop.f32.mrf.mxu2  ;;  %4191 = vmatpush.bf16.msrb.mxu3 %v5127_v4  ;;  %v3262_v18 = vunpack.c.l.bf16 %v3233_v48  ;;  %v7305_v31 = vpack.c.bf16 %v3219_v9, %v3218_v19  ;;  %v5128_v4 = vld [vmem:[#allocation4 + $0xb8] sm:$0xf0]  ;;  %v7725_v56 = vunpack.c.l.bf16 %v7251_v10 }
 0x2cb   : > { %v3390_v12 = vpack.c.bf16 %v5739_v15, %v5737_v52  ;;  %v2676_v8 = vadd.f32 %v2675_v24, %v7087_v63  ;;  %v3323_v52 = vunpack.c.h.bf16 %v7131_v50  ;;  %v3263_v15 = vunpack.c.h.bf16 %v3233_v48 }
 0x2cc   : > { %v2724_v36 = vpop.f32.mrf.mxu3  ;;  %v3264_v24 = vunpack.c.l.bf16 %v7295_v20  ;;  %5740 = vtanh.f32 %v3322_v45  ;;  %v3702_v59 = vmul.f32 %v3670_v49, %v7725_v56  ;;  %v3703_v19 = vmul.f32 %v3671_v32, %v3639_v22  ;;  %v5118_v56 = vld [vmem:[#allocation4 + $0xa0] sm:$0xf] }
 0x2cd   : > { %v7299_v28 = vpop.f32.mrf.mxu0  ;;  %v3688_v23 = vunpack.c.l.bf16 %v3390_v12  ;;  %v3689_v14 = vunpack.c.h.bf16 %v3390_v12  ;;  %v2725_v51 = vadd.f32 %v2724_v36, %v2676_v8  ;;  %v5064_v12 = vld [vmem:[#allocation4 + $0x38] sm:$0xf0]  ;;  %5742 = vtanh.f32 %v3323_v52 }
 0x2ce   : > { %v7302_v29 = vpop.f32.mrf.mxu1  ;;  %v5067_v8 = vor.u32 %v5317_v62, %v5064_v12  ;;  %v5131_v9 = vor.u32 %v5333_v38, %v5128_v4  ;;  %v7320_v45 = vmul.f32 0.5, %v3262_v18  ;;  %v3266_v10 = vunpack.c.l.bf16 %v7305_v31 }
 0x2cf   : > { %v3720_v61 = vmul.f32 %v3688_v23, %v3656_v2  ;;  %v3721_v26 = vmul.f32 %v3689_v14, %v3657_v37  ;;  %v3065_v57 = vpack.c.bf16 %v2823_v34, %v2725_v51  ;;  %v3265_v2 = vunpack.c.h.bf16 %v7295_v20 }
 0x2d0   : > { %v2668_v34 = vadd.f32 %v7211_v60, %v7087_v63  ;;  %v3326_v37 = vunpack.c.l.bf16 %v7151_v7  ;;  %v2766_v20 = vadd.f32 %v7199_v3, %v7076_v11  ;;  %4240 = vmatpush.bf16.msrb.mxu0 %v5067_v8  ;;  %v7327_v14 = vmul.f32 0.5, %v3263_v15  ;;  %4289 = vmatpush.bf16.msrb.mxu1 %v5131_v9  ;;  %v5316_v8 = vld [vmem:[#allocation4 + $0x24] sm:$0xf0] }
 0x2d1   : > { %v7311_v13 = vpack.c.bf16 %v3721_v26, %v3720_v61  ;;  %v3340_v36 = vunpack.c.l.bf16 %v3065_v57  ;;  %v3341_v50 = vunpack.c.h.bf16 %v3065_v57  ;;  %v3327_v22 = vunpack.c.h.bf16 %v7151_v7 }
 0x2d2   : > { %v7316_v48 = vpop.f32.mrf.mxu2  ;;  %v3748_v18 = vunpack.c.l.bf16 %v7123_v1  ;;  %v3646_v49 = vunpack.c.l.bf16 %v7309_v54  ;;  %v3647_v3 = vunpack.c.h.bf16 %v7309_v54  ;;  %v2717_v52 = vadd.f32 %v7214_v33, %v2668_v34  ;;  %v5741_v61 = vpop.eup %5740  ;;  %v5054_v34 = vld [vmem:[#allocation4 + $0x20] sm:$0xf] }
 0x2d3   : > { %5744 = vtanh.f32 %v3340_v36  ;;  %v7336_v26 = vmul.f32 0.5, %v3264_v24  ;;  %v7338_v57 = vmul.f32 0.5, %v3265_v2  ;;  %v7340_v15 = vpack.c.bf16 %v3703_v19, %v3702_v59  ;;  %v5743_v36 = vpop.eup %5742  ;;  %v5332_v59 = vld [vmem:[#allocation4 + $0xa4] sm:$0xf0] }
 0x2d4   : > { %5746 = vtanh.f32 %v3341_v50  ;;  %v7325_v23 = vpop.f32.mrf.mxu3  ;;  %v3267_v50 = vunpack.c.h.bf16 %v7305_v31  ;;  %v2815_v62 = vadd.f32 %v7204_v58, %v2766_v20  ;;  %v3312_v12 = vpack.c.bf16 %v3293_v27, %v7293_v35  ;;  %v5904_v31 = vld [vmem:[%s7712_s4] sm:$0x3f] }
 0x2d5   : > { %v2778_v60 = vpop.f32.mrf.mxu0  ;;  %5748 = vtanh.f32 %v3326_v37  ;;  %v7347_v24 = vmul.f32 0.5, %v3266_v10  ;;  %v3749_v38 = vunpack.c.h.bf16 %v7123_v1  ;;  %v3330_v2 = vunpack.c.l.bf16 %v7178_v46 }
 0x2d6   : > { %v2779_v51 = vadd.f32 %v2778_v60, %v7076_v11  ;;  %v2827_v32 = vpop.f32.mrf.mxu1  ;;  %5750 = vtanh.f32 %v3327_v22  ;;  %v3331_v58 = vunpack.c.h.bf16 %v7178_v46  ;;  %v3056_v35 = vpack.c.bf16 %v2815_v62, %v2717_v52 }
 0x2d7   : > { %2875 = vmatmul.bf16.gmra.mxu2 %v6962_v25  ;;  %5752 = vtanh.f32 %v3748_v18  ;;  %v5055_v27 = vor.u32 %v5316_v8, %v5054_v34  ;;  %v3750_v1 = vunpack.c.l.bf16 %v7340_v15  ;;  %v5119_v37 = vor.u32 %v5332_v59, %v5118_v56 }
 0x2d8   : > { %v2828_v7 = vadd.f32 %v2827_v32, %v2779_v51  ;;  %2973 = vmatmul.bf16.gmra.mxu0 %v6962_v25  ;;  %v3383_v20 = vpack.c.bf16 %v5743_v36, %v5741_v61  ;;  %v3660_v60 = vunpack.c.l.bf16 %v3312_v12  ;;  %v3661_v10 = vunpack.c.h.bf16 %v3312_v12 }
 0x2d9   : > { %v5745_v33 = vpop.eup %5744  ;;  %2924 = vmatmul.bf16.gmra.mxu3 %v6965_v6  ;;  %3022 = vmatmul.bf16.gmra.mxu1 %v6965_v6  ;;  %v2673_v6 = vadd.f32 %v7261_v40, %v7087_v63  ;;  %5754 = vtanh.f32 %v3330_v2  ;;  %v7362_v62 = vpack.c.bf16 %v7234_v0, %v7230_v39  ;;  %v3334_v61 = vunpack.c.l.bf16 %v3056_v35 }
 0x2da   : > { %v5747_v4 = vpop.eup %5746  ;;  %v2680_v25 = vpop.f32.mrf.mxu2  ;;  %4143 = vmatpush.bf16.msrb.mxu2 %v5055_v27  ;;  %4192 = vmatpush.bf16.msrb.mxu3 %v5119_v37  ;;  %5756 = vtanh.f32 %v3331_v58  ;;  %v2771_v40 = vadd.f32 %v7247_v43, %v7076_v11  ;;  %v3335_v0 = vunpack.c.h.bf16 %v3056_v35  ;;  %v3751_v43 = vunpack.c.h.bf16 %v7340_v15  ;;  %v5048_v15 = vld [vmem:[#allocation4 + $0x18] sm:$0xf0] }
 0x2db   : > { %v3392_v19 = vpack.c.bf16 %v5747_v4, %v5745_v33  ;;  %v2681_v9 = vadd.f32 %v2680_v25, %v7087_v63  ;;  %v5749_v32 = vpop.eup %5748  ;;  %5758 = vtanh.f32 %v3749_v38  ;;  %v3674_v4 = vunpack.c.l.bf16 %v3383_v20 }
 0x2dc   : > { %v2729_v22 = vpop.f32.mrf.mxu3  ;;  %v5751_v12 = vpop.eup %5750  ;;  %5760 = vtanh.f32 %v3750_v1  ;;  %v3675_v25 = vunpack.c.h.bf16 %v3383_v20  ;;  %v2722_v39 = vadd.f32 %v7264_v30, %v2673_v6  ;;  %v2820_v38 = vadd.f32 %v7253_v44, %v2771_v40 }
 0x2dd   : > { %v7358_v51 = vpop.f32.mrf.mxu0  ;;  %v3692_v46 = vunpack.c.l.bf16 %v3392_v19  ;;  %v3693_v18 = vunpack.c.h.bf16 %v3392_v19  ;;  %v2730_v52 = vadd.f32 %v2729_v22, %v2681_v9  ;;  %v7368_v8 = vpop.eup %5752  ;;  %v3385_v59 = vpack.c.bf16 %v5751_v12, %v5749_v32 }
 0x2de   : > { %v7366_v36 = vpop.f32.mrf.mxu1  ;;  %5762 = vtanh.f32 %v3334_v61  ;;  %v7379_v1 = vmul.f32 0.5, %v3267_v50  ;;  %v3650_v30 = vunpack.c.l.bf16 %v7362_v62  ;;  %v7384_v35 = vpack.c.bf16 %v7272_v21, %v7268_v41 }
 0x2df   : > { %v3724_v33 = vmul.f32 %v3692_v46, %v3660_v60  ;;  %v3725_v2 = vmul.f32 %v3693_v18, %v3661_v10  ;;  %v3071_v34 = vpack.c.bf16 %v2828_v7, %v2730_v52  ;;  %v5755_v7 = vpop.eup %5754  ;;  %v7387_v37 = vpack.c.bf16 %v2820_v38, %v2722_v39  ;;  %v5315_v46 = vld [vmem:[#allocation4 + $0x24] sm:$0xf]  ;;  %v5056_v18 = vld [vmem:[#allocation4 + $0x28] sm:$0xf0] }
 0x2e0   : > { %v5757_v9 = vpop.eup %5756  ;;  %v7394_v50 = vperm.slane %v5904_v31, 5  ;;  %v7726_v41 = vunpack.c.l.bf16 %v7276_v55  ;;  %v7727_v60 = vunpack.c.h.bf16 %v7276_v55  ;;  %v7404_v22 = vpack.c.bf16 %v7284_v42, %v7281_v16  ;;  %v5331_v52 = vld [vmem:[#allocation4 + $0xa4] sm:$0xf] }
 0x2e1   : > { %v7371_v58 = vpack.c.bf16 %v3725_v2, %v3724_v33  ;;  %v3344_v27 = vunpack.c.l.bf16 %v3071_v34  ;;  %v3345_v56 = vunpack.c.h.bf16 %v3071_v34  ;;  %v7396_v6 = vpop.eup %5758  ;;  %v3678_v61 = vunpack.c.l.bf16 %v3385_v59  ;;  %v5120_v2 = vld [vmem:[#allocation4 + $0xa8] sm:$0xf0] }
 0x2e2   : > { %v7375_v19 = vpop.f32.mrf.mxu2  ;;  %v3706_v21 = vmul.f32 %v3674_v4, %v7726_v41  ;;  %v3707_v10 = vmul.f32 %v3675_v25, %v7727_v60  ;;  %v7406_v32 = vpop.eup %5760  ;;  %v3679_v40 = vunpack.c.h.bf16 %v3385_v59  ;;  %v5059_v33 = vor.u32 %v5315_v46, %v5056_v18  ;;  %v5046_v18 = vld [vmem:[#allocation4 + $0x10] sm:$0xf] }
 0x2e3   : > { %5764 = vtanh.f32 %v3344_v27  ;;  %v7408_v34 = vpack.c.bf16 %v5757_v9, %v5755_v7  ;;  %v3314_v4 = vpack.c.bf16 %v7338_v57, %v7336_v26  ;;  %v7413_v16 = vperm.slane %v5904_v31, 4 }
 0x2e4   : > { %5766 = vtanh.f32 %v3345_v56  ;;  %v7389_v44 = vpop.f32.mrf.mxu3  ;;  %v5763_v42 = vpop.eup %5762  ;;  %v3338_v39 = vunpack.c.l.bf16 %v7387_v37  ;;  %4241 = vmatpush.bf16.msrb.mxu0 %v5059_v33  ;;  %v5123_v27 = vor.u32 %v5331_v52, %v5120_v2  ;;  %v3710_v7 = vmul.f32 %v3678_v61, %v3646_v49  ;;  %v5314_v52 = vld [vmem:[#allocation4 + $0x14] sm:$0xf0]  ;;  %v5110_v49 = vld [vmem:[#allocation4 + $0x90] sm:$0xf] }
 0x2e5   : > { %v2939_v20 = vpop.f32.mrf.mxu0  ;;  %5768 = vtanh.f32 %v3335_v0  ;;  %v2678_v0 = vadd.f32 %v7316_v48, %v7087_v63  ;;  %v3711_v9 = vmul.f32 %v3679_v40, %v3647_v3  ;;  %v3339_v48 = vunpack.c.h.bf16 %v7387_v37  ;;  %v5330_v33 = vld [vmem:[#allocation4 + $0x94] sm:$0xf0] }
 0x2e6   : > { %5770 = vtanh.f32 %v3751_v43  ;;  %v2988_v12 = vpop.f32.mrf.mxu1  ;;  %v7419_v43 = vpack.c.bf16 %v3707_v10, %v3706_v21  ;;  %v2940_v26 = vadd.f32 %v2939_v20, %v7394_v50  ;;  %v2776_v31 = vadd.f32 %v7299_v28, %v7076_v11  ;;  %4290 = vmatpush.bf16.msrb.mxu1 %v5123_v27 }
 0x2e7   : > { %v3682_v60 = vunpack.c.l.bf16 %v7408_v34  ;;  %v3664_v46 = vunpack.c.l.bf16 %v3314_v4  ;;  %5772 = vtanh.f32 %v3338_v39  ;;  %v2727_v54 = vadd.f32 %v7325_v23, %v2678_v0  ;;  %v5313_v0 = vld [vmem:[#allocation4 + $0x14] sm:$0xf] }
 0x2e8   : > { %v3665_v3 = vunpack.c.h.bf16 %v3314_v4  ;;  %v5047_v40 = vor.u32 %v5314_v52, %v5046_v18  ;;  %v2989_v38 = vadd.f32 %v2988_v12, %v2940_v26  ;;  %5774 = vtanh.f32 %v3339_v48  ;;  %v5329_v18 = vld [vmem:[#allocation4 + $0x94] sm:$0xf]  ;;  %v5112_v26 = vld [vmem:[#allocation4 + $0x98] sm:$0xf0] }
 0x2e9   : > { %v5765_v56 = vpop.eup %5764  ;;  %v5111_v25 = vor.u32 %v5330_v33, %v5110_v49  ;;  %v3683_v39 = vunpack.c.h.bf16 %v7408_v34  ;;  %v7440_v12 = vpack.c.bf16 %v7327_v14, %v7320_v45  ;;  %v3752_v45 = vunpack.c.l.bf16 %v7141_v5 }
 0x2ea   : > { %v5767_v57 = vpop.eup %5766  ;;  %v2841_v41 = vpop.f32.mrf.mxu2  ;;  %4144 = vmatpush.bf16.msrb.mxu2 %v5047_v40  ;;  %v7728_v14 = vunpack.c.h.bf16 %v7362_v62 }
 0x2eb   : > { %v5769_v21 = vpop.eup %5768  ;;  %v3394_v10 = vpack.c.bf16 %v5767_v57, %v5765_v56  ;;  %v2842_v20 = vadd.f32 %v2841_v41, %v7413_v16  ;;  %v2825_v41 = vadd.f32 %v7302_v29, %v2776_v31  ;;  %4193 = vmatpush.bf16.msrb.mxu3 %v5111_v25  ;;  %v5051_v29 = vor.u32 %v5313_v0, %v5048_v15  ;;  %v5102_v0 = vld [vmem:[#allocation4 + $0x80] sm:$0xf] }
 0x2ec   : > { %v7433_v61 = vpop.eup %5770  ;;  %v2890_v37 = vpop.f32.mrf.mxu3  ;;  %v3389_v57 = vpack.c.bf16 %v5769_v21, %v5763_v42  ;;  %v5115_v21 = vor.u32 %v5329_v18, %v5112_v26  ;;  %v3715_v25 = vmul.f32 %v3683_v39, %v7728_v14  ;;  %v3662_v62 = vunpack.c.l.bf16 %v7440_v12 }
 0x2ed   : > { %v2941_v28 = vpop.f32.mrf.mxu0  ;;  %v3696_v2 = vunpack.c.l.bf16 %v3394_v10  ;;  %v3697_v27 = vunpack.c.h.bf16 %v3394_v10  ;;  %v2891_v56 = vadd.f32 %v2890_v37, %v2842_v20  ;;  %v3068_v52 = vpack.c.bf16 %v2825_v41, %v2727_v54  ;;  %v5773_v10 = vpop.eup %5772  ;;  %4242 = vmatpush.bf16.msrb.mxu0 %v5051_v29 }
 0x2ee   : > { %v2990_v59 = vpop.f32.mrf.mxu1  ;;  %v2942_v42 = vadd.f32 %v2941_v28, %v7394_v50  ;;  %v3687_v20 = vunpack.c.h.bf16 %v3389_v57  ;;  %4291 = vmatpush.bf16.msrb.mxu1 %v5115_v21  ;;  %v5775_v54 = vpop.eup %5774  ;;  %v3663_v40 = vunpack.c.h.bf16 %v7440_v12  ;;  %v2683_v14 = vadd.f32 %v7375_v19, %v7087_v63 }
 0x2ef   : > { %v3728_v55 = vmul.f32 %v3696_v2, %v3664_v46  ;;  %v3729_v23 = vmul.f32 %v3697_v27, %v3665_v3  ;;  %v3030_v4 = vpack.c.bf16 %v2989_v38, %v2891_v56  ;;  %v3714_v38 = vmul.f32 %v3682_v60, %v3650_v30 }
 0x2f0   : > { %v3686_v46 = vunpack.c.l.bf16 %v3389_v57  ;;  %v7452_v3 = vpack.c.bf16 %v3711_v9, %v3710_v7  ;;  %v3342_v37 = vunpack.c.l.bf16 %v3068_v52  ;;  %v7456_v30 = vpack.c.bf16 %v7379_v1, %v7347_v24 }
 0x2f1   : > { %v7443_v48 = vpack.c.bf16 %v3729_v23, %v3728_v55  ;;  %v3396_v31 = vunpack.c.l.bf16 %v3030_v4  ;;  %v3397_v34 = vunpack.c.h.bf16 %v3030_v4  ;;  %v3753_v55 = vunpack.c.h.bf16 %v7141_v5  ;;  %v5038_v23 = vld [vmem:[#allocation4] sm:$0xf]  ;;  %v5312_v4 = vld [vmem:[#allocation4 + $0x4] sm:$0xf0] }
 0x2f2   : > { %v2843_v49 = vpop.f32.mrf.mxu2  ;;  %v2991_v33 = vadd.f32 %v2990_v59, %v2942_v42  ;;  %v7729_v27 = vunpack.c.l.bf16 %v7384_v35  ;;  %v7730_v7 = vunpack.c.h.bf16 %v7384_v35  ;;  %v3343_v56 = vunpack.c.h.bf16 %v3068_v52 }
 0x2f3   : > { %5776 = vtanh.f32 %v3396_v31  ;;  %v2844_v15 = vadd.f32 %v2843_v49, %v7413_v16  ;;  %v7464_v24 = vpack.c.bf16 %v3715_v25, %v3714_v38  ;;  %v3391_v1 = vpack.c.bf16 %v5775_v54, %v5773_v10  ;;  %v5328_v31 = vld [vmem:[#allocation4 + $0x84] sm:$0xf0] }
 0x2f4   : > { %5778 = vtanh.f32 %v3397_v34  ;;  %v2892_v60 = vpop.f32.mrf.mxu3  ;;  %v3718_v5 = vmul.f32 %v3686_v46, %v7729_v27  ;;  %v3719_v9 = vmul.f32 %v3687_v20, %v7730_v7  ;;  %v3666_v39 = vunpack.c.l.bf16 %v7456_v30 }
 0x2f5   : > { %v2944_v28 = vpop.f32.mrf.mxu0  ;;  %v2893_v2 = vadd.f32 %v2892_v60, %v2844_v15  ;;  %5780 = vtanh.f32 %v3752_v45  ;;  %v3667_v59 = vunpack.c.h.bf16 %v7456_v30  ;;  %v7470_v35 = vpack.c.bf16 %v7396_v6, %v7368_v8 }
 0x2f6   : > { %v2993_v57 = vpop.f32.mrf.mxu1  ;;  %5782 = vtanh.f32 %v3753_v55  ;;  %v2945_v29 = vadd.f32 %v2944_v28, %v7394_v50  ;;  %v5039_v26 = vor.u32 %v5312_v4, %v5038_v23  ;;  %v7473_v21 = vpack.c.bf16 %v3719_v9, %v3718_v5 }
 0x2f7   : > { %v3033_v41 = vpack.c.bf16 %v2991_v33, %v2893_v2  ;;  %5784 = vtanh.f32 %v3342_v37  ;;  %v5103_v38 = vor.u32 %v5328_v31, %v5102_v0  ;;  %v7477_v46 = vpack.c.bf16 %v7433_v61, %v7406_v32 }
 0x2f8   : > { %5786 = vtanh.f32 %v3343_v56  ;;  %v3690_v20 = vunpack.c.l.bf16 %v3391_v1  ;;  %4145 = vmatpush.bf16.msrb.mxu2 %v5039_v26  ;;  %v3691_v45 = vunpack.c.h.bf16 %v3391_v1  ;;  %v3860_v55 = vunpack.c.l.bf16 %v7470_v35 }
 0x2f9   : > { %v5777_v18 = vpop.eup %5776  ;;  %v3398_v52 = vunpack.c.l.bf16 %v3033_v41  ;;  %v3399_v42 = vunpack.c.h.bf16 %v3033_v41  ;;  %4194 = vmatpush.bf16.msrb.mxu3 %v5103_v38  ;;  %v2994_v37 = vadd.f32 %v2993_v57, %v2945_v29  ;;  %v2781_v33 = vadd.f32 %v7358_v51, %v7076_v11  ;;  %v5311_v41 = vld [vmem:[#allocation4 + $0x4] sm:$0xf]  ;;  %v5040_v57 = vld [vmem:[#allocation4 + $0x8] sm:$0xf0] }
 0x2fa   : > { %v5779_v34 = vpop.eup %5778  ;;  %v2846_v10 = vpop.f32.mrf.mxu2  ;;  %v3862_v27 = vunpack.c.l.bf16 %v7477_v46  ;;  %v3861_v63 = vunpack.c.h.bf16 %v7470_v35  ;;  %v3754_v19 = vunpack.c.l.bf16 %v7419_v43  ;;  %v7731_v5 = vunpack.c.l.bf16 %v7404_v22 }
 0x2fb   : > { %v3460_v8 = vpack.c.bf16 %v5779_v34, %v5777_v18  ;;  %5788 = vtanh.f32 %v3398_v52  ;;  %v2847_v6 = vadd.f32 %v2846_v10, %v7413_v16  ;;  %v5781_v49 = vpop.eup %5780  ;;  %v7732_v4 = vunpack.c.h.bf16 %v7404_v22  ;;  %v5327_v18 = vld [vmem:[#allocation4 + $0x84] sm:$0xf]  ;;  %v5104_v52 = vld [vmem:[#allocation4 + $0x88] sm:$0xf0] }
 0x2fc   : > { %5790 = vtanh.f32 %v3399_v42  ;;  %v2895_v25 = vpop.f32.mrf.mxu3  ;;  %v5783_v54 = vpop.eup %5782  ;;  %v3722_v7 = vmul.f32 %v3690_v20, %v7731_v5  ;;  %v2732_v11 = vadd.f32 %v7389_v44, %v2683_v14  ;;  %v5043_v51 = vor.u32 %v5311_v41, %v5040_v57 }
 0x2fd   : > { %v2946_v15 = vpop.f32.mrf.mxu0  ;;  %v3476_v32 = vunpack.c.l.bf16 %v3460_v8  ;;  %v3477_v61 = vunpack.c.h.bf16 %v3460_v8  ;;  %v2896_v60 = vadd.f32 %v2895_v25, %v2847_v6  ;;  %v5785_v28 = vpop.eup %5784  ;;  %v3723_v0 = vmul.f32 %v3691_v45, %v7732_v4 }
 0x2fe   : > { %v2995_v2 = vpop.f32.mrf.mxu1  ;;  %v5787_v23 = vpop.eup %5786  ;;  %v3755_v42 = vunpack.c.h.bf16 %v7419_v43  ;;  %v5107_v10 = vor.u32 %v5327_v18, %v5104_v52  ;;  %v2830_v20 = vadd.f32 %v7366_v36, %v2781_v33  ;;  %v2947_v8 = vadd.f32 %v2946_v15, %v7394_v50  ;;  %4243 = vmatpush.bf16.msrb.mxu0 %v5043_v51 }
 0x2ff   : > { %v3508_v9 = vadd.f32 1.0, %v3476_v32  ;;  %v3509_v56 = vadd.f32 1.0, %v3477_v61  ;;  %v3036_v1 = vpack.c.bf16 %v2994_v37, %v2896_v60  ;;  %5792 = vtanh.f32 %v3754_v19 }
 0x300   : > { %v7496_v22 = vpack.c.bf16 %v5783_v54, %v5781_v49  ;;  %4292 = vmatpush.bf16.msrb.mxu1 %v5107_v10  ;;  %v3393_v43 = vpack.c.bf16 %v5787_v23, %v5785_v28  ;;  %v3756_v36 = vunpack.c.l.bf16 %v7165_v17  ;;  %v3074_v37 = vpack.c.bf16 %v2830_v20, %v2732_v11 }
 0x301   : > { %v5789_v29 = vpop.eup %5788  ;;  %v3540_v26 = vpack.c.bf16 %v3509_v56, %v3508_v9  ;;  %v3400_v31 = vunpack.c.l.bf16 %v3036_v1  ;;  %v3401_v34 = vunpack.c.h.bf16 %v3036_v1  ;;  %v3757_v33 = vunpack.c.h.bf16 %v7165_v17 }
 0x302   : > { %v5791_v38 = vpop.eup %5790  ;;  %v2848_v6 = vpop.f32.mrf.mxu2  ;;  %v2996_v19 = vadd.f32 %v2995_v2, %v2947_v8  ;;  %v3863_v28 = vunpack.c.h.bf16 %v7477_v46  ;;  %v7504_v57 = vpack.c.bf16 %v3723_v0, %v3722_v7  ;;  %v3864_v4 = vunpack.c.l.bf16 %v7496_v22 }
 0x303   : > { %v3556_v44 = vunpack.c.l.bf16 %v3540_v26  ;;  %v3557_v45 = vunpack.c.h.bf16 %v3540_v26  ;;  %v3461_v14 = vpack.c.bf16 %v5791_v38, %v5789_v29  ;;  %5794 = vtanh.f32 %v3400_v31 }
 0x304   : > { %5796 = vtanh.f32 %v3401_v34  ;;  %v2849_v25 = vadd.f32 %v2848_v6, %v7413_v16  ;;  %v2897_v32 = vpop.f32.mrf.mxu3  ;;  %v3694_v17 = vunpack.c.l.bf16 %v3393_v43  ;;  %v3346_v52 = vunpack.c.l.bf16 %v3074_v37 }
 0x305   : > { %v2949_v61 = vpop.f32.mrf.mxu0  ;;  %v3478_v15 = vunpack.c.l.bf16 %v3461_v14  ;;  %v3479_v60 = vunpack.c.h.bf16 %v3461_v14  ;;  %v3588_v49 = vmul.f32 0.5, %v3556_v44  ;;  %v3589_v54 = vmul.f32 0.5, %v3557_v45  ;;  %v7502_v41 = vpop.eup %5792 }
 0x306   : > { %v2898_v5 = vadd.f32 %v2897_v32, %v2849_v25  ;;  %v2998_v9 = vpop.f32.mrf.mxu1  ;;  %5798 = vtanh.f32 %v3755_v42  ;;  %v2950_v2 = vadd.f32 %v2949_v61, %v7394_v50  ;;  %v3695_v38 = vunpack.c.h.bf16 %v3393_v43 }
 0x307   : > { %v3510_v56 = vadd.f32 1.0, %v3478_v15  ;;  %v3511_v1 = vadd.f32 1.0, %v3479_v60  ;;  %5800 = vtanh.f32 %v3756_v36  ;;  %v3620_v42 = vpack.c.bf16 %v3589_v54, %v3588_v49 }
 0x308   : > { %v3039_v23 = vpack.c.bf16 %v2996_v19, %v2898_v5  ;;  %5802 = vtanh.f32 %v3757_v33  ;;  %v3347_v20 = vunpack.c.h.bf16 %v3074_v37  ;;  %v3865_v44 = vunpack.c.h.bf16 %v7496_v22 }
 0x309   : > { %v5795_v11 = vpop.eup %5794  ;;  %v3541_v51 = vpack.c.bf16 %v3511_v1, %v3510_v56  ;;  %v3726_v14 = vmul.f32 %v3694_v17, %v3662_v62  ;;  %v2999_v25 = vadd.f32 %v2998_v9, %v2950_v2  ;;  %v3828_v33 = vunpack.c.l.bf16 %v3620_v42 }
 0x30a   : > { %v5797_v18 = vpop.eup %5796  ;;  %v3402_v29 = vunpack.c.l.bf16 %v3039_v23  ;;  %v3403_v26 = vunpack.c.h.bf16 %v3039_v23  ;;  %v2851_v31 = vpop.f32.mrf.mxu2  ;;  %v3829_v49 = vunpack.c.h.bf16 %v3620_v42  ;;  %v3727_v5 = vmul.f32 %v3695_v38, %v3663_v40 }
 0x30b   : > { %v3558_v34 = vunpack.c.l.bf16 %v3541_v51  ;;  %v3559_v10 = vunpack.c.h.bf16 %v3541_v51  ;;  %v3462_v7 = vpack.c.bf16 %v5797_v18, %v5795_v11  ;;  %v2852_v0 = vadd.f32 %v2851_v31, %v7413_v16 }
 0x30c   : > { %5804 = vtanh.f32 %v3402_v29  ;;  %v2900_v8 = vpop.f32.mrf.mxu3  ;;  %v5799_v45 = vpop.eup %5798  ;;  %v3758_v62 = vunpack.c.l.bf16 %v7452_v3  ;;  %v3759_v11 = vunpack.c.h.bf16 %v7452_v3  ;;  %v3892_v18 = vmul.f32 %v3860_v55, %v3828_v33 }
 0x30d   : > { %v2951_v6 = vpop.f32.mrf.mxu0  ;;  %5806 = vtanh.f32 %v3403_v26  ;;  %v2901_v32 = vadd.f32 %v2900_v8, %v2852_v0  ;;  %v5801_v61 = vpop.eup %5800  ;;  %v3590_v15 = vmul.f32 0.5, %v3558_v34  ;;  %v3591_v60 = vmul.f32 0.5, %v3559_v10 }
 0x30e   : > { %v3000_v36 = vpop.f32.mrf.mxu1  ;;  %v5803_v43 = vpop.eup %5802  ;;  %5808 = vtanh.f32 %v3346_v52  ;;  %v3480_v37 = vunpack.c.l.bf16 %v3462_v7  ;;  %v3481_v54 = vunpack.c.h.bf16 %v3462_v7  ;;  %v2952_v23 = vadd.f32 %v2951_v6, %v7394_v50 }
 0x30f   : > { %v3042_v19 = vpack.c.bf16 %v2999_v25, %v2901_v32  ;;  %5810 = vtanh.f32 %v3347_v20  ;;  %v3621_v56 = vpack.c.bf16 %v3591_v60, %v3590_v15  ;;  %v3893_v12 = vmul.f32 %v3861_v63, %v3829_v49 }
 0x310   : > { %v3512_v29 = vadd.f32 1.0, %v3480_v37  ;;  %v3513_v26 = vadd.f32 1.0, %v3481_v54  ;;  %v3001_v0 = vadd.f32 %v3000_v36, %v2952_v23  ;;  %v7527_v63 = vpack.c.bf16 %v5799_v45, %v7502_v41 }
 0x311   : > { %v3404_v9 = vunpack.c.l.bf16 %v3042_v19  ;;  %v3405_v1 = vunpack.c.h.bf16 %v3042_v19  ;;  %v3830_v2 = vunpack.c.l.bf16 %v3621_v56  ;;  %v3831_v52 = vunpack.c.h.bf16 %v3621_v56 }
 0x312   : > { %v5805_v17 = vpop.eup %5804  ;;  %v2853_v51 = vpop.f32.mrf.mxu2  ;;  %v7529_v15 = vpack.c.bf16 %v3727_v5, %v3726_v14  ;;  %v7532_v41 = vpack.c.bf16 %v5803_v43, %v5801_v61  ;;  %v3866_v56 = vunpack.c.l.bf16 %v7527_v63 }
 0x313   : > { %v5807_v40 = vpop.eup %5806  ;;  %5812 = vtanh.f32 %v3404_v9  ;;  %v2854_v31 = vadd.f32 %v2853_v51, %v7413_v16  ;;  %v3894_v10 = vmul.f32 %v3862_v27, %v3830_v2  ;;  %v3895_v55 = vmul.f32 %v3863_v28, %v3831_v52 }
 0x314   : > { %v3463_v42 = vpack.c.bf16 %v5807_v40, %v5805_v17  ;;  %5814 = vtanh.f32 %v3405_v1  ;;  %v2902_v34 = vpop.f32.mrf.mxu3  ;;  %v5809_v7 = vpop.eup %5808  ;;  %v3542_v27 = vpack.c.bf16 %v3513_v26, %v3512_v29  ;;  %v3760_v9 = vunpack.c.l.bf16 %v7207_v53 }
 0x315   : > { %v2954_v3 = vpop.f32.mrf.mxu0  ;;  %v2903_v35 = vadd.f32 %v2902_v34, %v2854_v31  ;;  %5816 = vtanh.f32 %v3758_v62  ;;  %v5811_v38 = vpop.eup %5810  ;;  %v3924_v25 = vpack.c.bf16 %v3894_v10, %v3892_v18  ;;  %v3925_v32 = vpack.c.bf16 %v3895_v55, %v3893_v12 }
 0x316   : > { %v3482_v20 = vunpack.c.l.bf16 %v3463_v42  ;;  %v3483_v8 = vunpack.c.h.bf16 %v3463_v42  ;;  %v3003_v6 = vpop.f32.mrf.mxu1  ;;  %5818 = vtanh.f32 %v3759_v11  ;;  %v2955_v36 = vadd.f32 %v2954_v3, %v7394_v50 }
 0x317   : > { %v3045_v60 = vpack.c.bf16 %v3001_v0, %v2903_v35  ;;  %4146 = vmatmul.bf16.vlgmr.msrb.gmra.mxu2 %v3924_v25  ;;  %4195 = vmatmul.bf16.vlgmr.msrb.gmra.mxu3 %v3925_v32  ;;  %v3560_v37 = vunpack.c.l.bf16 %v3542_v27  ;;  %v3561_v54 = vunpack.c.h.bf16 %v3542_v27  ;;  %v3867_v62 = vunpack.c.h.bf16 %v7527_v63 }
 0x318   : > { %v3514_v46 = vadd.f32 1.0, %v3482_v20  ;;  %v3515_v28 = vadd.f32 1.0, %v3483_v8  ;;  %4244 = vmatmul.bf16.vlgmr.msrb.gmra.mxu0 %v3924_v25  ;;  %4293 = vmatmul.bf16.vlgmr.msrb.gmra.mxu1 %v3925_v32  ;;  %v3004_v40 = vadd.f32 %v3003_v6, %v2955_v36  ;;  %v3868_v26 = vunpack.c.l.bf16 %v7532_v41 }
 0x319   : > { %v5813_v45 = vpop.eup %5812  ;;  %v3406_v33 = vunpack.c.l.bf16 %v3045_v60  ;;  %v3407_v49 = vunpack.c.h.bf16 %v3045_v60  ;;  %v3592_v43 = vmul.f32 0.5, %v3560_v37  ;;  %v3593_v18 = vmul.f32 0.5, %v3561_v54 }
 0x31a   : > { %v5815_v14 = vpop.eup %5814  ;;  %v2856_v19 = vpop.f32.mrf.mxu2  ;;  %v3543_v5 = vpack.c.bf16 %v3515_v28, %v3514_v46  ;;  %v7539_v55 = vpack.c.bf16 %v5811_v38, %v5809_v7  ;;  %v3869_v35 = vunpack.c.h.bf16 %v7532_v41  ;;  %v3761_v63 = vunpack.c.h.bf16 %v7207_v53 }
 0x31b   : > { %v5817_v1 = vpop.eup %5816  ;;  %v3464_v23 = vpack.c.bf16 %v5815_v14, %v5813_v45  ;;  %5820 = vtanh.f32 %v3406_v33  ;;  %v2857_v61 = vadd.f32 %v2856_v19, %v7413_v16  ;;  %v3622_v10 = vpack.c.bf16 %v3593_v18, %v3592_v43 }
 0x31c   : > { %5822 = vtanh.f32 %v3407_v49  ;;  %v2905_v11 = vpop.f32.mrf.mxu3  ;;  %v3562_v51 = vunpack.c.l.bf16 %v3543_v5  ;;  %v3563_v2 = vunpack.c.h.bf16 %v3543_v5  ;;  %v5819_v52 = vpop.eup %5818  ;;  %v3699_v22 = vunpack.c.h.bf16 %v7539_v55 }
 0x31d   : > { %v2956_v17 = vpop.f32.mrf.mxu0  ;;  %v3484_v12 = vunpack.c.l.bf16 %v3464_v23  ;;  %v2906_v29 = vadd.f32 %v2905_v11, %v2857_v61  ;;  %v3485_v31 = vunpack.c.h.bf16 %v3464_v23  ;;  %v3832_v8 = vunpack.c.l.bf16 %v3622_v10 }
 0x31e   : > { %v3005_v42 = vpop.f32.mrf.mxu1  ;;  %v3594_v34 = vmul.f32 0.5, %v3562_v51  ;;  %v3595_v3 = vmul.f32 0.5, %v3563_v2  ;;  %v3833_v25 = vunpack.c.h.bf16 %v3622_v10  ;;  %5824 = vtanh.f32 %v3760_v9 }
 0x31f   : > { %v3048_v0 = vpack.c.bf16 %v3004_v40, %v2906_v29  ;;  %v2957_v27 = vadd.f32 %v2956_v17, %v7394_v50  ;;  %v7544_v46 = vpack.c.bf16 %v5819_v52, %v5817_v1  ;;  %v3516_v36 = vadd.f32 1.0, %v3484_v12 }
 0x320   : > { %v3623_v20 = vpack.c.bf16 %v3595_v3, %v3594_v34  ;;  %v3517_v7 = vadd.f32 1.0, %v3485_v31  ;;  %v3896_v37 = vmul.f32 %v3864_v4, %v3832_v8  ;;  %v3897_v19 = vmul.f32 %v3865_v44, %v3833_v25 }
 0x321   : > { %v5821_v6 = vpop.eup %5820  ;;  %v3408_v32 = vunpack.c.l.bf16 %v3048_v0  ;;  %v3409_v60 = vunpack.c.h.bf16 %v3048_v0  ;;  %v3006_v23 = vadd.f32 %v3005_v42, %v2957_v27  ;;  %v3698_v17 = vunpack.c.l.bf16 %v7539_v55 }
 0x322   : > { %v5823_v28 = vpop.eup %5822  ;;  %v2858_v38 = vpop.f32.mrf.mxu2  ;;  %v3834_v45 = vunpack.c.l.bf16 %v3623_v20  ;;  %v3835_v33 = vunpack.c.h.bf16 %v3623_v20  ;;  %v3762_v40 = vunpack.c.l.bf16 %v7464_v24  ;;  %v3871_v20 = vunpack.c.h.bf16 %v7544_v46 }
 0x323   : > { %v3465_v49 = vpack.c.bf16 %v5823_v28, %v5821_v6  ;;  %5826 = vtanh.f32 %v3408_v32  ;;  %v2859_v53 = vadd.f32 %v2858_v38, %v7413_v16  ;;  %v3763_v8 = vunpack.c.h.bf16 %v7464_v24 }
 0x324   : > { %5828 = vtanh.f32 %v3409_v60  ;;  %v2907_v54 = vpop.f32.mrf.mxu3  ;;  %v3898_v14 = vmul.f32 %v3866_v56, %v3834_v45  ;;  %v3899_v5 = vmul.f32 %v3867_v62, %v3835_v33  ;;  %v5825_v11 = vpop.eup %5824  ;;  %v3544_v56 = vpack.c.bf16 %v3517_v7, %v3516_v36 }
 0x325   : > { %v3486_v9 = vunpack.c.l.bf16 %v3465_v49  ;;  %v3487_v1 = vunpack.c.h.bf16 %v3465_v49  ;;  %v2908_v61 = vadd.f32 %v2907_v54, %v2859_v53  ;;  %v2959_v43 = vpop.f32.mrf.mxu0  ;;  %5830 = vtanh.f32 %v3761_v63 }
 0x326   : > { %v3008_v51 = vpop.f32.mrf.mxu1  ;;  %v3926_v2 = vpack.c.bf16 %v3898_v14, %v3896_v37  ;;  %v3927_v18 = vpack.c.bf16 %v3899_v5, %v3897_v19  ;;  %v2960_v44 = vadd.f32 %v2959_v43, %v7394_v50  ;;  %v3870_v62 = vunpack.c.l.bf16 %v7544_v46 }
 0x327   : > { %v3518_v4 = vadd.f32 1.0, %v3486_v9  ;;  %v3519_v52 = vadd.f32 1.0, %v3487_v1  ;;  %v3051_v12 = vpack.c.bf16 %v3006_v23, %v2908_v61  ;;  %v3564_v3 = vunpack.c.l.bf16 %v3544_v56 }
 0x328   : > { %4151 = vmatmul.bf16.gmra.mxu2 %v3926_v2  ;;  %4200 = vmatmul.bf16.gmra.mxu3 %v3927_v18  ;;  %v3565_v63 = vunpack.c.h.bf16 %v3544_v56  ;;  %v3764_v25 = vunpack.c.l.bf16 %v7257_v47  ;;  %v3009_v45 = vadd.f32 %v3008_v51, %v2960_v44  ;;  %v3765_v9 = vunpack.c.h.bf16 %v7257_v47 }
 0x329   : > { %v5827_v29 = vpop.eup %5826  ;;  %v3410_v31 = vunpack.c.l.bf16 %v3051_v12  ;;  %v3411_v42 = vunpack.c.h.bf16 %v3051_v12  ;;  %4249 = vmatmul.bf16.gmra.mxu0 %v3926_v2  ;;  %4298 = vmatmul.bf16.gmra.mxu1 %v3927_v18  ;;  %v3545_v34 = vpack.c.bf16 %v3519_v52, %v3518_v4  ;;  %v3596_v7 = vmul.f32 0.5, %v3564_v3 }
 0x32a   : > { %v5829_v10 = vpop.eup %5828  ;;  %v2861_v0 = vpop.f32.mrf.mxu2  ;;  %v3597_v38 = vmul.f32 0.5, %v3565_v63  ;;  %v3766_v4 = vunpack.c.l.bf16 %v7473_v21  ;;  %v7575_v41 = vmul.f32 %v3698_v17, %v3666_v39 }
 0x32b   : > { %v3466_v6 = vpack.c.bf16 %v5829_v10, %v5827_v29  ;;  %5832 = vtanh.f32 %v3410_v31  ;;  %v2862_v32 = vadd.f32 %v2861_v0, %v7413_v16  ;;  %v3566_v60 = vunpack.c.l.bf16 %v3545_v34  ;;  %v5831_v27 = vpop.eup %5830 }
 0x32c   : > { %5834 = vtanh.f32 %v3411_v42  ;;  %v2910_v28 = vpop.f32.mrf.mxu3  ;;  %v3567_v36 = vunpack.c.h.bf16 %v3545_v34  ;;  %v3624_v14 = vpack.c.bf16 %v3597_v38, %v3596_v7  ;;  %v7560_v5 = vpack.c.bf16 %v5831_v27, %v5825_v11 }
 0x32d   : > { %v2911_v33 = vadd.f32 %v2910_v28, %v2862_v32  ;;  %v2961_v49 = vpop.f32.mrf.mxu0  ;;  %v3598_v53 = vmul.f32 0.5, %v3566_v60  ;;  %5836 = vtanh.f32 %v3762_v40  ;;  %v3488_v46 = vunpack.c.l.bf16 %v3466_v6 }
 0x32e   : > { %v3489_v24 = vunpack.c.h.bf16 %v3466_v6  ;;  %v3010_v37 = vpop.f32.mrf.mxu1  ;;  %v3599_v54 = vmul.f32 0.5, %v3567_v36  ;;  %5838 = vtanh.f32 %v3763_v8  ;;  %v3836_v23 = vunpack.c.l.bf16 %v3624_v14 }
 0x32f   : > { %v3054_v19 = vpack.c.bf16 %v3009_v45, %v2911_v33  ;;  %v3837_v61 = vunpack.c.h.bf16 %v3624_v14  ;;  %5840 = vtanh.f32 %v3764_v25  ;;  %v2962_v18 = vadd.f32 %v2961_v49, %v7394_v50 }
 0x330   : > { %v3625_v1 = vpack.c.bf16 %v3599_v54, %v3598_v53  ;;  %v3520_v12 = vadd.f32 1.0, %v3488_v46  ;;  %v3521_v56 = vadd.f32 1.0, %v3489_v24  ;;  %v3900_v42 = vmul.f32 %v3868_v26, %v3836_v23 }
 0x331   : > { %v5833_v43 = vpop.eup %5832  ;;  %v3412_v51 = vunpack.c.l.bf16 %v3054_v19  ;;  %v3413_v2 = vunpack.c.h.bf16 %v3054_v19  ;;  %v3901_v10 = vmul.f32 %v3869_v35, %v3837_v61  ;;  %v3011_v6 = vadd.f32 %v3010_v37, %v2962_v18 }
 0x332   : > { %v5835_v52 = vpop.eup %5834  ;;  %v2863_v44 = vpop.f32.mrf.mxu2  ;;  %v3838_v40 = vunpack.c.l.bf16 %v3625_v1  ;;  %v3839_v11 = vunpack.c.h.bf16 %v3625_v1  ;;  %v3767_v38 = vunpack.c.h.bf16 %v7473_v21  ;;  %v3546_v33 = vpack.c.bf16 %v3521_v56, %v3520_v12 }
 0x333   : > { %v5837_v29 = vpop.eup %5836  ;;  %v3467_v31 = vpack.c.bf16 %v5835_v52, %v5833_v43  ;;  %5842 = vtanh.f32 %v3412_v51  ;;  %v2864_v47 = vadd.f32 %v2863_v44, %v7413_v16  ;;  %v3873_v39 = vunpack.c.h.bf16 %v7560_v5 }
 0x334   : > { %5844 = vtanh.f32 %v3413_v2  ;;  %v2912_v34 = vpop.f32.mrf.mxu3  ;;  %v3902_v3 = vmul.f32 %v3870_v62, %v3838_v40  ;;  %v3903_v0 = vmul.f32 %v3871_v20, %v3839_v11  ;;  %v5839_v63 = vpop.eup %5838  ;;  %v3872_v20 = vunpack.c.l.bf16 %v7560_v5 }
 0x335   : > { %v3490_v8 = vunpack.c.l.bf16 %v3467_v31  ;;  %v3491_v25 = vunpack.c.h.bf16 %v3467_v31  ;;  %v2913_v32 = vadd.f32 %v2912_v34, %v2864_v47  ;;  %v2964_v60 = vpop.f32.mrf.mxu0  ;;  %v5841_v27 = vpop.eup %5840  ;;  %5846 = vtanh.f32 %v3765_v9 }
 0x336   : > { %v3013_v28 = vpop.f32.mrf.mxu1  ;;  %v3928_v36 = vpack.c.bf16 %v3902_v3, %v3900_v42  ;;  %v3929_v7 = vpack.c.bf16 %v3903_v0, %v3901_v10  ;;  %v2965_v35 = vadd.f32 %v2964_v60, %v7394_v50  ;;  %5848 = vtanh.f32 %v3766_v4 }
 0x337   : > { %v3522_v26 = vadd.f32 1.0, %v3490_v8  ;;  %v3523_v45 = vadd.f32 1.0, %v3491_v25  ;;  %v3057_v62 = vpack.c.bf16 %v3011_v6, %v2913_v32  ;;  %v3568_v24 = vunpack.c.l.bf16 %v3546_v33 }
 0x338   : > { %4156 = vmatmul.bf16.gmra.mxu2 %v3928_v36  ;;  %4205 = vmatmul.bf16.gmra.mxu3 %v3929_v7  ;;  %v3569_v14 = vunpack.c.h.bf16 %v3546_v33  ;;  %v3819_v19 = vpack.c.bf16 %v5839_v63, %v5837_v29  ;;  %5850 = vtanh.f32 %v3767_v38  ;;  %v3014_v18 = vadd.f32 %v3013_v28, %v2965_v35 }
 0x339   : > { %v5843_v49 = vpop.eup %5842  ;;  %v3414_v21 = vunpack.c.l.bf16 %v3057_v62  ;;  %v3415_v53 = vunpack.c.h.bf16 %v3057_v62  ;;  %4254 = vmatmul.bf16.gmra.mxu0 %v3928_v36  ;;  %4303 = vmatmul.bf16.gmra.mxu1 %v3929_v7  ;;  %v3547_v46 = vpack.c.bf16 %v3523_v45, %v3522_v26  ;;  %v3600_v51 = vmul.f32 0.5, %v3568_v24 }
 0x33a   : > { %v5845_v37 = vpop.eup %5844  ;;  %v2866_v54 = vpop.f32.mrf.mxu2  ;;  %v3601_v2 = vmul.f32 0.5, %v3569_v14  ;;  %v3768_v56 = vunpack.c.l.bf16 %v7311_v13  ;;  %v3874_v42 = vunpack.c.l.bf16 %v3819_v19  ;;  %v3875_v34 = vunpack.c.h.bf16 %v3819_v19 }
 0x33b   : > { %v3468_v17 = vpack.c.bf16 %v5845_v37, %v5843_v49  ;;  %5852 = vtanh.f32 %v3414_v21  ;;  %v2867_v9 = vadd.f32 %v2866_v54, %v7413_v16  ;;  %v3570_v1 = vunpack.c.l.bf16 %v3547_v46  ;;  %v5847_v23 = vpop.eup %5846 }
 0x33c   : > { %5854 = vtanh.f32 %v3415_v53  ;;  %v2915_v61 = vpop.f32.mrf.mxu3  ;;  %v3571_v43 = vunpack.c.h.bf16 %v3547_v46  ;;  %v5849_v44 = vpop.eup %5848  ;;  %v3626_v31 = vpack.c.bf16 %v3601_v2, %v3600_v51  ;;  %v7582_v3 = vpack.c.bf16 %v5847_v23, %v5841_v27 }
 0x33d   : > { %v2916_v4 = vadd.f32 %v2915_v61, %v2867_v9  ;;  %v2966_v52 = vpop.f32.mrf.mxu0  ;;  %v3602_v12 = vmul.f32 0.5, %v3570_v1  ;;  %v3492_v5 = vunpack.c.l.bf16 %v3468_v17  ;;  %v3493_v40 = vunpack.c.h.bf16 %v3468_v17 }
 0x33e   : > { %v3015_v11 = vpop.f32.mrf.mxu1  ;;  %v3603_v29 = vmul.f32 0.5, %v3571_v43  ;;  %v5851_v10 = vpop.eup %5850  ;;  %v3840_v63 = vunpack.c.l.bf16 %v3626_v31  ;;  %v3841_v8 = vunpack.c.h.bf16 %v3626_v31  ;;  %v3769_v25 = vunpack.c.h.bf16 %v7311_v13 }
 0x33f   : > { %v3060_v47 = vpack.c.bf16 %v3014_v18, %v2916_v4  ;;  %v2967_v28 = vadd.f32 %v2966_v52, %v7394_v50  ;;  %5856 = vtanh.f32 %v3768_v56  ;;  %v3524_v7 = vadd.f32 1.0, %v3492_v5 }
 0x340   : > { %v3627_v0 = vpack.c.bf16 %v3603_v29, %v3602_v12  ;;  %v3525_v38 = vadd.f32 1.0, %v3493_v40  ;;  %v3904_v35 = vmul.f32 %v3872_v20, %v3840_v63  ;;  %v3905_v21 = vmul.f32 %v3873_v39, %v3841_v8 }
 0x341   : > { %v5853_v6 = vpop.eup %5852  ;;  %v3416_v32 = vunpack.c.l.bf16 %v3060_v47  ;;  %v3417_v60 = vunpack.c.h.bf16 %v3060_v47  ;;  %v3016_v37 = vadd.f32 %v3015_v11, %v2967_v28  ;;  %v7587_v1 = vpack.c.bf16 %v5851_v10, %v5849_v44 }
 0x342   : > { %v5855_v36 = vpop.eup %5854  ;;  %v2868_v26 = vpop.f32.mrf.mxu2  ;;  %v3842_v45 = vunpack.c.l.bf16 %v3627_v0  ;;  %v3843_v62 = vunpack.c.h.bf16 %v3627_v0  ;;  %v3548_v51 = vpack.c.bf16 %v3525_v38, %v3524_v7  ;;  %v7593_v39 = vmul.f32 %v3699_v22, %v3667_v59 }
 0x343   : > { %v3469_v27 = vpack.c.bf16 %v5855_v36, %v5853_v6  ;;  %5858 = vtanh.f32 %v3416_v32  ;;  %v2869_v33 = vadd.f32 %v2868_v26, %v7413_v16  ;;  %v3876_v18 = vunpack.c.l.bf16 %v7582_v3 }
 0x344   : > { %5860 = vtanh.f32 %v3417_v60  ;;  %v2917_v49 = vpop.f32.mrf.mxu3  ;;  %v3906_v13 = vmul.f32 %v3874_v42, %v3842_v45  ;;  %v3907_v53 = vmul.f32 %v3875_v34, %v3843_v62  ;;  %v3770_v4 = vunpack.c.l.bf16 %v7504_v57 }
 0x345   : > { %v3494_v46 = vunpack.c.l.bf16 %v3469_v27  ;;  %v3495_v24 = vunpack.c.h.bf16 %v3469_v27  ;;  %v2918_v54 = vadd.f32 %v2917_v49, %v2869_v33  ;;  %v2969_v14 = vpop.f32.mrf.mxu0  ;;  %5862 = vtanh.f32 %v3769_v25  ;;  %v5857_v23 = vpop.eup %5856 }
 0x346   : > { %v3018_v19 = vpop.f32.mrf.mxu1  ;;  %v3930_v17 = vpack.c.bf16 %v3906_v13, %v3904_v35  ;;  %v3931_v9 = vpack.c.bf16 %v3907_v53, %v3905_v21  ;;  %v2970_v2 = vadd.f32 %v2969_v14, %v7394_v50  ;;  %v3572_v5 = vunpack.c.l.bf16 %v3548_v51 }
 0x347   : > { %v3526_v61 = vadd.f32 1.0, %v3494_v46  ;;  %v3527_v43 = vadd.f32 1.0, %v3495_v24  ;;  %v3063_v20 = vpack.c.bf16 %v3016_v37, %v2918_v54  ;;  %v3573_v55 = vunpack.c.h.bf16 %v3548_v51 }
 0x348   : > { %4161 = vmatmul.bf16.gmra.mxu2 %v3930_v17  ;;  %4210 = vmatmul.bf16.gmra.mxu3 %v3931_v9  ;;  %v3878_v59 = vunpack.c.l.bf16 %v7587_v1  ;;  %v3877_v22 = vunpack.c.h.bf16 %v7582_v3  ;;  %v3771_v11 = vunpack.c.h.bf16 %v7504_v57  ;;  %v3604_v0 = vmul.f32 0.5, %v3572_v5 }
 0x349   : > { %v5859_v52 = vpop.eup %5858  ;;  %v3418_v12 = vunpack.c.l.bf16 %v3063_v20  ;;  %v3419_v56 = vunpack.c.h.bf16 %v3063_v20  ;;  %4259 = vmatmul.bf16.gmra.mxu0 %v3930_v17  ;;  %4308 = vmatmul.bf16.gmra.mxu1 %v3931_v9  ;;  %v3549_v44 = vpack.c.bf16 %v3527_v43, %v3526_v61  ;;  %v3605_v63 = vmul.f32 0.5, %v3573_v55 }
 0x34a   : > { %v5861_v30 = vpop.eup %5860  ;;  %v2871_v40 = vpop.f32.mrf.mxu2  ;;  %v3019_v8 = vadd.f32 %v3018_v19, %v2970_v2  ;;  %v3879_v38 = vunpack.c.h.bf16 %v7587_v1  ;;  %v3772_v33 = vunpack.c.l.bf16 %v7371_v58  ;;  %v3773_v53 = vunpack.c.h.bf16 %v7371_v58 }
 0x34b   : > { %v3470_v29 = vpack.c.bf16 %v5861_v30, %v5859_v52  ;;  %5864 = vtanh.f32 %v3418_v12  ;;  %v2872_v31 = vadd.f32 %v2871_v40, %v7413_v16  ;;  %v3574_v47 = vunpack.c.l.bf16 %v3549_v44  ;;  %v5863_v42 = vpop.eup %5862 }
 0x34c   : > { %5866 = vtanh.f32 %v3419_v56  ;;  %v2920_v34 = vpop.f32.mrf.mxu3  ;;  %v3575_v10 = vunpack.c.h.bf16 %v3549_v44  ;;  %v3628_v57 = vpack.c.bf16 %v3605_v63, %v3604_v0  ;;  %v7603_v26 = vpack.c.bf16 %v5863_v42, %v5857_v23 }
 0x34d   : > { %v2921_v25 = vadd.f32 %v2920_v34, %v2872_v31  ;;  %v2971_v6 = vpop.f32.mrf.mxu0  ;;  %v3606_v32 = vmul.f32 0.5, %v3574_v47  ;;  %5868 = vtanh.f32 %v3770_v4  ;;  %v3496_v60 = vunpack.c.l.bf16 %v3470_v29 }
 0x34e   : > { %v3497_v3 = vunpack.c.h.bf16 %v3470_v29  ;;  %v3607_v28 = vmul.f32 0.5, %v3575_v10  ;;  %v3020_v7 = vpop.f32.mrf.mxu1  ;;  %5870 = vtanh.f32 %v3771_v11  ;;  %v3844_v62 = vunpack.c.l.bf16 %v3628_v57 }
 0x34f   : > { %v3066_v36 = vpack.c.bf16 %v3019_v8, %v2921_v25  ;;  %v3845_v27 = vunpack.c.h.bf16 %v3628_v57  ;;  %v2972_v21 = vadd.f32 %v2971_v6, %v7394_v50  ;;  %v3528_v24 = vadd.f32 1.0, %v3496_v60 }
 0x350   : > { %v3629_v45 = vpack.c.bf16 %v3607_v28, %v3606_v32  ;;  %v3529_v37 = vadd.f32 1.0, %v3497_v3  ;;  %v3908_v23 = vmul.f32 %v3876_v18, %v3844_v62  ;;  %v3881_v29 = vunpack.c.h.bf16 %v7603_v26 }
 0x351   : > { %v5865_v35 = vpop.eup %5864  ;;  %v3420_v49 = vunpack.c.l.bf16 %v3066_v36  ;;  %v3421_v13 = vunpack.c.h.bf16 %v3066_v36  ;;  %v3909_v20 = vmul.f32 %v3877_v22, %v3845_v27  ;;  %v3021_v52 = vadd.f32 %v3020_v7, %v2972_v21 }
 0x352   : > { %v5867_v46 = vpop.eup %5866  ;;  %v2873_v54 = vpop.f32.mrf.mxu2  ;;  %v3846_v14 = vunpack.c.l.bf16 %v3629_v45  ;;  %v3847_v19 = vunpack.c.h.bf16 %v3629_v45  ;;  %v3550_v18 = vpack.c.bf16 %v3529_v37, %v3528_v24  ;;  %v3880_v22 = vunpack.c.l.bf16 %v7603_v26 }
 0x353   : > { %v5869_v17 = vpop.eup %5868  ;;  %v3471_v9 = vpack.c.bf16 %v5867_v46, %v5865_v35  ;;  %5872 = vtanh.f32 %v3420_v49  ;;  %v2874_v1 = vadd.f32 %v2873_v54, %v7413_v16  ;;  %v3774_v32 = vunpack.c.l.bf16 %v7529_v15 }
 0x354   : > { %5874 = vtanh.f32 %v3421_v13  ;;  %v2922_v61 = vpop.f32.mrf.mxu3  ;;  %v3910_v43 = vmul.f32 %v3878_v59, %v3846_v14  ;;  %v3911_v51 = vmul.f32 %v3879_v38, %v3847_v19  ;;  %v5871_v2 = vpop.eup %5870  ;;  %v3576_v0 = vunpack.c.l.bf16 %v3550_v18 }
 0x355   : > { %v3498_v4 = vunpack.c.l.bf16 %v3471_v9  ;;  %v3499_v58 = vunpack.c.h.bf16 %v3471_v9  ;;  %v2923_v12 = vadd.f32 %v2922_v61, %v2874_v1  ;;  %v2974_v56 = vpop.f32.mrf.mxu0  ;;  %5876 = vtanh.f32 %v3772_v33 }
 0x356   : > { %v2975_v44 = vadd.f32 %v2974_v56, %v7394_v50  ;;  %v3932_v5 = vpack.c.bf16 %v3910_v43, %v3908_v23  ;;  %v3933_v30 = vpack.c.bf16 %v3911_v51, %v3909_v20  ;;  %v7610_v59 = vpack.c.bf16 %v5871_v2, %v5869_v17  ;;  %v3023_v34 = vpop.f32.mrf.mxu1 }
 0x357   : > { %v3530_v40 = vadd.f32 1.0, %v3498_v4  ;;  %v3531_v55 = vadd.f32 1.0, %v3499_v58  ;;  %v3069_v11 = vpack.c.bf16 %v3021_v52, %v2923_v12  ;;  %5878 = vtanh.f32 %v3773_v53 }
 0x358   : > { %4166 = vmatmul.bf16.gmra.mxu2 %v3932_v5  ;;  %4215 = vmatmul.bf16.gmra.mxu3 %v3933_v30  ;;  %v3024_v8 = vadd.f32 %v3023_v34, %v2975_v44  ;;  %v3577_v6 = vunpack.c.h.bf16 %v3550_v18  ;;  %v3775_v60 = vunpack.c.h.bf16 %v7529_v15  ;;  %v3608_v26 = vmul.f32 0.5, %v3576_v0 }
 0x359   : > { %v5873_v31 = vpop.eup %5872  ;;  %v3422_v47 = vunpack.c.l.bf16 %v3069_v11  ;;  %v3423_v42 = vunpack.c.h.bf16 %v3069_v11  ;;  %4264 = vmatmul.bf16.gmra.mxu0 %v3932_v5  ;;  %4313 = vmatmul.bf16.gmra.mxu1 %v3933_v30  ;;  %v3551_v10 = vpack.c.bf16 %v3531_v55, %v3530_v40  ;;  %v3882_v53 = vunpack.c.l.bf16 %v7610_v59 }
 0x35a   : > { %v5875_v63 = vpop.eup %5874  ;;  %v2876_v25 = vpop.f32.mrf.mxu2  ;;  %v3609_v45 = vmul.f32 0.5, %v3577_v6  ;;  %v3883_v46 = vunpack.c.h.bf16 %v7610_v59 }
 0x35b   : > { %v3472_v3 = vpack.c.bf16 %v5875_v63, %v5873_v31  ;;  %5880 = vtanh.f32 %v3422_v47  ;;  %v2877_v28 = vadd.f32 %v2876_v25, %v7413_v16  ;;  %v3578_v57 = vunpack.c.l.bf16 %v3551_v10  ;;  %v7617_v36 = vpop.eup %5876 }
 0x35c   : > { %5882 = vtanh.f32 %v3423_v42  ;;  %v2925_v7 = vpop.f32.mrf.mxu3  ;;  %v3579_v38 = vunpack.c.h.bf16 %v3551_v10  ;;  %v3630_v15 = vpack.c.bf16 %v3609_v45, %v3608_v26 }
 0x35d   : > { %v3500_v62 = vunpack.c.l.bf16 %v3472_v3  ;;  %v3501_v27 = vunpack.c.h.bf16 %v3472_v3  ;;  %v2926_v33 = vadd.f32 %v2925_v7, %v2877_v28  ;;  %v3610_v35 = vmul.f32 0.5, %v3578_v57  ;;  %v5879_v49 = vpop.eup %5878  ;;  %v2976_v13 = vpop.f32.mrf.mxu0 }
 0x35e   : > { %v3611_v21 = vmul.f32 0.5, %v3579_v38  ;;  %5884 = vtanh.f32 %v3774_v32  ;;  %v3848_v19 = vunpack.c.l.bf16 %v3630_v15  ;;  %v3849_v17 = vunpack.c.h.bf16 %v3630_v15  ;;  %v3025_v5 = vpop.f32.mrf.mxu1 }
 0x35f   : > { %v3532_v24 = vadd.f32 1.0, %v3500_v62  ;;  %v3533_v37 = vadd.f32 1.0, %v3501_v27  ;;  %v3072_v54 = vpack.c.bf16 %v3024_v8, %v2926_v33  ;;  %5886 = vtanh.f32 %v3775_v60 }
 0x360   : > { %v3631_v14 = vpack.c.bf16 %v3611_v21, %v3610_v35  ;;  %v2977_v61 = vadd.f32 %v2976_v13, %v7394_v50  ;;  %v3912_v4 = vmul.f32 %v3880_v22, %v3848_v19  ;;  %v3913_v52 = vmul.f32 %v3881_v29, %v3849_v17 }
 0x361   : > { %v5881_v9 = vpop.eup %5880  ;;  %v3424_v1 = vunpack.c.l.bf16 %v3072_v54  ;;  %v3425_v23 = vunpack.c.h.bf16 %v3072_v54  ;;  %v3552_v43 = vpack.c.bf16 %v3533_v37, %v3532_v24  ;;  %v3747_v8 = vpack.c.bf16 %v7593_v39, %v7575_v41 }
 0x362   : > { %v5883_v20 = vpop.eup %5882  ;;  %v2878_v51 = vpop.f32.mrf.mxu2  ;;  %v3850_v2 = vunpack.c.l.bf16 %v3631_v14  ;;  %v3851_v58 = vunpack.c.h.bf16 %v3631_v14  ;;  %v3026_v31 = vadd.f32 %v3025_v5, %v2977_v61  ;;  %v3824_v57 = vpack.c.bf16 %v5879_v49, %v7617_v36 }
 0x363   : > { %v3473_v12 = vpack.c.bf16 %v5883_v20, %v5881_v9  ;;  %5888 = vtanh.f32 %v3424_v1  ;;  %v2879_v56 = vadd.f32 %v2878_v51, %v7413_v16  ;;  %v3580_v44 = vunpack.c.l.bf16 %v3552_v43 }
 0x364   : > { %5890 = vtanh.f32 %v3425_v23  ;;  %v2927_v30 = vpop.f32.mrf.mxu3  ;;  %v3914_v40 = vmul.f32 %v3882_v53, %v3850_v2  ;;  %v3915_v55 = vmul.f32 %v3883_v46, %v3851_v58  ;;  %v3581_v11 = vunpack.c.h.bf16 %v3552_v43  ;;  %v5885_v18 = vpop.eup %5884 }
 0x365   : > { %v3502_v50 = vunpack.c.l.bf16 %v3473_v12  ;;  %v3503_v59 = vunpack.c.h.bf16 %v3473_v12  ;;  %v2928_v47 = vadd.f32 %v2927_v30, %v2879_v56  ;;  %v5887_v42 = vpop.eup %5886  ;;  %v3612_v29 = vmul.f32 0.5, %v3580_v44 }
 0x366   : > { %v3934_v22 = vpack.c.bf16 %v3914_v40, %v3912_v4  ;;  %v3935_v34 = vpack.c.bf16 %v3915_v55, %v3913_v52  ;;  %v3613_v10 = vmul.f32 0.5, %v3581_v11  ;;  %v3776_v7 = vunpack.c.l.bf16 %v7443_v48 }
 0x367   : > { %v3534_v0 = vadd.f32 1.0, %v3502_v50  ;;  %v3535_v63 = vadd.f32 1.0, %v3503_v59  ;;  %v3075_v16 = vpack.c.bf16 %v3026_v31, %v2928_v47  ;;  %v3825_v41 = vpack.c.bf16 %v5887_v42, %v5885_v18 }
 0x368   : > { %4171 = vmatmul.bf16.gmra.mxu2 %v3934_v22  ;;  %4220 = vmatmul.bf16.gmra.mxu3 %v3935_v34  ;;  %v3632_v28 = vpack.c.bf16 %v3613_v10, %v3612_v29  ;;  %v3777_v39 = vunpack.c.h.bf16 %v7443_v48  ;;  %v3778_v62 = vunpack.c.l.bf16 %v3747_v8  ;;  %v3884_v15 = vunpack.c.l.bf16 %v3824_v57 }
 0x369   : > { %v5889_v25 = vpop.eup %5888  ;;  %v3426_v6 = vunpack.c.l.bf16 %v3075_v16  ;;  %v3427_v32 = vunpack.c.h.bf16 %v3075_v16  ;;  %4269 = vmatmul.bf16.gmra.mxu0 %v3934_v22  ;;  %4318 = vmatmul.bf16.gmra.mxu1 %v3935_v34  ;;  %v3553_v60 = vpack.c.bf16 %v3535_v63, %v3534_v0  ;;  %v3779_v46 = vunpack.c.h.bf16 %v3747_v8 }
 0x36a   : > { %v5891_v3 = vpop.eup %5890  ;;  %v3852_v21 = vunpack.c.l.bf16 %v3632_v28  ;;  %v3853_v53 = vunpack.c.h.bf16 %v3632_v28  ;;  %v3886_v37 = vunpack.c.l.bf16 %v3825_v41  ;;  %v3885_v54 = vunpack.c.h.bf16 %v3824_v57 }
 0x36b   : > { %v3474_v38 = vpack.c.bf16 %v5891_v3, %v5889_v25  ;;  %5892 = vtanh.f32 %v3426_v6  ;;  %v3582_v26 = vunpack.c.l.bf16 %v3553_v60  ;;  %v3583_v45 = vunpack.c.h.bf16 %v3553_v60 }
 0x36c   : > { %5894 = vtanh.f32 %v3427_v32  ;;  %v3887_v14 = vunpack.c.h.bf16 %v3825_v41  ;;  %v3916_v23 = vmul.f32 %v3884_v15, %v3852_v21  ;;  %v3917_v61 = vmul.f32 %v3885_v54, %v3853_v53  ;;  %v3972_v41 = vld [vmem:[%s7714_s6] sm:$0x3] }
 0x36d   : > { %v3504_v27 = vunpack.c.l.bf16 %v3474_v38  ;;  %v3505_v33 = vunpack.c.h.bf16 %v3474_v38  ;;  %v3614_v35 = vmul.f32 0.5, %v3582_v26  ;;  %v3615_v13 = vmul.f32 0.5, %v3583_v45 }
 0x36e   : > { %5896 = vtanh.f32 %v3776_v7 }
 0x36f   : > { %v3536_v36 = vadd.f32 1.0, %v3504_v27  ;;  %v3537_v49 = vadd.f32 1.0, %v3505_v33  ;;  %v3633_v24 = vpack.c.bf16 %v3615_v13, %v3614_v35  ;;  %5898 = vtanh.f32 %v3777_v39 }
 0x370   : > { %5900 = vtanh.f32 %v3778_v62  ;;  %v7631_v39 = vperm.slane %v3972_v41, 1  ;;  %v7640_v35 = vperm.slane %v3972_v41, 0 }
 0x371   : > { %v5893_v19 = vpop.eup %5892  ;;  %v3854_v17 = vunpack.c.l.bf16 %v3633_v24  ;;  %v3855_v48 = vunpack.c.h.bf16 %v3633_v24  ;;  %v3554_v9 = vpack.c.bf16 %v3537_v49, %v3536_v36  ;;  %5902 = vtanh.f32 %v3779_v46 }
 0x372   : > { %v5895_v1 = vpop.eup %5894 }
 0x373   : > { %v3475_v43 = vpack.c.bf16 %v5895_v1, %v5893_v19  ;;  %v3918_v20 = vmul.f32 %v3886_v37, %v3854_v17  ;;  %v3919_v51 = vmul.f32 %v3887_v14, %v3855_v48  ;;  %v3584_v2 = vunpack.c.l.bf16 %v3554_v9 }
 0x374   : > { %v3585_v4 = vunpack.c.h.bf16 %v3554_v9  ;;  %v5897_v58 = vpop.eup %5896 }
 0x375   : > { %v3506_v52 = vunpack.c.l.bf16 %v3475_v43  ;;  %v3507_v12 = vunpack.c.h.bf16 %v3475_v43  ;;  %v3936_v56 = vpack.c.bf16 %v3918_v20, %v3916_v23  ;;  %v3937_v44 = vpack.c.bf16 %v3919_v51, %v3917_v61  ;;  %v5899_v5 = vpop.eup %5898 }
 0x376   : > { %v5901_v30 = vpop.eup %5900  ;;  %v3616_v11 = vmul.f32 0.5, %v3584_v2  ;;  %v3617_v18 = vmul.f32 0.5, %v3585_v4  ;;  %v3826_v22 = vpack.c.bf16 %v5899_v5, %v5897_v58 }
 0x377   : > { %v3538_v40 = vadd.f32 1.0, %v3506_v52  ;;  %v3539_v55 = vadd.f32 1.0, %v3507_v12  ;;  %v5903_v50 = vpop.eup %5902 }
 0x378   : > { %4176 = vmatmul.bf16.gmra.mxu2 %v3936_v56  ;;  %4225 = vmatmul.bf16.gmra.mxu3 %v3937_v44  ;;  %v3634_v42 = vpack.c.bf16 %v3617_v18, %v3616_v11  ;;  %v3827_v34 = vpack.c.bf16 %v5903_v50, %v5901_v30  ;;  %v3888_v8 = vunpack.c.l.bf16 %v3826_v22  ;;  %v3889_v60 = vunpack.c.h.bf16 %v3826_v22 }
 0x379   : > { %4274 = vmatmul.bf16.gmra.mxu0 %v3936_v56  ;;  %4323 = vmatmul.bf16.gmra.mxu1 %v3937_v44  ;;  %v3555_v59 = vpack.c.bf16 %v3539_v55, %v3538_v40 }
 0x37a   : > { %v3856_v63 = vunpack.c.l.bf16 %v3634_v42  ;;  %v3857_v16 = vunpack.c.h.bf16 %v3634_v42  ;;  %v3890_v25 = vunpack.c.l.bf16 %v3827_v34  ;;  %v3891_v3 = vunpack.c.h.bf16 %v3827_v34 }
 0x37b   : > { %v3586_v31 = vunpack.c.l.bf16 %v3555_v59  ;;  %v3587_v47 = vunpack.c.h.bf16 %v3555_v59 }
 0x37c   : > { %v3920_v28 = vmul.f32 %v3888_v8, %v3856_v63  ;;  %v3921_v7 = vmul.f32 %v3889_v60, %v3857_v16 }
 0x37d   : > { %v3618_v29 = vmul.f32 0.5, %v3586_v31  ;;  %v3619_v10 = vmul.f32 0.5, %v3587_v47 }
 0x37f   : > { %v3635_v0 = vpack.c.bf16 %v3619_v10, %v3618_v29 }
 0x381   : > { %v3858_v6 = vunpack.c.l.bf16 %v3635_v0  ;;  %v3859_v32 = vunpack.c.h.bf16 %v3635_v0 }
 0x383   : > { %v3922_v57 = vmul.f32 %v3890_v25, %v3858_v6  ;;  %v3923_v38 = vmul.f32 %v3891_v3, %v3859_v32 }
 0x385   : > { %v3938_v26 = vpack.c.bf16 %v3922_v57, %v3920_v28  ;;  %v3939_v45 = vpack.c.bf16 %v3923_v38, %v3921_v7 }
 0x388   : > { %4181 = vmatmul.bf16.gmra.mxu2 %v3938_v26  ;;  %4230 = vmatmul.bf16.gmra.mxu3 %v3939_v45 }
 0x389   : > { %4279 = vmatmul.bf16.gmra.mxu0 %v3938_v26  ;;  %4328 = vmatmul.bf16.gmra.mxu1 %v3939_v45 }
 0x395   : > { %v4245_v62 = vpop.f32.mrf.mxu0  ;;  %v4294_v27 = vpop.f32.mrf.mxu1 }
 0x396   : > { %v4246_v33 = vadd.f32 %v4245_v62, %v7631_v39 }
 0x398   : > { %v4295_v13 = vadd.f32 %v4294_v27, %v4246_v33 }
 0x39a   : > { %4335 = vst [vmem:[%s7638_s22 + $0x8] sm:$0xff] %v4295_v13  ;;  %v4147_v21 = vpop.f32.mrf.mxu2  ;;  %v4196_v15 = vpop.f32.mrf.mxu3 }
 0x39b   : > { %v4148_v53 = vadd.f32 %v4147_v21, %v7640_v35 }
 0x39d   : > { %v4197_v46 = vadd.f32 %v4196_v15, %v4148_v53  ;;  %v4247_v36 = vpop.f32.mrf.mxu0  ;;  %v4296_v49 = vpop.f32.mrf.mxu1 }
 0x39e   : > { %v4248_v24 = vadd.f32 %v4247_v36, %v7631_v39 }
 0x39f   : > { %4334 = vst [vmem:[%s7638_s22] sm:$0xff] %v4197_v46 }
 0x3a0   : > { %v4297_v37 = vadd.f32 %v4296_v49, %v4248_v24 }
 0x3a2   : > { %4337 = vst [vmem:[%s7638_s22 + $0x18] sm:$0xff] %v4297_v37  ;;  %v4149_v54 = vpop.f32.mrf.mxu2  ;;  %v4198_v14 = vpop.f32.mrf.mxu3 }
 0x3a3   : > { %v4150_v19 = vadd.f32 %v4149_v54, %v7640_v35 }
 0x3a5   : > { %v4199_v17 = vadd.f32 %v4198_v14, %v4150_v19 }
 0x3a6   : > { %v4250_v48 = vpop.f32.mrf.mxu0  ;;  %v4299_v9 = vpop.f32.mrf.mxu1 }
 0x3a7   : > { %v4251_v1 = vadd.f32 %v4250_v48, %v7631_v39  ;;  %4336 = vst [vmem:[%s7638_s22 + $0x10] sm:$0xff] %v4199_v17 }
 0x3a9   : > { %v4300_v23 = vadd.f32 %v4299_v9, %v4251_v1 }
 0x3ab   : > { %4339 = vst [vmem:[%s7638_s22 + $0x28] sm:$0xff] %v4300_v23  ;;  %v4152_v61 = vpop.f32.mrf.mxu2  ;;  %v4201_v43 = vpop.f32.mrf.mxu3 }
 0x3ac   : > { %v4153_v20 = vadd.f32 %v4152_v61, %v7640_v35 }
 0x3ae   : > { %v4202_v51 = vadd.f32 %v4201_v43, %v4153_v20  ;;  %v4252_v2 = vpop.f32.mrf.mxu0  ;;  %v4301_v4 = vpop.f32.mrf.mxu1 }
 0x3af   : > { %v4253_v58 = vadd.f32 %v4252_v2, %v7631_v39 }
 0x3b0   : > { %4338 = vst [vmem:[%s7638_s22 + $0x20] sm:$0xff] %v4202_v51 }
 0x3b1   : > { %v4302_v52 = vadd.f32 %v4301_v4, %v4253_v58 }
 0x3b3   : > { %4341 = vst [vmem:[%s7638_s22 + $0x38] sm:$0xff] %v4302_v52  ;;  %v4154_v12 = vpop.f32.mrf.mxu2  ;;  %v4203_v56 = vpop.f32.mrf.mxu3 }
 0x3b4   : > { %v4155_v44 = vadd.f32 %v4154_v12, %v7640_v35 }
 0x3b6   : > { %v4204_v5 = vadd.f32 %v4203_v56, %v4155_v44  ;;  %v4255_v30 = vpop.f32.mrf.mxu0  ;;  %v4304_v40 = vpop.f32.mrf.mxu1 }
 0x3b7   : > { %v4256_v55 = vadd.f32 %v4255_v30, %v7631_v39 }
 0x3b8   : > { %4340 = vst [vmem:[%s7638_s22 + $0x30] sm:$0xff] %v4204_v5 }
 0x3b9   : > { %v4305_v11 = vadd.f32 %v4304_v40, %v4256_v55 }
 0x3bb   : > { %4343 = vst [vmem:[%s7638_s22 + $0x48] sm:$0xff] %v4305_v11  ;;  %v4157_v18 = vpop.f32.mrf.mxu2  ;;  %v4206_v50 = vpop.f32.mrf.mxu3 }
 0x3bc   : > { %v4158_v59 = vadd.f32 %v4157_v18, %v7640_v35 }
 0x3be   : > { %v4207_v31 = vadd.f32 %v4206_v50, %v4158_v59  ;;  %v4257_v47 = vpop.f32.mrf.mxu0  ;;  %v4306_v42 = vpop.f32.mrf.mxu1 }
 0x3bf   : > { %v4258_v22 = vadd.f32 %v4257_v47, %v7631_v39 }
 0x3c0   : > { %4342 = vst [vmem:[%s7638_s22 + $0x40] sm:$0xff] %v4207_v31 }
 0x3c1   : > { %v4307_v34 = vadd.f32 %v4306_v42, %v4258_v22 }
 0x3c3   : > { %4345 = vst [vmem:[%s7638_s22 + $0x58] sm:$0xff] %v4307_v34  ;;  %v4159_v29 = vpop.f32.mrf.mxu2  ;;  %v4208_v10 = vpop.f32.mrf.mxu3 }
 0x3c4   : > { %v4160_v0 = vadd.f32 %v4159_v29, %v7640_v35 }
 0x3c6   : > { %v4209_v63 = vadd.f32 %v4208_v10, %v4160_v0  ;;  %v4260_v16 = vpop.f32.mrf.mxu0  ;;  %v4309_v8 = vpop.f32.mrf.mxu1 }
 0x3c7   : > { %v4261_v25 = vadd.f32 %v4260_v16, %v7631_v39 }
 0x3c8   : > { %4344 = vst [vmem:[%s7638_s22 + $0x50] sm:$0xff] %v4209_v63 }
 0x3c9   : > { %v4310_v6 = vadd.f32 %v4309_v8, %v4261_v25 }
 0x3cb   : > { %4347 = vst [vmem:[%s7638_s22 + $0x68] sm:$0xff] %v4310_v6  ;;  %v4162_v32 = vpop.f32.mrf.mxu2  ;;  %v4211_v60 = vpop.f32.mrf.mxu3 }
 0x3cc   : > { %v4163_v3 = vadd.f32 %v4162_v32, %v7640_v35 }
 0x3ce   : > { %v4212_v28 = vadd.f32 %v4211_v60, %v4163_v3  ;;  %v4262_v57 = vpop.f32.mrf.mxu0  ;;  %v4311_v7 = vpop.f32.mrf.mxu1 }
 0x3cf   : > { %v4263_v38 = vadd.f32 %v4262_v57, %v7631_v39 }
 0x3d0   : > { %4346 = vst [vmem:[%s7638_s22 + $0x60] sm:$0xff] %v4212_v28 }
 0x3d1   : > { %v4312_v26 = vadd.f32 %v4311_v7, %v4263_v38 }
 0x3d3   : > { %4349 = vst [vmem:[%s7638_s22 + $0x78] sm:$0xff] %v4312_v26  ;;  %v4164_v45 = vpop.f32.mrf.mxu2  ;;  %v4213_v41 = vpop.f32.mrf.mxu3 }
 0x3d4   : > { %v4165_v62 = vadd.f32 %v4164_v45, %v7640_v35 }
 0x3d6   : > { %v4214_v27 = vadd.f32 %v4213_v41, %v4165_v62  ;;  %v4265_v33 = vpop.f32.mrf.mxu0  ;;  %v4314_v13 = vpop.f32.mrf.mxu1 }
 0x3d7   : > { %v4266_v21 = vadd.f32 %v4265_v33, %v7631_v39 }
 0x3d8   : > { %4348 = vst [vmem:[%s7638_s22 + $0x70] sm:$0xff] %v4214_v27 }
 0x3d9   : > { %v4315_v15 = vadd.f32 %v4314_v13, %v4266_v21 }
 0x3db   : > { %4351 = vst [vmem:[%s7638_s22 + $0x88] sm:$0xff] %v4315_v15  ;;  %v4167_v53 = vpop.f32.mrf.mxu2  ;;  %v4216_v46 = vpop.f32.mrf.mxu3 }
 0x3dc   : > { %v4168_v36 = vadd.f32 %v4167_v53, %v7640_v35 }
 0x3de   : > { %v4217_v49 = vadd.f32 %v4216_v46, %v4168_v36  ;;  %v4267_v24 = vpop.f32.mrf.mxu0  ;;  %v4316_v37 = vpop.f32.mrf.mxu1 }
 0x3df   : > { %v4268_v54 = vadd.f32 %v4267_v24, %v7631_v39 }
 0x3e0   : > { %4350 = vst [vmem:[%s7638_s22 + $0x80] sm:$0xff] %v4217_v49 }
 0x3e1   : > { %v4317_v14 = vadd.f32 %v4316_v37, %v4268_v54 }
 0x3e3   : > { %4353 = vst [vmem:[%s7638_s22 + $0x98] sm:$0xff] %v4317_v14  ;;  %v4169_v19 = vpop.f32.mrf.mxu2  ;;  %v4218_v17 = vpop.f32.mrf.mxu3 }
 0x3e4   : > { %v4170_v48 = vadd.f32 %v4169_v19, %v7640_v35 }
 0x3e6   : > { %v4219_v9 = vadd.f32 %v4218_v17, %v4170_v48  ;;  %v4270_v1 = vpop.f32.mrf.mxu0  ;;  %v4319_v23 = vpop.f32.mrf.mxu1 }
 0x3e7   : > { %v4271_v61 = vadd.f32 %v4270_v1, %v7631_v39 }
 0x3e8   : > { %4352 = vst [vmem:[%s7638_s22 + $0x90] sm:$0xff] %v4219_v9 }
 0x3e9   : > { %v4320_v43 = vadd.f32 %v4319_v23, %v4271_v61 }
 0x3eb   : > { %4355 = vst [vmem:[%s7638_s22 + $0xa8] sm:$0xff] %v4320_v43  ;;  %v4172_v20 = vpop.f32.mrf.mxu2  ;;  %v4221_v51 = vpop.f32.mrf.mxu3 }
 0x3ec   : > { %v4173_v2 = vadd.f32 %v4172_v20, %v7640_v35 }
 0x3ee   : > { %v4222_v4 = vadd.f32 %v4221_v51, %v4173_v2  ;;  %v4272_v58 = vpop.f32.mrf.mxu0  ;;  %v4321_v52 = vpop.f32.mrf.mxu1 }
 0x3ef   : > { %v4273_v12 = vadd.f32 %v4272_v58, %v7631_v39 }
 0x3f0   : > { %4354 = vst [vmem:[%s7638_s22 + $0xa0] sm:$0xff] %v4222_v4 }
 0x3f1   : > { %v4322_v56 = vadd.f32 %v4321_v52, %v4273_v12 }
 0x3f3   : > { %4357 = vst [vmem:[%s7638_s22 + $0xb8] sm:$0xff] %v4322_v56  ;;  %v4174_v44 = vpop.f32.mrf.mxu2  ;;  %v4223_v5 = vpop.f32.mrf.mxu3 }
 0x3f4   : > { %v4175_v30 = vadd.f32 %v4174_v44, %v7640_v35 }
 0x3f6   : > { %v4224_v40 = vadd.f32 %v4223_v5, %v4175_v30  ;;  %v4275_v55 = vpop.f32.mrf.mxu0  ;;  %v4324_v11 = vpop.f32.mrf.mxu1 }
 0x3f7   : > { %v4276_v18 = vadd.f32 %v4275_v55, %v7631_v39 }
 0x3f8   : > { %4356 = vst [vmem:[%s7638_s22 + $0xb0] sm:$0xff] %v4224_v40 }
 0x3f9   : > { %v4325_v50 = vadd.f32 %v4324_v11, %v4276_v18 }
 0x3fb   : > { %4359 = vst [vmem:[%s7638_s22 + $0xc8] sm:$0xff] %v4325_v50  ;;  %v4177_v59 = vpop.f32.mrf.mxu2  ;;  %v4226_v31 = vpop.f32.mrf.mxu3 }
 0x3fc   : > { %v4178_v47 = vadd.f32 %v4177_v59, %v7640_v35 }
 0x3fe   : > { %v4227_v42 = vadd.f32 %v4226_v31, %v4178_v47  ;;  %v4277_v22 = vpop.f32.mrf.mxu0  ;;  %v4326_v34 = vpop.f32.mrf.mxu1 }
 0x3ff   : > { %v4278_v29 = vadd.f32 %v4277_v22, %v7631_v39 }
 0x400   : > { %4358 = vst [vmem:[%s7638_s22 + $0xc0] sm:$0xff] %v4227_v42 }
 0x401   : > { %v4327_v10 = vadd.f32 %v4326_v34, %v4278_v29 }
 0x403   : > { %4361 = vst [vmem:[%s7638_s22 + $0xd8] sm:$0xff] %v4327_v10  ;;  %v4179_v0 = vpop.f32.mrf.mxu2  ;;  %v4228_v63 = vpop.f32.mrf.mxu3 }
 0x404   : > { %v4180_v16 = vadd.f32 %v4179_v0, %v7640_v35 }
 0x406   : > { %v4229_v8 = vadd.f32 %v4228_v63, %v4180_v16  ;;  %v4280_v25 = vpop.f32.mrf.mxu0  ;;  %v4329_v6 = vpop.f32.mrf.mxu1 }
 0x407   : > { %v4281_v32 = vadd.f32 %v4280_v25, %v7631_v39 }
 0x408   : > { %4360 = vst [vmem:[%s7638_s22 + $0xd0] sm:$0xff] %v4229_v8 }
 0x409   : > { %v4330_v60 = vadd.f32 %v4329_v6, %v4281_v32 }
 0x40b   : > { %4363 = vst [vmem:[%s7638_s22 + $0xe8] sm:$0xff] %v4330_v60  ;;  %v4182_v3 = vpop.f32.mrf.mxu2  ;;  %v4231_v28 = vpop.f32.mrf.mxu3 }
 0x40c   : > { %v4183_v57 = vadd.f32 %v4182_v3, %v7640_v35 }
 0x40e   : > { %v4232_v7 = vadd.f32 %v4231_v28, %v4183_v57  ;;  %v4282_v38 = vpop.f32.mrf.mxu0  ;;  %v4331_v45 = vpop.f32.mrf.mxu1 }
 0x40f   : > { %v4283_v26 = vadd.f32 %v4282_v38, %v7631_v39 }
 0x410   : > { %4362 = vst [vmem:[%s7638_s22 + $0xe0] sm:$0xff] %v4232_v7 }
 0x411   : > { %v4332_v41 = vadd.f32 %v4331_v45, %v4283_v26 }
 0x413   : > { %4365 = vst [vmem:[%s7638_s22 + $0xf8] sm:$0xff] %v4332_v41  ;;  %v4184_v62 = vpop.f32.mrf.mxu2  ;;  %v4233_v33 = vpop.f32.mrf.mxu3 }
 0x414   : > { %v4185_v27 = vadd.f32 %v4184_v62, %v7640_v35 }
 0x416   : > { %v4234_v13 = vadd.f32 %v4233_v33, %v4185_v27 }
 0x418   : > { %4364 = vst [vmem:[%s7638_s22 + $0xf0] sm:$0xff] %v4234_v13 }
 0x419 PF: > { %s19_s24 = sadd.s32 1, %s5979_s24  }
 0x41a   : > { %p16_p7 = scmp.ge.s32.totalorder %s19_s24, 4  }
 0x41c   :  { %18 = sbr.rel (!%p16_p7) target bundleno = 2 (0x2), region = 87 }
 0x421   :  { %4390 = vsyncpa [#allocation3], 1 }
 0x422   :  { %4392 = vsyncpa [#allocation3 + $0x1], 1 }
 0x423   :  { %4393 = vsyncpa [#allocation5], 1 }

</bundles_post_ra>
